<compile_context>
chip_gen: v7x
topology: tpu7x:2x2x1
jax: 0.10.0
libtpu: 0.0.40
codegen_flags: <defaults>
</compile_context>

<pallas_src>
import math
import functools

import numpy as np
import jax
import jax.numpy as jnp
from jax.experimental import pallas as pl
from jax.experimental.pallas import tpu as pltpu

# ------------------------- small, module-consistent hyper-params -------------------------
IN_DIM = 16
N_EMBD = 32
HEADS = 4
HEAD_DIM = N_EMBD // HEADS
N_LAYERS = [0, 2]          # -> one encoder stack (down=2, conv), one decoder stack (up=2, conv)
N_BLOCKS = N_LAYERS[1]
E_DIM = 16
N_E = 8
N_CODEBOOK = 1
BETA = 1.0
BLOCK_SIZE = 64
SEQ_LEN = 8
BATCH = 2
ONE_CODEBOOK_SIZE = N_E // N_CODEBOOK

T = SEQ_LEN
T2 = T // 2
BT = BATCH * T            # flattened full-resolution rows
M = BATCH * T2            # flattened half-resolution rows
C = N_EMBD
NEG = -1e30

ENC_TAGS = [f"e{i}" for i in range(N_BLOCKS)]
DEC_TAGS = [f"d{i}" for i in range(N_BLOCKS)]


# ====================================== kernel helpers ======================================
def _ln(v, g, b):
    """Row-wise LayerNorm of [R, C] with [1, C] gain/bias (eps matches PyTorch)."""
    mu = jnp.mean(v, axis=-1, keepdims=True)
    vc = v - mu
    var = jnp.mean(vc * vc, axis=-1, keepdims=True)
    return vc * jax.lax.rsqrt(var + 1e-5) * g + b


def _rot_down(x):   # out[r] = x[r-1]  (row 0 wraps; caller zeroes batch-boundary rows)
    return jnp.concatenate([x[-1:, :], x[:-1, :]], axis=0)


def _rot_up(x):     # out[r] = x[r+1]  (last row wraps; caller zeroes batch-boundary rows)
    return jnp.concatenate([x[1:, :], x[:1, :]], axis=0)


# ====================================== fused kernel ======================================
def _vqvae_kernel(x_ref, fmask_ref, bias_ref, vqv_ref,
                  w32_ref, w128_ref, w16_ref, vec_ref,
                  out_ref, idx_ref, zl_ref, *, offs):
    f32 = jnp.float32
    V = vec_ref[...]                                    # all 1-D params, one row each

    def vec(name, w=C):
        o = offs["vec"][name]
        return V[o:o + 1, :w]

    def m32(name, rows=C):
        o = offs["w32"][name]
        return w32_ref[o:o + rows, :]

    def m128(name):
        o = offs["w128"][name]
        return w128_ref[o:o + C, :]

    def m16(name, rows):
        o = offs["w16"][name]
        return w16_ref[o:o + rows, :]

    # static per-head lane masks (heads tile the lane axis in HEAD_DIM-wide slices)
    lane = jax.lax.broadcasted_iota(jnp.int32, (1, C), 1)
    hm = [((lane >= h * HEAD_DIM) & (lane < (h + 1) * HEAD_DIM)).astype(f32)
          for h in range(HEADS)]
    attn_bias = bias_ref[...]                           # [H*M, M]: 0 valid / -1e30 invalid
    scale = 1.0 / math.sqrt(HEAD_DIM)

    # ------------------------------- fused pre-LN GPT block -------------------------------
    def block(x, tag):
        hn = _ln(x, vec(f"{tag}.ln1_g"), vec(f"{tag}.ln1_b"))
        q = jnp.dot(hn, m32(f"{tag}.wq"), preferred_element_type=f32) + vec(f"{tag}.bq")
        k = jnp.dot(hn, m32(f"{tag}.wk"), preferred_element_type=f32) + vec(f"{tag}.bk")
        v = jnp.dot(hn, m32(f"{tag}.wv"), preferred_element_type=f32) + vec(f"{tag}.bv")
        # Per-head scores with ONE dot: head-masked queries stacked on sublanes.
        qs = jnp.concatenate([q * hm[h] for h in range(HEADS)], axis=0)         # [H*M, C]
        s = jax.lax.dot_general(qs, k, (((1,), (1,)), ((), ())),
                                preferred_element_type=f32) * scale            # [H*M, M]
        s = s + attn_bias
        mx = jnp.max(s, axis=-1, keepdims=True)
        ex = jnp.exp(s - mx)
        den = jnp.sum(ex, axis=-1, keepdims=True)
        p = ex * pl.reciprocal(den, approx=True)
        of = jnp.dot(p, v, preferred_element_type=f32)                          # [H*M, C]
        o = of[0:M, :] * hm[0]
        for h in range(1, HEADS):
            o = o + of[h * M:(h + 1) * M, :] * hm[h]                            # [M, C]
        x = x + jnp.dot(o, m32(f"{tag}.wo"), preferred_element_type=f32) + vec(f"{tag}.bo")
        h2 = _ln(x, vec(f"{tag}.ln2_g"), vec(f"{tag}.ln2_b"))
        # TODO(synk): PyTorch nn.GELU() default is exact erf; tanh approximation used here.
        mh = jax.nn.gelu(jnp.dot(h2, m128(f"{tag}.w1"), preferred_element_type=f32)
                         + vec(f"{tag}.b1", 4 * C), approximate=True)
        x = x + jnp.dot(mh, m32(f"{tag}.w2", 4 * C), preferred_element_type=f32) \
              + vec(f"{tag}.b2")
        return x

    # ---------------- encoder: emb -> masked Conv1d(k3,p1) -> MaxPool1d(2) ----------------
    x = x_ref[...]                                           # [BT, IN]
    fm = fmask_ref[...]                                      # [BT, 1]
    e = (jnp.dot(x, m32("emb_w", IN_DIM), preferred_element_type=f32) + vec("emb_b")) * fm

    rid = jax.lax.broadcasted_iota(jnp.int32, (BT, 1), 0)
    nf = jnp.ones((BT, 1), f32)
    nl = jnp.ones((BT, 1), f32)
    for b in range(BATCH):                                   # zero the conv halo at batch edges
        nf = nf * (rid != b * T).astype(f32)
        nl = nl * (rid != b * T + T - 1).astype(f32)
    e_prev = _rot_down(e) * nf
    e_next = _rot_up(e) * nl
    conv = (jnp.dot(e_prev, m32("cw0"), preferred_element_type=f32)
            + jnp.dot(e, m32("cw1"), preferred_element_type=f32)
            + jnp.dot(e_next, m32("cw2"), preferred_element_type=f32)
            + vec("conv_b"))
    h = jnp.max(conv.reshape(M, 2, C), axis=1)               # MaxPool1d(2) over time

    # ---------------- encoder blocks + ln_f + head ----------------
    h = h + m32("pe", M)                                     # sine_frozen PE at block 0
    for tag in ENC_TAGS:
        h = block(h, tag)
    hid = jnp.dot(_ln(h, vec("enc_lnf_g"), vec("enc_lnf_b")), m32("enc_head"),
                  preferred_element_type=f32)

    # ---------------- quant_emb + vector quantization ----------------
    z = jnp.dot(hid, m16("quant_emb_w", C), preferred_element_type=f32) \
        + vec("quant_emb_b", E_DIM)
    cb = m16("codebook", N_E)                                # [K, D]
    ze = jax.lax.dot_general(z, cb, (((1,), (1,)), ((), ())), preferred_element_type=f32)
    d = jnp.sum(z * z, axis=-1, keepdims=True) + vec("esq", N_E) - 2.0 * ze
    idx = jnp.argmin(d, axis=-1).astype(jnp.int32)           # [M]
    onehot = (idx[:, None] == jax.lax.broadcasted_iota(jnp.int32, (M, N_E), 1)).astype(f32)
    zq = jnp.dot(onehot, cb, preferred_element_type=f32)     # gather via matmul, [M, D]
    vqv = vqv_ref[...]                                       # [M, 1] pooled validity
    # TODO(synk): forward value of beta*||sg(zq)-z||^2 + ||zq-sg(z)||^2 (no straight-through).
    loss = (1.0 + BETA) * jnp.mean((zq - z) ** 2, axis=-1, keepdims=True)
    num = jnp.sum(loss * vqv, axis=0, keepdims=True)
    den2 = jnp.sum(vqv, axis=0, keepdims=True)
    zl_ref[...] = num / jnp.maximum(den2, 1.0)               # guard all-invalid 0/0
    idx_ref[...] = jnp.where(vqv > 0.5, idx.reshape(M, 1), -1)
    zq = zq * vqv

    # ---------------- decoder blocks ----------------
    h = jnp.dot(zq, m32("post_quant_w", E_DIM), preferred_element_type=f32) \
        + vec("post_quant_b")
    h = h + m32("pe", M)
    for tag in DEC_TAGS:
        h = block(h, tag)

    # ------- ConvTranspose1d(k4,s2,p1) up-sample + ln_f + head + regressor -------
    rid2 = jax.lax.broadcasted_iota(jnp.int32, (M, 1), 0)
    nf2 = jnp.ones((M, 1), f32)
    nl2 = jnp.ones((M, 1), f32)
    for b in range(BATCH):
        nf2 = nf2 * (rid2 != b * T2).astype(f32)
        nl2 = nl2 * (rid2 != b * T2 + T2 - 1).astype(f32)
    h_prev = _rot_down(h) * nf2
    h_next = _rot_up(h) * nl2
    up_b = vec("up_b")
    # y[2t] = x[t]W1 + x[t-1]W3 + b ; y[2t+1] = x[t]W2 + x[t+1]W0 + b
    even = (jnp.dot(h, m32("uw1"), preferred_element_type=f32)
            + jnp.dot(h_prev, m32("uw3"), preferred_element_type=f32) + up_b)
    odd = (jnp.dot(h, m32("uw2"), preferred_element_type=f32)
           + jnp.dot(h_next, m32("uw0"), preferred_element_type=f32) + up_b)

    def head_reg(y):
        y = jnp.dot(_ln(y, vec("dec_lnf_g"), vec("dec_lnf_b")), m32("dec_head"),
                    preferred_element_type=f32)
        r = jnp.maximum(jnp.dot(y, m32("reg_w1"), preferred_element_type=f32)
                        + vec("reg_b1"), 0.0)
        return jnp.dot(r, m16("reg_w2", C), preferred_element_type=f32) + vec("reg_b2", IN_DIM)

    # even|odd lane-concatenated; the time interleave is one cheap XLA reshape outside.
    out_ref[...] = jnp.concatenate([head_reg(even), head_reg(odd)], axis=-1)   # [M, 2*IN]


# ==================================== forward wrapper ====================================
def transformer_vqvae_forward(packed, x, valid_frame, *, offs):
    """Mirrors TransformerVQVAE.forward(batch0) with quant_prop=1.0 (inference)."""
    B = BATCH
    mask = valid_frame.astype(jnp.float32)                       # [B, T]
    fmask = mask.reshape(BT, 1)
    mask_e = jnp.max(mask.reshape(B, T2, 2), axis=-1)            # pooled validity [B, T2]
    vq_valid = mask_e.reshape(M, 1)

    # block-diagonal (same-batch) x key-validity additive attention bias, head-tiled
    bid = jnp.repeat(jnp.arange(B, dtype=jnp.int32), T2)         # [M]
    same = bid[:, None] == bid[None, :]
    keyok = vq_valid.reshape(1, M) > 0.5
    bias = jnp.where(same & keyok, 0.0, NEG).astype(jnp.float32)  # [M, M]
    attn_bias = jnp.tile(bias, (HEADS, 1))                       # [H*M, M]

    vm = pl.BlockSpec(memory_space=pltpu.MemorySpace.VMEM)
    out_pack, idx, zloss = pl.pallas_call(
        functools.partial(_vqvae_kernel, offs=offs),
        out_shape=(jax.ShapeDtypeStruct((M, 2 * IN_DIM), jnp.float32),
                   jax.ShapeDtypeStruct((M, 1), jnp.int32),
                   jax.ShapeDtypeStruct((1, 1), jnp.float32)),
        in_specs=[vm] * 8,
        out_specs=(vm, vm, vm),
    )(x.reshape(BT, IN_DIM), fmask, attn_bias, vq_valid,
      packed["w32"], packed["w128"], packed["w16"], packed["vecs"])

    # interleave even/odd time steps (layout only, done in XLA)
    re = out_pack[:, :IN_DIM].reshape(B, T2, IN_DIM)
    ro = out_pack[:, IN_DIM:].reshape(B, T2, IN_DIM)
    out = jnp.stack([re, ro], axis=2).reshape(B, T, IN_DIM)

    idx = idx.reshape(B, T2, N_CODEBOOK)
    kl = math.log(ONE_CODEBOOK_SIZE) * jnp.ones(idx.shape, jnp.float32)
    return out, {"quant_loss": zloss[0, 0], "kl": kl,
                 "kl_valid": mask_e.astype(jnp.int32)}, idx


# ==================================== parameter packing ====================================
def _pack_rows(entries, width):
    """entries: [(name, array with <=width cols)]. Returns (jnp [R,width], {name: row_off})."""
    rows, offsets, n = [], {}, 0
    for name, a in entries:
        a = np.asarray(a, np.float32)
        if a.ndim == 1:
            a = a[None, :]
        r, w = a.shape
        if w < width:
            a = np.concatenate([a, np.zeros((r, width - w), np.float32)], axis=1)
        rows.append(a)
        offsets[name] = n
        n += r
    return jnp.asarray(np.concatenate(rows, axis=0)), offsets


def pack_params(params):
    enc, dec = params["encoder"], params["decoder"]
    blocks = [(t, enc["blocks"][i]) for i, t in enumerate(ENC_TAGS)] + \
             [(t, dec["blocks"][i]) for i, t in enumerate(DEC_TAGS)]
    # encoder/decoder PE buffers are both sine_frozen with identical values -> shared rows
    pe_flat = np.tile(np.asarray(enc["pe"])[0, :T2, :], (BATCH, 1))              # [M, C]

    w32_entries = [("emb_w", params["emb_w"]), ("pe", pe_flat),
                   ("cw0", enc["down"]["w0"]), ("cw1", enc["down"]["w1"]),
                   ("cw2", enc["down"]["w2"])]
    for tag, bp in blocks:
        w32_entries += [(f"{tag}.wq", bp["wq"]), (f"{tag}.wk", bp["wk"]),
                        (f"{tag}.wv", bp["wv"]), (f"{tag}.wo", bp["wo"]),
                        (f"{tag}.w2", bp["w2"])]
    w32_entries += [("enc_head", enc["head_w"]),
                    ("post_quant_w", params["post_quant_w"]),
                    ("uw0", dec["up"]["w0"]), ("uw1", dec["up"]["w1"]),
                    ("uw2", dec["up"]["w2"]), ("uw3", dec["up"]["w3"]),
                    ("dec_head", dec["head_w"]),
                    ("reg_w1", params["reg_w1"])]
    w32, o32 = _pack_rows(w32_entries, 32)

    w128, o128 = _pack_rows([(f"{tag}.w1", bp["w1"]) for tag, bp in blocks], 128)

    w16, o16 = _pack_rows([("quant_emb_w", params["quant_emb_w"]),
                           ("reg_w2", params["reg_w2"]),
                           ("codebook", params["codebook"])], 16)

    esq = np.sum(np.asarray(params["codebook"]) ** 2, axis=-1)                   # [K]
    vec_entries = [("emb_b", params["emb_b"]), ("conv_b", enc["down"]["b"])]
    for tag, bp in blocks:
        for nm in ["ln1_g", "ln1_b", "bq", "bk", "bv", "bo",
                   "ln2_g", "ln2_b", "b1", "b2"]:
            vec_entries.append((f"{tag}.{nm}", bp[nm]))
    vec_entries += [("enc_lnf_g", enc["lnf_g"]), ("enc_lnf_b", enc["lnf_b"]),
                    ("quant_emb_b", params["quant_emb_b"]), ("esq", esq),
                    ("post_quant_b", params["post_quant_b"]),
                    ("dec_lnf_g", dec["lnf_g"]), ("dec_lnf_b", dec["lnf_b"]),
                    ("up_b", dec["up"]["b"]),
                    ("reg_b1", params["reg_b1"]), ("reg_b2", params["reg_b2"])]
    vecs, ov = _pack_rows(vec_entries, 128)

    packed = {"w32": w32, "w128": w128, "w16": w16, "vecs": vecs}
    offs = {"w32": o32, "w128": o128, "w16": o16, "vec": ov}
    return packed, offs


# ==================================== deterministic init ====================================
def _normal(key, shape, std=0.02):
    return std * jax.random.normal(key, shape, jnp.float32)


def sine_pe(max_len, dim):
    rest = dim % 2
    pe = np.zeros((max_len, dim + rest), dtype=np.float32)
    position = np.arange(max_len, dtype=np.float32)[:, None]
    div_term = np.exp(np.arange(0, dim + rest, 2, dtype=np.float32)
                      * (-math.log(10000.0) / (dim + rest)))
    pe[:, 0::2] = np.sin(position * div_term)
    pe[:, 1::2] = np.cos(position * div_term)
    return jnp.asarray(pe[None, :, :dim])


def init_block(key, c):
    ks = jax.random.split(key, 6)
    return {
        "ln1_g": jnp.ones((c,)), "ln1_b": jnp.zeros((c,)),
        "wq": _normal(ks[0], (c, c)), "bq": jnp.zeros((c,)),
        "wk": _normal(ks[1], (c, c)), "bk": jnp.zeros((c,)),
        "wv": _normal(ks[2], (c, c)), "bv": jnp.zeros((c,)),
        "wo": _normal(ks[3], (c, c)), "bo": jnp.zeros((c,)),
        "ln2_g": jnp.ones((c,)), "ln2_b": jnp.zeros((c,)),
        "w1": _normal(ks[4], (c, 4 * c)), "b1": jnp.zeros((4 * c,)),
        "w2": _normal(ks[5], (4 * c, c)), "b2": jnp.zeros((c,)),
    }


def init_stack(key, n_layer, c, block_size, down, up):
    ks = jax.random.split(key, n_layer + 3)
    sp = {
        "blocks": [init_block(ks[i], c) for i in range(n_layer)],
        "pe": sine_pe(block_size, c),
        "lnf_g": jnp.ones((c,)), "lnf_b": jnp.zeros((c,)),
        "head_w": _normal(ks[n_layer], (c, c)),
    }
    if down:
        kd = jax.random.split(ks[n_layer + 1], 3)
        sp["down"] = {"w0": _normal(kd[0], (c, c)), "w1": _normal(kd[1], (c, c)),
                      "w2": _normal(kd[2], (c, c)), "b": jnp.zeros((c,))}
    if up:
        ku = jax.random.split(ks[n_layer + 2], 4)
        sp["up"] = {"w0": _normal(ku[0], (c, c)), "w1": _normal(ku[1], (c, c)),
                    "w2": _normal(ku[2], (c, c)), "w3": _normal(ku[3], (c, c)),
                    "b": jnp.zeros((c,))}
    return sp


def init_params(key):
    ks = jax.random.split(key, 8)
    return {
        "emb_w": _normal(ks[0], (IN_DIM, N_EMBD)), "emb_b": jnp.zeros((N_EMBD,)),
        "encoder": init_stack(ks[1], N_BLOCKS, N_EMBD, BLOCK_SIZE, down=True, up=False),
        "quant_emb_w": _normal(ks[2], (N_EMBD, E_DIM)), "quant_emb_b": jnp.zeros((E_DIM,)),
        "codebook": jax.random.uniform(ks[3], (N_E, E_DIM), jnp.float32, -1.0 / N_E, 1.0 / N_E),
        "post_quant_w": _normal(ks[4], (E_DIM, N_EMBD)), "post_quant_b": jnp.zeros((N_EMBD,)),
        "decoder": init_stack(ks[5], N_BLOCKS, N_EMBD, BLOCK_SIZE, down=False, up=True),
        "reg_w1": _normal(ks[6], (N_EMBD, N_EMBD)), "reg_b1": jnp.zeros((N_EMBD,)),
        "reg_w2": _normal(ks[7], (N_EMBD, IN_DIM)), "reg_b2": jnp.zeros((IN_DIM,)),
    }


# ========================================== main ==========================================
if __name__ == "__main__":
    key = jax.random.PRNGKey(0)
    kp, kx = jax.random.split(key)
    params = init_params(kp)
    packed, offs = pack_params(params)          # one-time host-side weight packing

    # batch0 = {'batch_seq_hand_comp_gt': x, 'valid_frame': valid}
    x = jax.random.normal(kx, (BATCH, SEQ_LEN, IN_DIM), jnp.float32)
    valid = jnp.ones((BATCH, SEQ_LEN), jnp.int32).at[1, 6:].set(0)

    fwd = jax.jit(functools.partial(transformer_vqvae_forward, offs=offs))
    out_comp, losses, indices = fwd(packed, x, valid)
    out_comp, losses, indices = jax.block_until_ready((out_comp, losses, indices))

    assert out_comp.shape == (BATCH, SEQ_LEN, IN_DIM)
    assert indices.shape == (BATCH, SEQ_LEN // 2, N_CODEBOOK)
    assert losses["kl"].shape == indices.shape
    assert losses["kl_valid"].shape == (BATCH, SEQ_LEN // 2)
    assert np.isfinite(np.asarray(out_comp)).all()
    assert np.isfinite(float(losses["quant_loss"]))
    print("KERNEL_OK")
</pallas_src>

<mosaic_0001>
module attributes {stable_mosaic.version = 11 : i64} {
  func.func @_vqvae_kernel(%arg0: memref<16x16xf32, #tpu.memory_space<vmem>>, %arg1: memref<16x1xf32, #tpu.memory_space<vmem>>, %arg2: memref<32x8xf32, #tpu.memory_space<vmem>>, %arg3: memref<8x1xf32, #tpu.memory_space<vmem>>, %arg4: memref<1384x32xf32, #tpu.memory_space<vmem>>, %arg5: memref<128x128xf32, #tpu.memory_space<vmem>>, %arg6: memref<72x16xf32, #tpu.memory_space<vmem>>, %arg7: memref<52x128xf32, #tpu.memory_space<vmem>>, %arg8: memref<8x32xf32, #tpu.memory_space<vmem>>, %arg9: memref<8x1xi32, #tpu.memory_space<vmem>>, %arg10: memref<1x1xf32, #tpu.memory_space<vmem>>) attributes {dimension_semantics = [], scalar_prefetch = 0 : i64, scratch_operands = 0 : i64, tpu.core_type = #tpu.core_type<tc>} {
    %c0 = arith.constant 0 : index
    %c0_0 = arith.constant 0 : index
    %0 = vector.load %arg7[%c0, %c0_0] : memref<52x128xf32, #tpu.memory_space<vmem>>, vector<52x128xf32>
    %1 = tpu.iota {dimensions = array<i32: 1>} : vector<1x32xi32>
    %c0_i32 = arith.constant 0 : i32
    %2 = vector.broadcast %c0_i32 : i32 to vector<1x32xi32>
    %3 = arith.cmpi sge, %1, %2 : vector<1x32xi32>
    %c8_i32 = arith.constant 8 : i32
    %4 = vector.broadcast %c8_i32 : i32 to vector<1x32xi32>
    %5 = arith.cmpi slt, %1, %4 : vector<1x32xi32>
    %6 = arith.andi %3, %5 : vector<1x32xi1>
    %7 = arith.extui %6 : vector<1x32xi1> to vector<1x32xi32>
    %8 = arith.sitofp %7 : vector<1x32xi32> to vector<1x32xf32>
    %c8_i32_1 = arith.constant 8 : i32
    %9 = vector.broadcast %c8_i32_1 : i32 to vector<1x32xi32>
    %10 = arith.cmpi sge, %1, %9 : vector<1x32xi32>
    %c16_i32 = arith.constant 16 : i32
    %11 = vector.broadcast %c16_i32 : i32 to vector<1x32xi32>
    %12 = arith.cmpi slt, %1, %11 : vector<1x32xi32>
    %13 = arith.andi %10, %12 : vector<1x32xi1>
    %14 = arith.extui %13 : vector<1x32xi1> to vector<1x32xi32>
    %15 = arith.sitofp %14 : vector<1x32xi32> to vector<1x32xf32>
    %c16_i32_2 = arith.constant 16 : i32
    %16 = vector.broadcast %c16_i32_2 : i32 to vector<1x32xi32>
    %17 = arith.cmpi sge, %1, %16 : vector<1x32xi32>
    %c24_i32 = arith.constant 24 : i32
    %18 = vector.broadcast %c24_i32 : i32 to vector<1x32xi32>
    %19 = arith.cmpi slt, %1, %18 : vector<1x32xi32>
    %20 = arith.andi %17, %19 : vector<1x32xi1>
    %21 = arith.extui %20 : vector<1x32xi1> to vector<1x32xi32>
    %22 = arith.sitofp %21 : vector<1x32xi32> to vector<1x32xf32>
    %c24_i32_3 = arith.constant 24 : i32
    %23 = vector.broadcast %c24_i32_3 : i32 to vector<1x32xi32>
    %24 = arith.cmpi sge, %1, %23 : vector<1x32xi32>
    %c32_i32 = arith.constant 32 : i32
    %25 = vector.broadcast %c32_i32 : i32 to vector<1x32xi32>
    %26 = arith.cmpi slt, %1, %25 : vector<1x32xi32>
    %27 = arith.andi %24, %26 : vector<1x32xi1>
    %28 = arith.extui %27 : vector<1x32xi1> to vector<1x32xi32>
    %29 = arith.sitofp %28 : vector<1x32xi32> to vector<1x32xf32>
    %c0_4 = arith.constant 0 : index
    %c0_5 = arith.constant 0 : index
    %30 = vector.load %arg2[%c0_4, %c0_5] : memref<32x8xf32, #tpu.memory_space<vmem>>, vector<32x8xf32>
    %c0_6 = arith.constant 0 : index
    %c0_7 = arith.constant 0 : index
    %31 = vector.load %arg0[%c0_6, %c0_7] : memref<16x16xf32, #tpu.memory_space<vmem>>, vector<16x16xf32>
    %c0_8 = arith.constant 0 : index
    %c0_9 = arith.constant 0 : index
    %32 = vector.load %arg1[%c0_8, %c0_9] : memref<16x1xf32, #tpu.memory_space<vmem>>, vector<16x1xf32>
    %c0_10 = arith.constant 0 : index
    %c0_11 = arith.constant 0 : index
    %33 = vector.load %arg4[%c0_10, %c0_11] : memref<1384x32xf32, #tpu.memory_space<vmem>>, vector<16x32xf32>
    %cst = arith.constant dense<0.000000e+00> : vector<16x32xf32>
    %34 = tpu.matmul %31, %33, %cst {dimension_numbers = #tpu.dot_dimension_numbers<[1], [0], [0], [1], [0, 0, 1, 1], [], []>} : vector<16x16xf32>, vector<16x32xf32>, vector<16x32xf32> -> vector<16x32xf32>
    %35 = vector.extract_strided_slice %0 {offsets = [0, 0], sizes = [1, 32], strides = [1, 1]} : vector<52x128xf32> to vector<1x32xf32>
    %36 = vector.broadcast %35 : vector<1x32xf32> to vector<16x32xf32>
    %37 = arith.addf %34, %36 : vector<16x32xf32>
    %38 = vector.broadcast %32 : vector<16x1xf32> to vector<16x32xf32>
    %39 = arith.mulf %37, %38 : vector<16x32xf32>
    %40 = tpu.iota {dimensions = array<i32: 0>} : vector<16x1xi32>
    %cst_12 = arith.constant 1.000000e+00 : f32
    %41 = vector.broadcast %cst_12 : f32 to vector<16x1xf32>
    %cst_13 = arith.constant 1.000000e+00 : f32
    %42 = vector.broadcast %cst_13 : f32 to vector<16x1xf32>
    %c0_i32_14 = arith.constant 0 : i32
    %43 = vector.broadcast %c0_i32_14 : i32 to vector<16x1xi32>
    %44 = arith.cmpi ne, %40, %43 : vector<16x1xi32>
    %45 = arith.extui %44 : vector<16x1xi1> to vector<16x1xi32>
    %46 = arith.sitofp %45 : vector<16x1xi32> to vector<16x1xf32>
    %47 = arith.mulf %41, %46 : vector<16x1xf32>
    %c7_i32 = arith.constant 7 : i32
    %48 = vector.broadcast %c7_i32 : i32 to vector<16x1xi32>
    %49 = arith.cmpi ne, %40, %48 : vector<16x1xi32>
    %50 = arith.extui %49 : vector<16x1xi1> to vector<16x1xi32>
    %51 = arith.sitofp %50 : vector<16x1xi32> to vector<16x1xf32>
    %52 = arith.mulf %42, %51 : vector<16x1xf32>
    %c8_i32_15 = arith.constant 8 : i32
    %53 = vector.broadcast %c8_i32_15 : i32 to vector<16x1xi32>
    %54 = arith.cmpi ne, %40, %53 : vector<16x1xi32>
    %55 = arith.extui %54 : vector<16x1xi1> to vector<16x1xi32>
    %56 = arith.sitofp %55 : vector<16x1xi32> to vector<16x1xf32>
    %57 = arith.mulf %47, %56 : vector<16x1xf32>
    %c15_i32 = arith.constant 15 : i32
    %58 = vector.broadcast %c15_i32 : i32 to vector<16x1xi32>
    %59 = arith.cmpi ne, %40, %58 : vector<16x1xi32>
    %60 = arith.extui %59 : vector<16x1xi1> to vector<16x1xi32>
    %61 = arith.sitofp %60 : vector<16x1xi32> to vector<16x1xf32>
    %62 = arith.mulf %52, %61 : vector<16x1xf32>
    %63 = vector.extract_strided_slice %39 {offsets = [15, 0], sizes = [1, 32], strides = [1, 1]} : vector<16x32xf32> to vector<1x32xf32>
    %64 = vector.extract_strided_slice %39 {offsets = [0, 0], sizes = [15, 32], strides = [1, 1]} : vector<16x32xf32> to vector<15x32xf32>
    %65 = tpu.concatenate %63, %64 in 0 : vector<1x32xf32>, vector<15x32xf32> -> vector<16x32xf32>
    %66 = vector.broadcast %57 : vector<16x1xf32> to vector<16x32xf32>
    %67 = arith.mulf %65, %66 : vector<16x32xf32>
    %68 = vector.extract_strided_slice %39 {offsets = [1, 0], sizes = [15, 32], strides = [1, 1]} : vector<16x32xf32> to vector<15x32xf32>
    %69 = vector.extract_strided_slice %39 {offsets = [0, 0], sizes = [1, 32], strides = [1, 1]} : vector<16x32xf32> to vector<1x32xf32>
    %70 = tpu.concatenate %68, %69 in 0 : vector<15x32xf32>, vector<1x32xf32> -> vector<16x32xf32>
    %71 = vector.broadcast %62 : vector<16x1xf32> to vector<16x32xf32>
    %72 = arith.mulf %70, %71 : vector<16x32xf32>
    %c24 = arith.constant 24 : index
    %c0_16 = arith.constant 0 : index
    %73 = vector.load %arg4[%c24, %c0_16] : memref<1384x32xf32, #tpu.memory_space<vmem>>, vector<32x32xf32>
    %cst_17 = arith.constant dense<0.000000e+00> : vector<16x32xf32>
    %74 = tpu.matmul %67, %73, %cst_17 {dimension_numbers = #tpu.dot_dimension_numbers<[1], [0], [0], [1], [0, 0, 1, 1], [], []>} : vector<16x32xf32>, vector<32x32xf32>, vector<16x32xf32> -> vector<16x32xf32>
    %c56 = arith.constant 56 : index
    %c0_18 = arith.constant 0 : index
    %75 = vector.load %arg4[%c56, %c0_18] : memref<1384x32xf32, #tpu.memory_space<vmem>>, vector<32x32xf32>
    %cst_19 = arith.constant dense<0.000000e+00> : vector<16x32xf32>
    %76 = tpu.matmul %39, %75, %cst_19 {dimension_numbers = #tpu.dot_dimension_numbers<[1], [0], [0], [1], [0, 0, 1, 1], [], []>} : vector<16x32xf32>, vector<32x32xf32>, vector<16x32xf32> -> vector<16x32xf32>
    %77 = arith.addf %74, %76 : vector<16x32xf32>
    %c88 = arith.constant 88 : index
    %c0_20 = arith.constant 0 : index
    %78 = vector.load %arg4[%c88, %c0_20] : memref<1384x32xf32, #tpu.memory_space<vmem>>, vector<32x32xf32>
    %cst_21 = arith.constant dense<0.000000e+00> : vector<16x32xf32>
    %79 = tpu.matmul %72, %78, %cst_21 {dimension_numbers = #tpu.dot_dimension_numbers<[1], [0], [0], [1], [0, 0, 1, 1], [], []>} : vector<16x32xf32>, vector<32x32xf32>, vector<16x32xf32> -> vector<16x32xf32>
    %80 = arith.addf %77, %79 : vector<16x32xf32>
    %81 = vector.extract_strided_slice %0 {offsets = [1, 0], sizes = [1, 32], strides = [1, 1]} : vector<52x128xf32> to vector<1x32xf32>
    %82 = vector.broadcast %81 : vector<1x32xf32> to vector<16x32xf32>
    %83 = arith.addf %80, %82 : vector<16x32xf32>
    %84 = vector.shape_cast %83 : vector<16x32xf32> to vector<8x2x32xf32>
    %cst_22 = arith.constant dense<0xFF800000> : vector<8x32xf32>
    %85 = vector.multi_reduction <maximumf>, %84, %cst_22 [1] : vector<8x2x32xf32> to vector<8x32xf32>
    %c16 = arith.constant 16 : index
    %c0_23 = arith.constant 0 : index
    %86 = vector.load %arg4[%c16, %c0_23] : memref<1384x32xf32, #tpu.memory_space<vmem>>, vector<8x32xf32>
    %87 = arith.addf %85, %86 : vector<8x32xf32>
    %88 = vector.extract_strided_slice %0 {offsets = [2, 0], sizes = [1, 32], strides = [1, 1]} : vector<52x128xf32> to vector<1x32xf32>
    %89 = vector.extract_strided_slice %0 {offsets = [3, 0], sizes = [1, 32], strides = [1, 1]} : vector<52x128xf32> to vector<1x32xf32>
    %cst_24 = arith.constant dense<0.000000e+00> : vector<8xf32>
    %90 = vector.multi_reduction <add>, %87, %cst_24 [1] : vector<8x32xf32> to vector<8xf32>
    %91 = vector.shape_cast %90 : vector<8xf32> to vector<8x1xf32>
    %cst_25 = arith.constant 3.200000e+01 : f32
    %92 = vector.broadcast %cst_25 : f32 to vector<8x1xf32>
    %93 = arith.divf %91, %92 : vector<8x1xf32>
    %94 = vector.broadcast %93 : vector<8x1xf32> to vector<8x32xf32>
    %95 = arith.subf %87, %94 : vector<8x32xf32>
    %96 = arith.mulf %95, %95 : vector<8x32xf32>
    %cst_26 = arith.constant dense<0.000000e+00> : vector<8xf32>
    %97 = vector.multi_reduction <add>, %96, %cst_26 [1] : vector<8x32xf32> to vector<8xf32>
    %98 = vector.shape_cast %97 : vector<8xf32> to vector<8x1xf32>
    %cst_27 = arith.constant 3.200000e+01 : f32
    %99 = vector.broadcast %cst_27 : f32 to vector<8x1xf32>
    %100 = arith.divf %98, %99 : vector<8x1xf32>
    %cst_28 = arith.constant 9.99999974E-6 : f32
    %101 = vector.broadcast %cst_28 : f32 to vector<8x1xf32>
    %102 = arith.addf %100, %101 : vector<8x1xf32>
    %103 = math.rsqrt %102 : vector<8x1xf32>
    %104 = vector.broadcast %103 : vector<8x1xf32> to vector<8x32xf32>
    %105 = arith.mulf %95, %104 : vector<8x32xf32>
    %106 = vector.broadcast %88 : vector<1x32xf32> to vector<8x32xf32>
    %107 = arith.mulf %105, %106 : vector<8x32xf32>
    %108 = vector.broadcast %89 : vector<1x32xf32> to vector<8x32xf32>
    %109 = arith.addf %107, %108 : vector<8x32xf32>
    %c120 = arith.constant 120 : index
    %c0_29 = arith.constant 0 : index
    %110 = vector.load %arg4[%c120, %c0_29] : memref<1384x32xf32, #tpu.memory_space<vmem>>, vector<32x32xf32>
    %cst_30 = arith.constant dense<0.000000e+00> : vector<8x32xf32>
    %111 = tpu.matmul %109, %110, %cst_30 {dimension_numbers = #tpu.dot_dimension_numbers<[1], [0], [0], [1], [0, 0, 1, 1], [], []>} : vector<8x32xf32>, vector<32x32xf32>, vector<8x32xf32> -> vector<8x32xf32>
    %112 = vector.extract_strided_slice %0 {offsets = [4, 0], sizes = [1, 32], strides = [1, 1]} : vector<52x128xf32> to vector<1x32xf32>
    %113 = vector.broadcast %112 : vector<1x32xf32> to vector<8x32xf32>
    %114 = arith.addf %111, %113 : vector<8x32xf32>
    %c152 = arith.constant 152 : index
    %c0_31 = arith.constant 0 : index
    %115 = vector.load %arg4[%c152, %c0_31] : memref<1384x32xf32, #tpu.memory_space<vmem>>, vector<32x32xf32>
    %cst_32 = arith.constant dense<0.000000e+00> : vector<8x32xf32>
    %116 = tpu.matmul %109, %115, %cst_32 {dimension_numbers = #tpu.dot_dimension_numbers<[1], [0], [0], [1], [0, 0, 1, 1], [], []>} : vector<8x32xf32>, vector<32x32xf32>, vector<8x32xf32> -> vector<8x32xf32>
    %117 = vector.extract_strided_slice %0 {offsets = [5, 0], sizes = [1, 32], strides = [1, 1]} : vector<52x128xf32> to vector<1x32xf32>
    %118 = vector.broadcast %117 : vector<1x32xf32> to vector<8x32xf32>
    %119 = arith.addf %116, %118 : vector<8x32xf32>
    %c184 = arith.constant 184 : index
    %c0_33 = arith.constant 0 : index
    %120 = vector.load %arg4[%c184, %c0_33] : memref<1384x32xf32, #tpu.memory_space<vmem>>, vector<32x32xf32>
    %cst_34 = arith.constant dense<0.000000e+00> : vector<8x32xf32>
    %121 = tpu.matmul %109, %120, %cst_34 {dimension_numbers = #tpu.dot_dimension_numbers<[1], [0], [0], [1], [0, 0, 1, 1], [], []>} : vector<8x32xf32>, vector<32x32xf32>, vector<8x32xf32> -> vector<8x32xf32>
    %122 = vector.extract_strided_slice %0 {offsets = [6, 0], sizes = [1, 32], strides = [1, 1]} : vector<52x128xf32> to vector<1x32xf32>
    %123 = vector.broadcast %122 : vector<1x32xf32> to vector<8x32xf32>
    %124 = arith.addf %121, %123 : vector<8x32xf32>
    %125 = vector.broadcast %8 : vector<1x32xf32> to vector<8x32xf32>
    %126 = arith.mulf %114, %125 : vector<8x32xf32>
    %127 = vector.broadcast %15 : vector<1x32xf32> to vector<8x32xf32>
    %128 = arith.mulf %114, %127 : vector<8x32xf32>
    %129 = vector.broadcast %22 : vector<1x32xf32> to vector<8x32xf32>
    %130 = arith.mulf %114, %129 : vector<8x32xf32>
    %131 = vector.broadcast %29 : vector<1x32xf32> to vector<8x32xf32>
    %132 = arith.mulf %114, %131 : vector<8x32xf32>
    %133 = tpu.concatenate %126, %128, %130, %132 in 0 : vector<8x32xf32>, vector<8x32xf32>, vector<8x32xf32>, vector<8x32xf32> -> vector<32x32xf32>
    %cst_35 = arith.constant dense<0.000000e+00> : vector<32x8xf32>
    %134 = tpu.matmul %133, %119, %cst_35 {dimension_numbers = #tpu.dot_dimension_numbers<[1], [1], [0], [0], [0, 0, 1, 0], [], []>} : vector<32x32xf32>, vector<8x32xf32>, vector<32x8xf32> -> vector<32x8xf32>
    %cst_36 = arith.constant 0.353553385 : f32
    %135 = vector.broadcast %cst_36 : f32 to vector<32x8xf32>
    %136 = arith.mulf %134, %135 : vector<32x8xf32>
    %137 = arith.addf %136, %30 : vector<32x8xf32>
    %cst_37 = arith.constant dense<0xFF800000> : vector<32xf32>
    %138 = vector.multi_reduction <maximumf>, %137, %cst_37 [1] : vector<32x8xf32> to vector<32xf32>
    %139 = vector.shape_cast %138 : vector<32xf32> to vector<32x1xf32>
    %140 = vector.broadcast %139 : vector<32x1xf32> to vector<32x8xf32>
    %141 = arith.subf %137, %140 : vector<32x8xf32>
    %142 = math.exp %141 : vector<32x8xf32>
    %cst_38 = arith.constant dense<0.000000e+00> : vector<32xf32>
    %143 = vector.multi_reduction <add>, %142, %cst_38 [1] : vector<32x8xf32> to vector<32xf32>
    %144 = vector.shape_cast %143 : vector<32xf32> to vector<32x1xf32>
    %145 = tpu.reciprocal %144 {approx = true} : vector<32x1xf32> -> vector<32x1xf32>
    %146 = vector.broadcast %145 : vector<32x1xf32> to vector<32x8xf32>
    %147 = arith.mulf %142, %146 : vector<32x8xf32>
    %cst_39 = arith.constant dense<0.000000e+00> : vector<32x32xf32>
    %148 = tpu.matmul %147, %124, %cst_39 {dimension_numbers = #tpu.dot_dimension_numbers<[1], [0], [0], [1], [0, 0, 1, 1], [], []>} : vector<32x8xf32>, vector<8x32xf32>, vector<32x32xf32> -> vector<32x32xf32>
    %149 = vector.extract_strided_slice %148 {offsets = [0, 0], sizes = [8, 32], strides = [1, 1]} : vector<32x32xf32> to vector<8x32xf32>
    %150 = vector.broadcast %8 : vector<1x32xf32> to vector<8x32xf32>
    %151 = arith.mulf %149, %150 : vector<8x32xf32>
    %152 = vector.extract_strided_slice %148 {offsets = [8, 0], sizes = [8, 32], strides = [1, 1]} : vector<32x32xf32> to vector<8x32xf32>
    %153 = vector.broadcast %15 : vector<1x32xf32> to vector<8x32xf32>
    %154 = arith.mulf %152, %153 : vector<8x32xf32>
    %155 = arith.addf %151, %154 : vector<8x32xf32>
    %156 = vector.extract_strided_slice %148 {offsets = [16, 0], sizes = [8, 32], strides = [1, 1]} : vector<32x32xf32> to vector<8x32xf32>
    %157 = vector.broadcast %22 : vector<1x32xf32> to vector<8x32xf32>
    %158 = arith.mulf %156, %157 : vector<8x32xf32>
    %159 = arith.addf %155, %158 : vector<8x32xf32>
    %160 = vector.extract_strided_slice %148 {offsets = [24, 0], sizes = [8, 32], strides = [1, 1]} : vector<32x32xf32> to vector<8x32xf32>
    %161 = vector.broadcast %29 : vector<1x32xf32> to vector<8x32xf32>
    %162 = arith.mulf %160, %161 : vector<8x32xf32>
    %163 = arith.addf %159, %162 : vector<8x32xf32>
    %c216 = arith.constant 216 : index
    %c0_40 = arith.constant 0 : index
    %164 = vector.load %arg4[%c216, %c0_40] : memref<1384x32xf32, #tpu.memory_space<vmem>>, vector<32x32xf32>
    %cst_41 = arith.constant dense<0.000000e+00> : vector<8x32xf32>
    %165 = tpu.matmul %163, %164, %cst_41 {dimension_numbers = #tpu.dot_dimension_numbers<[1], [0], [0], [1], [0, 0, 1, 1], [], []>} : vector<8x32xf32>, vector<32x32xf32>, vector<8x32xf32> -> vector<8x32xf32>
    %166 = arith.addf %87, %165 : vector<8x32xf32>
    %167 = vector.extract_strided_slice %0 {offsets = [7, 0], sizes = [1, 32], strides = [1, 1]} : vector<52x128xf32> to vector<1x32xf32>
    %168 = vector.broadcast %167 : vector<1x32xf32> to vector<8x32xf32>
    %169 = arith.addf %166, %168 : vector<8x32xf32>
    %170 = vector.extract_strided_slice %0 {offsets = [8, 0], sizes = [1, 32], strides = [1, 1]} : vector<52x128xf32> to vector<1x32xf32>
    %171 = vector.extract_strided_slice %0 {offsets = [9, 0], sizes = [1, 32], strides = [1, 1]} : vector<52x128xf32> to vector<1x32xf32>
    %cst_42 = arith.constant dense<0.000000e+00> : vector<8xf32>
    %172 = vector.multi_reduction <add>, %169, %cst_42 [1] : vector<8x32xf32> to vector<8xf32>
    %173 = vector.shape_cast %172 : vector<8xf32> to vector<8x1xf32>
    %cst_43 = arith.constant 3.200000e+01 : f32
    %174 = vector.broadcast %cst_43 : f32 to vector<8x1xf32>
    %175 = arith.divf %173, %174 : vector<8x1xf32>
    %176 = vector.broadcast %175 : vector<8x1xf32> to vector<8x32xf32>
    %177 = arith.subf %169, %176 : vector<8x32xf32>
    %178 = arith.mulf %177, %177 : vector<8x32xf32>
    %cst_44 = arith.constant dense<0.000000e+00> : vector<8xf32>
    %179 = vector.multi_reduction <add>, %178, %cst_44 [1] : vector<8x32xf32> to vector<8xf32>
    %180 = vector.shape_cast %179 : vector<8xf32> to vector<8x1xf32>
    %cst_45 = arith.constant 3.200000e+01 : f32
    %181 = vector.broadcast %cst_45 : f32 to vector<8x1xf32>
    %182 = arith.divf %180, %181 : vector<8x1xf32>
    %cst_46 = arith.constant 9.99999974E-6 : f32
    %183 = vector.broadcast %cst_46 : f32 to vector<8x1xf32>
    %184 = arith.addf %182, %183 : vector<8x1xf32>
    %185 = math.rsqrt %184 : vector<8x1xf32>
    %186 = vector.broadcast %185 : vector<8x1xf32> to vector<8x32xf32>
    %187 = arith.mulf %177, %186 : vector<8x32xf32>
    %188 = vector.broadcast %170 : vector<1x32xf32> to vector<8x32xf32>
    %189 = arith.mulf %187, %188 : vector<8x32xf32>
    %190 = vector.broadcast %171 : vector<1x32xf32> to vector<8x32xf32>
    %191 = arith.addf %189, %190 : vector<8x32xf32>
    %c0_47 = arith.constant 0 : index
    %c0_48 = arith.constant 0 : index
    %192 = vector.load %arg5[%c0_47, %c0_48] : memref<128x128xf32, #tpu.memory_space<vmem>>, vector<32x128xf32>
    %cst_49 = arith.constant dense<0.000000e+00> : vector<8x128xf32>
    %193 = tpu.matmul %191, %192, %cst_49 {dimension_numbers = #tpu.dot_dimension_numbers<[1], [0], [0], [1], [0, 0, 1, 1], [], []>} : vector<8x32xf32>, vector<32x128xf32>, vector<8x128xf32> -> vector<8x128xf32>
    %194 = vector.extract_strided_slice %0 {offsets = [10, 0], sizes = [1, 128], strides = [1, 1]} : vector<52x128xf32> to vector<1x128xf32>
    %195 = vector.broadcast %194 : vector<1x128xf32> to vector<8x128xf32>
    %196 = arith.addf %193, %195 : vector<8x128xf32>
    %197 = arith.mulf %196, %196 : vector<8x128xf32>
    %198 = arith.mulf %196, %197 : vector<8x128xf32>
    %cst_50 = arith.constant 4.471500e-02 : f32
    %199 = vector.broadcast %cst_50 : f32 to vector<8x128xf32>
    %200 = arith.mulf %199, %198 : vector<8x128xf32>
    %201 = arith.addf %196, %200 : vector<8x128xf32>
    %cst_51 = arith.constant 0.797884583 : f32
    %202 = vector.broadcast %cst_51 : f32 to vector<8x128xf32>
    %203 = arith.mulf %202, %201 : vector<8x128xf32>
    %204 = math.tanh %203 : vector<8x128xf32>
    %cst_52 = arith.constant 1.000000e+00 : f32
    %205 = vector.broadcast %cst_52 : f32 to vector<8x128xf32>
    %206 = arith.addf %205, %204 : vector<8x128xf32>
    %cst_53 = arith.constant 5.000000e-01 : f32
    %207 = vector.broadcast %cst_53 : f32 to vector<8x128xf32>
    %208 = arith.mulf %207, %206 : vector<8x128xf32>
    %209 = arith.mulf %196, %208 : vector<8x128xf32>
    %c248 = arith.constant 248 : index
    %c0_54 = arith.constant 0 : index
    %210 = vector.load %arg4[%c248, %c0_54] : memref<1384x32xf32, #tpu.memory_space<vmem>>, vector<128x32xf32>
    %cst_55 = arith.constant dense<0.000000e+00> : vector<8x32xf32>
    %211 = tpu.matmul %209, %210, %cst_55 {dimension_numbers = #tpu.dot_dimension_numbers<[1], [0], [0], [1], [0, 0, 1, 1], [], []>} : vector<8x128xf32>, vector<128x32xf32>, vector<8x32xf32> -> vector<8x32xf32>
    %212 = arith.addf %169, %211 : vector<8x32xf32>
    %213 = vector.extract_strided_slice %0 {offsets = [11, 0], sizes = [1, 32], strides = [1, 1]} : vector<52x128xf32> to vector<1x32xf32>
    %214 = vector.broadcast %213 : vector<1x32xf32> to vector<8x32xf32>
    %215 = arith.addf %212, %214 : vector<8x32xf32>
    %216 = vector.extract_strided_slice %0 {offsets = [12, 0], sizes = [1, 32], strides = [1, 1]} : vector<52x128xf32> to vector<1x32xf32>
    %217 = vector.extract_strided_slice %0 {offsets = [13, 0], sizes = [1, 32], strides = [1, 1]} : vector<52x128xf32> to vector<1x32xf32>
    %cst_56 = arith.constant dense<0.000000e+00> : vector<8xf32>
    %218 = vector.multi_reduction <add>, %215, %cst_56 [1] : vector<8x32xf32> to vector<8xf32>
    %219 = vector.shape_cast %218 : vector<8xf32> to vector<8x1xf32>
    %cst_57 = arith.constant 3.200000e+01 : f32
    %220 = vector.broadcast %cst_57 : f32 to vector<8x1xf32>
    %221 = arith.divf %219, %220 : vector<8x1xf32>
    %222 = vector.broadcast %221 : vector<8x1xf32> to vector<8x32xf32>
    %223 = arith.subf %215, %222 : vector<8x32xf32>
    %224 = arith.mulf %223, %223 : vector<8x32xf32>
    %cst_58 = arith.constant dense<0.000000e+00> : vector<8xf32>
    %225 = vector.multi_reduction <add>, %224, %cst_58 [1] : vector<8x32xf32> to vector<8xf32>
    %226 = vector.shape_cast %225 : vector<8xf32> to vector<8x1xf32>
    %cst_59 = arith.constant 3.200000e+01 : f32
    %227 = vector.broadcast %cst_59 : f32 to vector<8x1xf32>
    %228 = arith.divf %226, %227 : vector<8x1xf32>
    %cst_60 = arith.constant 9.99999974E-6 : f32
    %229 = vector.broadcast %cst_60 : f32 to vector<8x1xf32>
    %230 = arith.addf %228, %229 : vector<8x1xf32>
    %231 = math.rsqrt %230 : vector<8x1xf32>
    %232 = vector.broadcast %231 : vector<8x1xf32> to vector<8x32xf32>
    %233 = arith.mulf %223, %232 : vector<8x32xf32>
    %234 = vector.broadcast %216 : vector<1x32xf32> to vector<8x32xf32>
    %235 = arith.mulf %233, %234 : vector<8x32xf32>
    %236 = vector.broadcast %217 : vector<1x32xf32> to vector<8x32xf32>
    %237 = arith.addf %235, %236 : vector<8x32xf32>
    %c376 = arith.constant 376 : index
    %c0_61 = arith.constant 0 : index
    %238 = vector.load %arg4[%c376, %c0_61] : memref<1384x32xf32, #tpu.memory_space<vmem>>, vector<32x32xf32>
    %cst_62 = arith.constant dense<0.000000e+00> : vector<8x32xf32>
    %239 = tpu.matmul %237, %238, %cst_62 {dimension_numbers = #tpu.dot_dimension_numbers<[1], [0], [0], [1], [0, 0, 1, 1], [], []>} : vector<8x32xf32>, vector<32x32xf32>, vector<8x32xf32> -> vector<8x32xf32>
    %240 = vector.extract_strided_slice %0 {offsets = [14, 0], sizes = [1, 32], strides = [1, 1]} : vector<52x128xf32> to vector<1x32xf32>
    %241 = vector.broadcast %240 : vector<1x32xf32> to vector<8x32xf32>
    %242 = arith.addf %239, %241 : vector<8x32xf32>
    %c408 = arith.constant 408 : index
    %c0_63 = arith.constant 0 : index
    %243 = vector.load %arg4[%c408, %c0_63] : memref<1384x32xf32, #tpu.memory_space<vmem>>, vector<32x32xf32>
    %cst_64 = arith.constant dense<0.000000e+00> : vector<8x32xf32>
    %244 = tpu.matmul %237, %243, %cst_64 {dimension_numbers = #tpu.dot_dimension_numbers<[1], [0], [0], [1], [0, 0, 1, 1], [], []>} : vector<8x32xf32>, vector<32x32xf32>, vector<8x32xf32> -> vector<8x32xf32>
    %245 = vector.extract_strided_slice %0 {offsets = [15, 0], sizes = [1, 32], strides = [1, 1]} : vector<52x128xf32> to vector<1x32xf32>
    %246 = vector.broadcast %245 : vector<1x32xf32> to vector<8x32xf32>
    %247 = arith.addf %244, %246 : vector<8x32xf32>
    %c440 = arith.constant 440 : index
    %c0_65 = arith.constant 0 : index
    %248 = vector.load %arg4[%c440, %c0_65] : memref<1384x32xf32, #tpu.memory_space<vmem>>, vector<32x32xf32>
    %cst_66 = arith.constant dense<0.000000e+00> : vector<8x32xf32>
    %249 = tpu.matmul %237, %248, %cst_66 {dimension_numbers = #tpu.dot_dimension_numbers<[1], [0], [0], [1], [0, 0, 1, 1], [], []>} : vector<8x32xf32>, vector<32x32xf32>, vector<8x32xf32> -> vector<8x32xf32>
    %250 = vector.extract_strided_slice %0 {offsets = [16, 0], sizes = [1, 32], strides = [1, 1]} : vector<52x128xf32> to vector<1x32xf32>
    %251 = vector.broadcast %250 : vector<1x32xf32> to vector<8x32xf32>
    %252 = arith.addf %249, %251 : vector<8x32xf32>
    %253 = vector.broadcast %8 : vector<1x32xf32> to vector<8x32xf32>
    %254 = arith.mulf %242, %253 : vector<8x32xf32>
    %255 = vector.broadcast %15 : vector<1x32xf32> to vector<8x32xf32>
    %256 = arith.mulf %242, %255 : vector<8x32xf32>
    %257 = vector.broadcast %22 : vector<1x32xf32> to vector<8x32xf32>
    %258 = arith.mulf %242, %257 : vector<8x32xf32>
    %259 = vector.broadcast %29 : vector<1x32xf32> to vector<8x32xf32>
    %260 = arith.mulf %242, %259 : vector<8x32xf32>
    %261 = tpu.concatenate %254, %256, %258, %260 in 0 : vector<8x32xf32>, vector<8x32xf32>, vector<8x32xf32>, vector<8x32xf32> -> vector<32x32xf32>
    %cst_67 = arith.constant dense<0.000000e+00> : vector<32x8xf32>
    %262 = tpu.matmul %261, %247, %cst_67 {dimension_numbers = #tpu.dot_dimension_numbers<[1], [1], [0], [0], [0, 0, 1, 0], [], []>} : vector<32x32xf32>, vector<8x32xf32>, vector<32x8xf32> -> vector<32x8xf32>
    %cst_68 = arith.constant 0.353553385 : f32
    %263 = vector.broadcast %cst_68 : f32 to vector<32x8xf32>
    %264 = arith.mulf %262, %263 : vector<32x8xf32>
    %265 = arith.addf %264, %30 : vector<32x8xf32>
    %cst_69 = arith.constant dense<0xFF800000> : vector<32xf32>
    %266 = vector.multi_reduction <maximumf>, %265, %cst_69 [1] : vector<32x8xf32> to vector<32xf32>
    %267 = vector.shape_cast %266 : vector<32xf32> to vector<32x1xf32>
    %268 = vector.broadcast %267 : vector<32x1xf32> to vector<32x8xf32>
    %269 = arith.subf %265, %268 : vector<32x8xf32>
    %270 = math.exp %269 : vector<32x8xf32>
    %cst_70 = arith.constant dense<0.000000e+00> : vector<32xf32>
    %271 = vector.multi_reduction <add>, %270, %cst_70 [1] : vector<32x8xf32> to vector<32xf32>
    %272 = vector.shape_cast %271 : vector<32xf32> to vector<32x1xf32>
    %273 = tpu.reciprocal %272 {approx = true} : vector<32x1xf32> -> vector<32x1xf32>
    %274 = vector.broadcast %273 : vector<32x1xf32> to vector<32x8xf32>
    %275 = arith.mulf %270, %274 : vector<32x8xf32>
    %cst_71 = arith.constant dense<0.000000e+00> : vector<32x32xf32>
    %276 = tpu.matmul %275, %252, %cst_71 {dimension_numbers = #tpu.dot_dimension_numbers<[1], [0], [0], [1], [0, 0, 1, 1], [], []>} : vector<32x8xf32>, vector<8x32xf32>, vector<32x32xf32> -> vector<32x32xf32>
    %277 = vector.extract_strided_slice %276 {offsets = [0, 0], sizes = [8, 32], strides = [1, 1]} : vector<32x32xf32> to vector<8x32xf32>
    %278 = vector.broadcast %8 : vector<1x32xf32> to vector<8x32xf32>
    %279 = arith.mulf %277, %278 : vector<8x32xf32>
    %280 = vector.extract_strided_slice %276 {offsets = [8, 0], sizes = [8, 32], strides = [1, 1]} : vector<32x32xf32> to vector<8x32xf32>
    %281 = vector.broadcast %15 : vector<1x32xf32> to vector<8x32xf32>
    %282 = arith.mulf %280, %281 : vector<8x32xf32>
    %283 = arith.addf %279, %282 : vector<8x32xf32>
    %284 = vector.extract_strided_slice %276 {offsets = [16, 0], sizes = [8, 32], strides = [1, 1]} : vector<32x32xf32> to vector<8x32xf32>
    %285 = vector.broadcast %22 : vector<1x32xf32> to vector<8x32xf32>
    %286 = arith.mulf %284, %285 : vector<8x32xf32>
    %287 = arith.addf %283, %286 : vector<8x32xf32>
    %288 = vector.extract_strided_slice %276 {offsets = [24, 0], sizes = [8, 32], strides = [1, 1]} : vector<32x32xf32> to vector<8x32xf32>
    %289 = vector.broadcast %29 : vector<1x32xf32> to vector<8x32xf32>
    %290 = arith.mulf %288, %289 : vector<8x32xf32>
    %291 = arith.addf %287, %290 : vector<8x32xf32>
    %c472 = arith.constant 472 : index
    %c0_72 = arith.constant 0 : index
    %292 = vector.load %arg4[%c472, %c0_72] : memref<1384x32xf32, #tpu.memory_space<vmem>>, vector<32x32xf32>
    %cst_73 = arith.constant dense<0.000000e+00> : vector<8x32xf32>
    %293 = tpu.matmul %291, %292, %cst_73 {dimension_numbers = #tpu.dot_dimension_numbers<[1], [0], [0], [1], [0, 0, 1, 1], [], []>} : vector<8x32xf32>, vector<32x32xf32>, vector<8x32xf32> -> vector<8x32xf32>
    %294 = arith.addf %215, %293 : vector<8x32xf32>
    %295 = vector.extract_strided_slice %0 {offsets = [17, 0], sizes = [1, 32], strides = [1, 1]} : vector<52x128xf32> to vector<1x32xf32>
    %296 = vector.broadcast %295 : vector<1x32xf32> to vector<8x32xf32>
    %297 = arith.addf %294, %296 : vector<8x32xf32>
    %298 = vector.extract_strided_slice %0 {offsets = [18, 0], sizes = [1, 32], strides = [1, 1]} : vector<52x128xf32> to vector<1x32xf32>
    %299 = vector.extract_strided_slice %0 {offsets = [19, 0], sizes = [1, 32], strides = [1, 1]} : vector<52x128xf32> to vector<1x32xf32>
    %cst_74 = arith.constant dense<0.000000e+00> : vector<8xf32>
    %300 = vector.multi_reduction <add>, %297, %cst_74 [1] : vector<8x32xf32> to vector<8xf32>
    %301 = vector.shape_cast %300 : vector<8xf32> to vector<8x1xf32>
    %cst_75 = arith.constant 3.200000e+01 : f32
    %302 = vector.broadcast %cst_75 : f32 to vector<8x1xf32>
    %303 = arith.divf %301, %302 : vector<8x1xf32>
    %304 = vector.broadcast %303 : vector<8x1xf32> to vector<8x32xf32>
    %305 = arith.subf %297, %304 : vector<8x32xf32>
    %306 = arith.mulf %305, %305 : vector<8x32xf32>
    %cst_76 = arith.constant dense<0.000000e+00> : vector<8xf32>
    %307 = vector.multi_reduction <add>, %306, %cst_76 [1] : vector<8x32xf32> to vector<8xf32>
    %308 = vector.shape_cast %307 : vector<8xf32> to vector<8x1xf32>
    %cst_77 = arith.constant 3.200000e+01 : f32
    %309 = vector.broadcast %cst_77 : f32 to vector<8x1xf32>
    %310 = arith.divf %308, %309 : vector<8x1xf32>
    %cst_78 = arith.constant 9.99999974E-6 : f32
    %311 = vector.broadcast %cst_78 : f32 to vector<8x1xf32>
    %312 = arith.addf %310, %311 : vector<8x1xf32>
    %313 = math.rsqrt %312 : vector<8x1xf32>
    %314 = vector.broadcast %313 : vector<8x1xf32> to vector<8x32xf32>
    %315 = arith.mulf %305, %314 : vector<8x32xf32>
    %316 = vector.broadcast %298 : vector<1x32xf32> to vector<8x32xf32>
    %317 = arith.mulf %315, %316 : vector<8x32xf32>
    %318 = vector.broadcast %299 : vector<1x32xf32> to vector<8x32xf32>
    %319 = arith.addf %317, %318 : vector<8x32xf32>
    %c32 = arith.constant 32 : index
    %c0_79 = arith.constant 0 : index
    %320 = vector.load %arg5[%c32, %c0_79] : memref<128x128xf32, #tpu.memory_space<vmem>>, vector<32x128xf32>
    %cst_80 = arith.constant dense<0.000000e+00> : vector<8x128xf32>
    %321 = tpu.matmul %319, %320, %cst_80 {dimension_numbers = #tpu.dot_dimension_numbers<[1], [0], [0], [1], [0, 0, 1, 1], [], []>} : vector<8x32xf32>, vector<32x128xf32>, vector<8x128xf32> -> vector<8x128xf32>
    %322 = vector.extract_strided_slice %0 {offsets = [20, 0], sizes = [1, 128], strides = [1, 1]} : vector<52x128xf32> to vector<1x128xf32>
    %323 = vector.broadcast %322 : vector<1x128xf32> to vector<8x128xf32>
    %324 = arith.addf %321, %323 : vector<8x128xf32>
    %325 = arith.mulf %324, %324 : vector<8x128xf32>
    %326 = arith.mulf %324, %325 : vector<8x128xf32>
    %cst_81 = arith.constant 4.471500e-02 : f32
    %327 = vector.broadcast %cst_81 : f32 to vector<8x128xf32>
    %328 = arith.mulf %327, %326 : vector<8x128xf32>
    %329 = arith.addf %324, %328 : vector<8x128xf32>
    %cst_82 = arith.constant 0.797884583 : f32
    %330 = vector.broadcast %cst_82 : f32 to vector<8x128xf32>
    %331 = arith.mulf %330, %329 : vector<8x128xf32>
    %332 = math.tanh %331 : vector<8x128xf32>
    %cst_83 = arith.constant 1.000000e+00 : f32
    %333 = vector.broadcast %cst_83 : f32 to vector<8x128xf32>
    %334 = arith.addf %333, %332 : vector<8x128xf32>
    %cst_84 = arith.constant 5.000000e-01 : f32
    %335 = vector.broadcast %cst_84 : f32 to vector<8x128xf32>
    %336 = arith.mulf %335, %334 : vector<8x128xf32>
    %337 = arith.mulf %324, %336 : vector<8x128xf32>
    %c504 = arith.constant 504 : index
    %c0_85 = arith.constant 0 : index
    %338 = vector.load %arg4[%c504, %c0_85] : memref<1384x32xf32, #tpu.memory_space<vmem>>, vector<128x32xf32>
    %cst_86 = arith.constant dense<0.000000e+00> : vector<8x32xf32>
    %339 = tpu.matmul %337, %338, %cst_86 {dimension_numbers = #tpu.dot_dimension_numbers<[1], [0], [0], [1], [0, 0, 1, 1], [], []>} : vector<8x128xf32>, vector<128x32xf32>, vector<8x32xf32> -> vector<8x32xf32>
    %340 = arith.addf %297, %339 : vector<8x32xf32>
    %341 = vector.extract_strided_slice %0 {offsets = [21, 0], sizes = [1, 32], strides = [1, 1]} : vector<52x128xf32> to vector<1x32xf32>
    %342 = vector.broadcast %341 : vector<1x32xf32> to vector<8x32xf32>
    %343 = arith.addf %340, %342 : vector<8x32xf32>
    %344 = vector.extract_strided_slice %0 {offsets = [42, 0], sizes = [1, 32], strides = [1, 1]} : vector<52x128xf32> to vector<1x32xf32>
    %345 = vector.extract_strided_slice %0 {offsets = [43, 0], sizes = [1, 32], strides = [1, 1]} : vector<52x128xf32> to vector<1x32xf32>
    %cst_87 = arith.constant dense<0.000000e+00> : vector<8xf32>
    %346 = vector.multi_reduction <add>, %343, %cst_87 [1] : vector<8x32xf32> to vector<8xf32>
    %347 = vector.shape_cast %346 : vector<8xf32> to vector<8x1xf32>
    %cst_88 = arith.constant 3.200000e+01 : f32
    %348 = vector.broadcast %cst_88 : f32 to vector<8x1xf32>
    %349 = arith.divf %347, %348 : vector<8x1xf32>
    %350 = vector.broadcast %349 : vector<8x1xf32> to vector<8x32xf32>
    %351 = arith.subf %343, %350 : vector<8x32xf32>
    %352 = arith.mulf %351, %351 : vector<8x32xf32>
    %cst_89 = arith.constant dense<0.000000e+00> : vector<8xf32>
    %353 = vector.multi_reduction <add>, %352, %cst_89 [1] : vector<8x32xf32> to vector<8xf32>
    %354 = vector.shape_cast %353 : vector<8xf32> to vector<8x1xf32>
    %cst_90 = arith.constant 3.200000e+01 : f32
    %355 = vector.broadcast %cst_90 : f32 to vector<8x1xf32>
    %356 = arith.divf %354, %355 : vector<8x1xf32>
    %cst_91 = arith.constant 9.99999974E-6 : f32
    %357 = vector.broadcast %cst_91 : f32 to vector<8x1xf32>
    %358 = arith.addf %356, %357 : vector<8x1xf32>
    %359 = math.rsqrt %358 : vector<8x1xf32>
    %360 = vector.broadcast %359 : vector<8x1xf32> to vector<8x32xf32>
    %361 = arith.mulf %351, %360 : vector<8x32xf32>
    %362 = vector.broadcast %344 : vector<1x32xf32> to vector<8x32xf32>
    %363 = arith.mulf %361, %362 : vector<8x32xf32>
    %364 = vector.broadcast %345 : vector<1x32xf32> to vector<8x32xf32>
    %365 = arith.addf %363, %364 : vector<8x32xf32>
    %c1144 = arith.constant 1144 : index
    %c0_92 = arith.constant 0 : index
    %366 = vector.load %arg4[%c1144, %c0_92] : memref<1384x32xf32, #tpu.memory_space<vmem>>, vector<32x32xf32>
    %cst_93 = arith.constant dense<0.000000e+00> : vector<8x32xf32>
    %367 = tpu.matmul %365, %366, %cst_93 {dimension_numbers = #tpu.dot_dimension_numbers<[1], [0], [0], [1], [0, 0, 1, 1], [], []>} : vector<8x32xf32>, vector<32x32xf32>, vector<8x32xf32> -> vector<8x32xf32>
    %c0_94 = arith.constant 0 : index
    %c0_95 = arith.constant 0 : index
    %368 = vector.load %arg6[%c0_94, %c0_95] : memref<72x16xf32, #tpu.memory_space<vmem>>, vector<32x16xf32>
    %cst_96 = arith.constant dense<0.000000e+00> : vector<8x16xf32>
    %369 = tpu.matmul %367, %368, %cst_96 {dimension_numbers = #tpu.dot_dimension_numbers<[1], [0], [0], [1], [0, 0, 1, 1], [], []>} : vector<8x32xf32>, vector<32x16xf32>, vector<8x16xf32> -> vector<8x16xf32>
    %370 = vector.extract_strided_slice %0 {offsets = [44, 0], sizes = [1, 16], strides = [1, 1]} : vector<52x128xf32> to vector<1x16xf32>
    %371 = vector.broadcast %370 : vector<1x16xf32> to vector<8x16xf32>
    %372 = arith.addf %369, %371 : vector<8x16xf32>
    %c64 = arith.constant 64 : index
    %c0_97 = arith.constant 0 : index
    %373 = vector.load %arg6[%c64, %c0_97] : memref<72x16xf32, #tpu.memory_space<vmem>>, vector<8x16xf32>
    %cst_98 = arith.constant dense<0.000000e+00> : vector<8x8xf32>
    %374 = tpu.matmul %372, %373, %cst_98 {dimension_numbers = #tpu.dot_dimension_numbers<[1], [1], [0], [0], [0, 0, 1, 0], [], []>} : vector<8x16xf32>, vector<8x16xf32>, vector<8x8xf32> -> vector<8x8xf32>
    %375 = arith.mulf %372, %372 : vector<8x16xf32>
    %cst_99 = arith.constant dense<0.000000e+00> : vector<8xf32>
    %376 = vector.multi_reduction <add>, %375, %cst_99 [1] : vector<8x16xf32> to vector<8xf32>
    %377 = vector.shape_cast %376 : vector<8xf32> to vector<8x1xf32>
    %378 = vector.extract_strided_slice %0 {offsets = [45, 0], sizes = [1, 8], strides = [1, 1]} : vector<52x128xf32> to vector<1x8xf32>
    %379 = vector.broadcast %377 : vector<8x1xf32> to vector<8x8xf32>
    %380 = vector.broadcast %378 : vector<1x8xf32> to vector<8x8xf32>
    %381 = arith.addf %379, %380 : vector<8x8xf32>
    %cst_100 = arith.constant 2.000000e+00 : f32
    %382 = vector.broadcast %cst_100 : f32 to vector<8x8xf32>
    %383 = arith.mulf %382, %374 : vector<8x8xf32>
    %384 = arith.subf %381, %383 : vector<8x8xf32>
    %385 = tpu.reduce_index %384 {axis = 1 : i32, kind = #tpu.reduction_kind<arg_min>} : vector<8x8xf32> -> vector<8xi32>
    %386 = vector.shape_cast %385 : vector<8xi32> to vector<8x1xi32>
    %387 = tpu.iota {dimensions = array<i32: 1>} : vector<8x8xi32>
    %388 = vector.broadcast %386 : vector<8x1xi32> to vector<8x8xi32>
    %389 = arith.cmpi eq, %388, %387 : vector<8x8xi32>
    %390 = arith.extui %389 : vector<8x8xi1> to vector<8x8xi32>
    %391 = arith.sitofp %390 : vector<8x8xi32> to vector<8x8xf32>
    %cst_101 = arith.constant dense<0.000000e+00> : vector<8x16xf32>
    %392 = tpu.matmul %391, %373, %cst_101 {dimension_numbers = #tpu.dot_dimension_numbers<[1], [0], [0], [1], [0, 0, 1, 1], [], []>} : vector<8x8xf32>, vector<8x16xf32>, vector<8x16xf32> -> vector<8x16xf32>
    %c0_102 = arith.constant 0 : index
    %c0_103 = arith.constant 0 : index
    %393 = vector.load %arg3[%c0_102, %c0_103] : memref<8x1xf32, #tpu.memory_space<vmem>>, vector<8x1xf32>
    %394 = arith.subf %392, %372 : vector<8x16xf32>
    %395 = arith.mulf %394, %394 : vector<8x16xf32>
    %cst_104 = arith.constant dense<0.000000e+00> : vector<8xf32>
    %396 = vector.multi_reduction <add>, %395, %cst_104 [1] : vector<8x16xf32> to vector<8xf32>
    %397 = vector.shape_cast %396 : vector<8xf32> to vector<8x1xf32>
    %cst_105 = arith.constant 1.600000e+01 : f32
    %398 = vector.broadcast %cst_105 : f32 to vector<8x1xf32>
    %399 = arith.divf %397, %398 : vector<8x1xf32>
    %cst_106 = arith.constant 2.000000e+00 : f32
    %400 = vector.broadcast %cst_106 : f32 to vector<8x1xf32>
    %401 = arith.mulf %400, %399 : vector<8x1xf32>
    %402 = arith.mulf %401, %393 : vector<8x1xf32>
    %cst_107 = arith.constant dense<0.000000e+00> : vector<1xf32>
    %403 = vector.multi_reduction <add>, %402, %cst_107 [0] : vector<8x1xf32> to vector<1xf32>
    %404 = vector.shape_cast %403 : vector<1xf32> to vector<1x1xf32>
    %cst_108 = arith.constant dense<0.000000e+00> : vector<1xf32>
    %405 = vector.multi_reduction <add>, %393, %cst_108 [0] : vector<8x1xf32> to vector<1xf32>
    %406 = vector.shape_cast %405 : vector<1xf32> to vector<1x1xf32>
    %cst_109 = arith.constant 1.000000e+00 : f32
    %407 = vector.broadcast %cst_109 : f32 to vector<1x1xf32>
    %408 = arith.maximumf %406, %407 : vector<1x1xf32>
    %409 = arith.divf %404, %408 : vector<1x1xf32>
    %c0_110 = arith.constant 0 : index
    %c0_111 = arith.constant 0 : index
    %410 = vector.load %arg10[%c0_110, %c0_111] : memref<1x1xf32, #tpu.memory_space<vmem>>, vector<1x1xf32>
    tpu.vector_store %arg10[%c0_110, %c0_111], %409 {strides = array<i32>} : memref<1x1xf32, #tpu.memory_space<vmem>>, vector<1x1xf32>,
    %cst_112 = arith.constant 5.000000e-01 : f32
    %411 = vector.broadcast %cst_112 : f32 to vector<8x1xf32>
    %412 = arith.cmpf ogt, %393, %411 : vector<8x1xf32>
    %413 = vector.shape_cast %385 : vector<8xi32> to vector<8x1xi32>
    %c-1_i32 = arith.constant -1 : i32
    %414 = vector.broadcast %c-1_i32 : i32 to vector<8x1xi32>
    %415 = arith.select %412, %413, %414 : vector<8x1xi1>, vector<8x1xi32>
    %c0_113 = arith.constant 0 : index
    %c0_114 = arith.constant 0 : index
    %416 = vector.load %arg9[%c0_113, %c0_114] : memref<8x1xi32, #tpu.memory_space<vmem>>, vector<8x1xi32>
    tpu.vector_store %arg9[%c0_113, %c0_114], %415 {strides = array<i32>} : memref<8x1xi32, #tpu.memory_space<vmem>>, vector<8x1xi32>,
    %417 = vector.broadcast %393 : vector<8x1xf32> to vector<8x16xf32>
    %418 = arith.mulf %392, %417 : vector<8x16xf32>
    %c1176 = arith.constant 1176 : index
    %c0_115 = arith.constant 0 : index
    %419 = vector.load %arg4[%c1176, %c0_115] : memref<1384x32xf32, #tpu.memory_space<vmem>>, vector<16x32xf32>
    %cst_116 = arith.constant dense<0.000000e+00> : vector<8x32xf32>
    %420 = tpu.matmul %418, %419, %cst_116 {dimension_numbers = #tpu.dot_dimension_numbers<[1], [0], [0], [1], [0, 0, 1, 1], [], []>} : vector<8x16xf32>, vector<16x32xf32>, vector<8x32xf32> -> vector<8x32xf32>
    %421 = vector.extract_strided_slice %0 {offsets = [46, 0], sizes = [1, 32], strides = [1, 1]} : vector<52x128xf32> to vector<1x32xf32>
    %422 = vector.broadcast %421 : vector<1x32xf32> to vector<8x32xf32>
    %423 = arith.addf %420, %422 : vector<8x32xf32>
    %c16_117 = arith.constant 16 : index
    %c0_118 = arith.constant 0 : index
    %424 = vector.load %arg4[%c16_117, %c0_118] : memref<1384x32xf32, #tpu.memory_space<vmem>>, vector<8x32xf32>
    %425 = arith.addf %423, %424 : vector<8x32xf32>
    %426 = vector.extract_strided_slice %0 {offsets = [22, 0], sizes = [1, 32], strides = [1, 1]} : vector<52x128xf32> to vector<1x32xf32>
    %427 = vector.extract_strided_slice %0 {offsets = [23, 0], sizes = [1, 32], strides = [1, 1]} : vector<52x128xf32> to vector<1x32xf32>
    %cst_119 = arith.constant dense<0.000000e+00> : vector<8xf32>
    %428 = vector.multi_reduction <add>, %425, %cst_119 [1] : vector<8x32xf32> to vector<8xf32>
    %429 = vector.shape_cast %428 : vector<8xf32> to vector<8x1xf32>
    %cst_120 = arith.constant 3.200000e+01 : f32
    %430 = vector.broadcast %cst_120 : f32 to vector<8x1xf32>
    %431 = arith.divf %429, %430 : vector<8x1xf32>
    %432 = vector.broadcast %431 : vector<8x1xf32> to vector<8x32xf32>
    %433 = arith.subf %425, %432 : vector<8x32xf32>
    %434 = arith.mulf %433, %433 : vector<8x32xf32>
    %cst_121 = arith.constant dense<0.000000e+00> : vector<8xf32>
    %435 = vector.multi_reduction <add>, %434, %cst_121 [1] : vector<8x32xf32> to vector<8xf32>
    %436 = vector.shape_cast %435 : vector<8xf32> to vector<8x1xf32>
    %cst_122 = arith.constant 3.200000e+01 : f32
    %437 = vector.broadcast %cst_122 : f32 to vector<8x1xf32>
    %438 = arith.divf %436, %437 : vector<8x1xf32>
    %cst_123 = arith.constant 9.99999974E-6 : f32
    %439 = vector.broadcast %cst_123 : f32 to vector<8x1xf32>
    %440 = arith.addf %438, %439 : vector<8x1xf32>
    %441 = math.rsqrt %440 : vector<8x1xf32>
    %442 = vector.broadcast %441 : vector<8x1xf32> to vector<8x32xf32>
    %443 = arith.mulf %433, %442 : vector<8x32xf32>
    %444 = vector.broadcast %426 : vector<1x32xf32> to vector<8x32xf32>
    %445 = arith.mulf %443, %444 : vector<8x32xf32>
    %446 = vector.broadcast %427 : vector<1x32xf32> to vector<8x32xf32>
    %447 = arith.addf %445, %446 : vector<8x32xf32>
    %c632 = arith.constant 632 : index
    %c0_124 = arith.constant 0 : index
    %448 = vector.load %arg4[%c632, %c0_124] : memref<1384x32xf32, #tpu.memory_space<vmem>>, vector<32x32xf32>
    %cst_125 = arith.constant dense<0.000000e+00> : vector<8x32xf32>
    %449 = tpu.matmul %447, %448, %cst_125 {dimension_numbers = #tpu.dot_dimension_numbers<[1], [0], [0], [1], [0, 0, 1, 1], [], []>} : vector<8x32xf32>, vector<32x32xf32>, vector<8x32xf32> -> vector<8x32xf32>
    %450 = vector.extract_strided_slice %0 {offsets = [24, 0], sizes = [1, 32], strides = [1, 1]} : vector<52x128xf32> to vector<1x32xf32>
    %451 = vector.broadcast %450 : vector<1x32xf32> to vector<8x32xf32>
    %452 = arith.addf %449, %451 : vector<8x32xf32>
    %c664 = arith.constant 664 : index
    %c0_126 = arith.constant 0 : index
    %453 = vector.load %arg4[%c664, %c0_126] : memref<1384x32xf32, #tpu.memory_space<vmem>>, vector<32x32xf32>
    %cst_127 = arith.constant dense<0.000000e+00> : vector<8x32xf32>
    %454 = tpu.matmul %447, %453, %cst_127 {dimension_numbers = #tpu.dot_dimension_numbers<[1], [0], [0], [1], [0, 0, 1, 1], [], []>} : vector<8x32xf32>, vector<32x32xf32>, vector<8x32xf32> -> vector<8x32xf32>
    %455 = vector.extract_strided_slice %0 {offsets = [25, 0], sizes = [1, 32], strides = [1, 1]} : vector<52x128xf32> to vector<1x32xf32>
    %456 = vector.broadcast %455 : vector<1x32xf32> to vector<8x32xf32>
    %457 = arith.addf %454, %456 : vector<8x32xf32>
    %c696 = arith.constant 696 : index
    %c0_128 = arith.constant 0 : index
    %458 = vector.load %arg4[%c696, %c0_128] : memref<1384x32xf32, #tpu.memory_space<vmem>>, vector<32x32xf32>
    %cst_129 = arith.constant dense<0.000000e+00> : vector<8x32xf32>
    %459 = tpu.matmul %447, %458, %cst_129 {dimension_numbers = #tpu.dot_dimension_numbers<[1], [0], [0], [1], [0, 0, 1, 1], [], []>} : vector<8x32xf32>, vector<32x32xf32>, vector<8x32xf32> -> vector<8x32xf32>
    %460 = vector.extract_strided_slice %0 {offsets = [26, 0], sizes = [1, 32], strides = [1, 1]} : vector<52x128xf32> to vector<1x32xf32>
    %461 = vector.broadcast %460 : vector<1x32xf32> to vector<8x32xf32>
    %462 = arith.addf %459, %461 : vector<8x32xf32>
    %463 = vector.broadcast %8 : vector<1x32xf32> to vector<8x32xf32>
    %464 = arith.mulf %452, %463 : vector<8x32xf32>
    %465 = vector.broadcast %15 : vector<1x32xf32> to vector<8x32xf32>
    %466 = arith.mulf %452, %465 : vector<8x32xf32>
    %467 = vector.broadcast %22 : vector<1x32xf32> to vector<8x32xf32>
    %468 = arith.mulf %452, %467 : vector<8x32xf32>
    %469 = vector.broadcast %29 : vector<1x32xf32> to vector<8x32xf32>
    %470 = arith.mulf %452, %469 : vector<8x32xf32>
    %471 = tpu.concatenate %464, %466, %468, %470 in 0 : vector<8x32xf32>, vector<8x32xf32>, vector<8x32xf32>, vector<8x32xf32> -> vector<32x32xf32>
    %cst_130 = arith.constant dense<0.000000e+00> : vector<32x8xf32>
    %472 = tpu.matmul %471, %457, %cst_130 {dimension_numbers = #tpu.dot_dimension_numbers<[1], [1], [0], [0], [0, 0, 1, 0], [], []>} : vector<32x32xf32>, vector<8x32xf32>, vector<32x8xf32> -> vector<32x8xf32>
    %cst_131 = arith.constant 0.353553385 : f32
    %473 = vector.broadcast %cst_131 : f32 to vector<32x8xf32>
    %474 = arith.mulf %472, %473 : vector<32x8xf32>
    %475 = arith.addf %474, %30 : vector<32x8xf32>
    %cst_132 = arith.constant dense<0xFF800000> : vector<32xf32>
    %476 = vector.multi_reduction <maximumf>, %475, %cst_132 [1] : vector<32x8xf32> to vector<32xf32>
    %477 = vector.shape_cast %476 : vector<32xf32> to vector<32x1xf32>
    %478 = vector.broadcast %477 : vector<32x1xf32> to vector<32x8xf32>
    %479 = arith.subf %475, %478 : vector<32x8xf32>
    %480 = math.exp %479 : vector<32x8xf32>
    %cst_133 = arith.constant dense<0.000000e+00> : vector<32xf32>
    %481 = vector.multi_reduction <add>, %480, %cst_133 [1] : vector<32x8xf32> to vector<32xf32>
    %482 = vector.shape_cast %481 : vector<32xf32> to vector<32x1xf32>
    %483 = tpu.reciprocal %482 {approx = true} : vector<32x1xf32> -> vector<32x1xf32>
    %484 = vector.broadcast %483 : vector<32x1xf32> to vector<32x8xf32>
    %485 = arith.mulf %480, %484 : vector<32x8xf32>
    %cst_134 = arith.constant dense<0.000000e+00> : vector<32x32xf32>
    %486 = tpu.matmul %485, %462, %cst_134 {dimension_numbers = #tpu.dot_dimension_numbers<[1], [0], [0], [1], [0, 0, 1, 1], [], []>} : vector<32x8xf32>, vector<8x32xf32>, vector<32x32xf32> -> vector<32x32xf32>
    %487 = vector.extract_strided_slice %486 {offsets = [0, 0], sizes = [8, 32], strides = [1, 1]} : vector<32x32xf32> to vector<8x32xf32>
    %488 = vector.broadcast %8 : vector<1x32xf32> to vector<8x32xf32>
    %489 = arith.mulf %487, %488 : vector<8x32xf32>
    %490 = vector.extract_strided_slice %486 {offsets = [8, 0], sizes = [8, 32], strides = [1, 1]} : vector<32x32xf32> to vector<8x32xf32>
    %491 = vector.broadcast %15 : vector<1x32xf32> to vector<8x32xf32>
    %492 = arith.mulf %490, %491 : vector<8x32xf32>
    %493 = arith.addf %489, %492 : vector<8x32xf32>
    %494 = vector.extract_strided_slice %486 {offsets = [16, 0], sizes = [8, 32], strides = [1, 1]} : vector<32x32xf32> to vector<8x32xf32>
    %495 = vector.broadcast %22 : vector<1x32xf32> to vector<8x32xf32>
    %496 = arith.mulf %494, %495 : vector<8x32xf32>
    %497 = arith.addf %493, %496 : vector<8x32xf32>
    %498 = vector.extract_strided_slice %486 {offsets = [24, 0], sizes = [8, 32], strides = [1, 1]} : vector<32x32xf32> to vector<8x32xf32>
    %499 = vector.broadcast %29 : vector<1x32xf32> to vector<8x32xf32>
    %500 = arith.mulf %498, %499 : vector<8x32xf32>
    %501 = arith.addf %497, %500 : vector<8x32xf32>
    %c728 = arith.constant 728 : index
    %c0_135 = arith.constant 0 : index
    %502 = vector.load %arg4[%c728, %c0_135] : memref<1384x32xf32, #tpu.memory_space<vmem>>, vector<32x32xf32>
    %cst_136 = arith.constant dense<0.000000e+00> : vector<8x32xf32>
    %503 = tpu.matmul %501, %502, %cst_136 {dimension_numbers = #tpu.dot_dimension_numbers<[1], [0], [0], [1], [0, 0, 1, 1], [], []>} : vector<8x32xf32>, vector<32x32xf32>, vector<8x32xf32> -> vector<8x32xf32>
    %504 = arith.addf %425, %503 : vector<8x32xf32>
    %505 = vector.extract_strided_slice %0 {offsets = [27, 0], sizes = [1, 32], strides = [1, 1]} : vector<52x128xf32> to vector<1x32xf32>
    %506 = vector.broadcast %505 : vector<1x32xf32> to vector<8x32xf32>
    %507 = arith.addf %504, %506 : vector<8x32xf32>
    %508 = vector.extract_strided_slice %0 {offsets = [28, 0], sizes = [1, 32], strides = [1, 1]} : vector<52x128xf32> to vector<1x32xf32>
    %509 = vector.extract_strided_slice %0 {offsets = [29, 0], sizes = [1, 32], strides = [1, 1]} : vector<52x128xf32> to vector<1x32xf32>
    %cst_137 = arith.constant dense<0.000000e+00> : vector<8xf32>
    %510 = vector.multi_reduction <add>, %507, %cst_137 [1] : vector<8x32xf32> to vector<8xf32>
    %511 = vector.shape_cast %510 : vector<8xf32> to vector<8x1xf32>
    %cst_138 = arith.constant 3.200000e+01 : f32
    %512 = vector.broadcast %cst_138 : f32 to vector<8x1xf32>
    %513 = arith.divf %511, %512 : vector<8x1xf32>
    %514 = vector.broadcast %513 : vector<8x1xf32> to vector<8x32xf32>
    %515 = arith.subf %507, %514 : vector<8x32xf32>
    %516 = arith.mulf %515, %515 : vector<8x32xf32>
    %cst_139 = arith.constant dense<0.000000e+00> : vector<8xf32>
    %517 = vector.multi_reduction <add>, %516, %cst_139 [1] : vector<8x32xf32> to vector<8xf32>
    %518 = vector.shape_cast %517 : vector<8xf32> to vector<8x1xf32>
    %cst_140 = arith.constant 3.200000e+01 : f32
    %519 = vector.broadcast %cst_140 : f32 to vector<8x1xf32>
    %520 = arith.divf %518, %519 : vector<8x1xf32>
    %cst_141 = arith.constant 9.99999974E-6 : f32
    %521 = vector.broadcast %cst_141 : f32 to vector<8x1xf32>
    %522 = arith.addf %520, %521 : vector<8x1xf32>
    %523 = math.rsqrt %522 : vector<8x1xf32>
    %524 = vector.broadcast %523 : vector<8x1xf32> to vector<8x32xf32>
    %525 = arith.mulf %515, %524 : vector<8x32xf32>
    %526 = vector.broadcast %508 : vector<1x32xf32> to vector<8x32xf32>
    %527 = arith.mulf %525, %526 : vector<8x32xf32>
    %528 = vector.broadcast %509 : vector<1x32xf32> to vector<8x32xf32>
    %529 = arith.addf %527, %528 : vector<8x32xf32>
    %c64_142 = arith.constant 64 : index
    %c0_143 = arith.constant 0 : index
    %530 = vector.load %arg5[%c64_142, %c0_143] : memref<128x128xf32, #tpu.memory_space<vmem>>, vector<32x128xf32>
    %cst_144 = arith.constant dense<0.000000e+00> : vector<8x128xf32>
    %531 = tpu.matmul %529, %530, %cst_144 {dimension_numbers = #tpu.dot_dimension_numbers<[1], [0], [0], [1], [0, 0, 1, 1], [], []>} : vector<8x32xf32>, vector<32x128xf32>, vector<8x128xf32> -> vector<8x128xf32>
    %532 = vector.extract_strided_slice %0 {offsets = [30, 0], sizes = [1, 128], strides = [1, 1]} : vector<52x128xf32> to vector<1x128xf32>
    %533 = vector.broadcast %532 : vector<1x128xf32> to vector<8x128xf32>
    %534 = arith.addf %531, %533 : vector<8x128xf32>
    %535 = arith.mulf %534, %534 : vector<8x128xf32>
    %536 = arith.mulf %534, %535 : vector<8x128xf32>
    %cst_145 = arith.constant 4.471500e-02 : f32
    %537 = vector.broadcast %cst_145 : f32 to vector<8x128xf32>
    %538 = arith.mulf %537, %536 : vector<8x128xf32>
    %539 = arith.addf %534, %538 : vector<8x128xf32>
    %cst_146 = arith.constant 0.797884583 : f32
    %540 = vector.broadcast %cst_146 : f32 to vector<8x128xf32>
    %541 = arith.mulf %540, %539 : vector<8x128xf32>
    %542 = math.tanh %541 : vector<8x128xf32>
    %cst_147 = arith.constant 1.000000e+00 : f32
    %543 = vector.broadcast %cst_147 : f32 to vector<8x128xf32>
    %544 = arith.addf %543, %542 : vector<8x128xf32>
    %cst_148 = arith.constant 5.000000e-01 : f32
    %545 = vector.broadcast %cst_148 : f32 to vector<8x128xf32>
    %546 = arith.mulf %545, %544 : vector<8x128xf32>
    %547 = arith.mulf %534, %546 : vector<8x128xf32>
    %c760 = arith.constant 760 : index
    %c0_149 = arith.constant 0 : index
    %548 = vector.load %arg4[%c760, %c0_149] : memref<1384x32xf32, #tpu.memory_space<vmem>>, vector<128x32xf32>
    %cst_150 = arith.constant dense<0.000000e+00> : vector<8x32xf32>
    %549 = tpu.matmul %547, %548, %cst_150 {dimension_numbers = #tpu.dot_dimension_numbers<[1], [0], [0], [1], [0, 0, 1, 1], [], []>} : vector<8x128xf32>, vector<128x32xf32>, vector<8x32xf32> -> vector<8x32xf32>
    %550 = arith.addf %507, %549 : vector<8x32xf32>
    %551 = vector.extract_strided_slice %0 {offsets = [31, 0], sizes = [1, 32], strides = [1, 1]} : vector<52x128xf32> to vector<1x32xf32>
    %552 = vector.broadcast %551 : vector<1x32xf32> to vector<8x32xf32>
    %553 = arith.addf %550, %552 : vector<8x32xf32>
    %554 = vector.extract_strided_slice %0 {offsets = [32, 0], sizes = [1, 32], strides = [1, 1]} : vector<52x128xf32> to vector<1x32xf32>
    %555 = vector.extract_strided_slice %0 {offsets = [33, 0], sizes = [1, 32], strides = [1, 1]} : vector<52x128xf32> to vector<1x32xf32>
    %cst_151 = arith.constant dense<0.000000e+00> : vector<8xf32>
    %556 = vector.multi_reduction <add>, %553, %cst_151 [1] : vector<8x32xf32> to vector<8xf32>
    %557 = vector.shape_cast %556 : vector<8xf32> to vector<8x1xf32>
    %cst_152 = arith.constant 3.200000e+01 : f32
    %558 = vector.broadcast %cst_152 : f32 to vector<8x1xf32>
    %559 = arith.divf %557, %558 : vector<8x1xf32>
    %560 = vector.broadcast %559 : vector<8x1xf32> to vector<8x32xf32>
    %561 = arith.subf %553, %560 : vector<8x32xf32>
    %562 = arith.mulf %561, %561 : vector<8x32xf32>
    %cst_153 = arith.constant dense<0.000000e+00> : vector<8xf32>
    %563 = vector.multi_reduction <add>, %562, %cst_153 [1] : vector<8x32xf32> to vector<8xf32>
    %564 = vector.shape_cast %563 : vector<8xf32> to vector<8x1xf32>
    %cst_154 = arith.constant 3.200000e+01 : f32
    %565 = vector.broadcast %cst_154 : f32 to vector<8x1xf32>
    %566 = arith.divf %564, %565 : vector<8x1xf32>
    %cst_155 = arith.constant 9.99999974E-6 : f32
    %567 = vector.broadcast %cst_155 : f32 to vector<8x1xf32>
    %568 = arith.addf %566, %567 : vector<8x1xf32>
    %569 = math.rsqrt %568 : vector<8x1xf32>
    %570 = vector.broadcast %569 : vector<8x1xf32> to vector<8x32xf32>
    %571 = arith.mulf %561, %570 : vector<8x32xf32>
    %572 = vector.broadcast %554 : vector<1x32xf32> to vector<8x32xf32>
    %573 = arith.mulf %571, %572 : vector<8x32xf32>
    %574 = vector.broadcast %555 : vector<1x32xf32> to vector<8x32xf32>
    %575 = arith.addf %573, %574 : vector<8x32xf32>
    %c888 = arith.constant 888 : index
    %c0_156 = arith.constant 0 : index
    %576 = vector.load %arg4[%c888, %c0_156] : memref<1384x32xf32, #tpu.memory_space<vmem>>, vector<32x32xf32>
    %cst_157 = arith.constant dense<0.000000e+00> : vector<8x32xf32>
    %577 = tpu.matmul %575, %576, %cst_157 {dimension_numbers = #tpu.dot_dimension_numbers<[1], [0], [0], [1], [0, 0, 1, 1], [], []>} : vector<8x32xf32>, vector<32x32xf32>, vector<8x32xf32> -> vector<8x32xf32>
    %578 = vector.extract_strided_slice %0 {offsets = [34, 0], sizes = [1, 32], strides = [1, 1]} : vector<52x128xf32> to vector<1x32xf32>
    %579 = vector.broadcast %578 : vector<1x32xf32> to vector<8x32xf32>
    %580 = arith.addf %577, %579 : vector<8x32xf32>
    %c920 = arith.constant 920 : index
    %c0_158 = arith.constant 0 : index
    %581 = vector.load %arg4[%c920, %c0_158] : memref<1384x32xf32, #tpu.memory_space<vmem>>, vector<32x32xf32>
    %cst_159 = arith.constant dense<0.000000e+00> : vector<8x32xf32>
    %582 = tpu.matmul %575, %581, %cst_159 {dimension_numbers = #tpu.dot_dimension_numbers<[1], [0], [0], [1], [0, 0, 1, 1], [], []>} : vector<8x32xf32>, vector<32x32xf32>, vector<8x32xf32> -> vector<8x32xf32>
    %583 = vector.extract_strided_slice %0 {offsets = [35, 0], sizes = [1, 32], strides = [1, 1]} : vector<52x128xf32> to vector<1x32xf32>
    %584 = vector.broadcast %583 : vector<1x32xf32> to vector<8x32xf32>
    %585 = arith.addf %582, %584 : vector<8x32xf32>
    %c952 = arith.constant 952 : index
    %c0_160 = arith.constant 0 : index
    %586 = vector.load %arg4[%c952, %c0_160] : memref<1384x32xf32, #tpu.memory_space<vmem>>, vector<32x32xf32>
    %cst_161 = arith.constant dense<0.000000e+00> : vector<8x32xf32>
    %587 = tpu.matmul %575, %586, %cst_161 {dimension_numbers = #tpu.dot_dimension_numbers<[1], [0], [0], [1], [0, 0, 1, 1], [], []>} : vector<8x32xf32>, vector<32x32xf32>, vector<8x32xf32> -> vector<8x32xf32>
    %588 = vector.extract_strided_slice %0 {offsets = [36, 0], sizes = [1, 32], strides = [1, 1]} : vector<52x128xf32> to vector<1x32xf32>
    %589 = vector.broadcast %588 : vector<1x32xf32> to vector<8x32xf32>
    %590 = arith.addf %587, %589 : vector<8x32xf32>
    %591 = vector.broadcast %8 : vector<1x32xf32> to vector<8x32xf32>
    %592 = arith.mulf %580, %591 : vector<8x32xf32>
    %593 = vector.broadcast %15 : vector<1x32xf32> to vector<8x32xf32>
    %594 = arith.mulf %580, %593 : vector<8x32xf32>
    %595 = vector.broadcast %22 : vector<1x32xf32> to vector<8x32xf32>
    %596 = arith.mulf %580, %595 : vector<8x32xf32>
    %597 = vector.broadcast %29 : vector<1x32xf32> to vector<8x32xf32>
    %598 = arith.mulf %580, %597 : vector<8x32xf32>
    %599 = tpu.concatenate %592, %594, %596, %598 in 0 : vector<8x32xf32>, vector<8x32xf32>, vector<8x32xf32>, vector<8x32xf32> -> vector<32x32xf32>
    %cst_162 = arith.constant dense<0.000000e+00> : vector<32x8xf32>
    %600 = tpu.matmul %599, %585, %cst_162 {dimension_numbers = #tpu.dot_dimension_numbers<[1], [1], [0], [0], [0, 0, 1, 0], [], []>} : vector<32x32xf32>, vector<8x32xf32>, vector<32x8xf32> -> vector<32x8xf32>
    %cst_163 = arith.constant 0.353553385 : f32
    %601 = vector.broadcast %cst_163 : f32 to vector<32x8xf32>
    %602 = arith.mulf %600, %601 : vector<32x8xf32>
    %603 = arith.addf %602, %30 : vector<32x8xf32>
    %cst_164 = arith.constant dense<0xFF800000> : vector<32xf32>
    %604 = vector.multi_reduction <maximumf>, %603, %cst_164 [1] : vector<32x8xf32> to vector<32xf32>
    %605 = vector.shape_cast %604 : vector<32xf32> to vector<32x1xf32>
    %606 = vector.broadcast %605 : vector<32x1xf32> to vector<32x8xf32>
    %607 = arith.subf %603, %606 : vector<32x8xf32>
    %608 = math.exp %607 : vector<32x8xf32>
    %cst_165 = arith.constant dense<0.000000e+00> : vector<32xf32>
    %609 = vector.multi_reduction <add>, %608, %cst_165 [1] : vector<32x8xf32> to vector<32xf32>
    %610 = vector.shape_cast %609 : vector<32xf32> to vector<32x1xf32>
    %611 = tpu.reciprocal %610 {approx = true} : vector<32x1xf32> -> vector<32x1xf32>
    %612 = vector.broadcast %611 : vector<32x1xf32> to vector<32x8xf32>
    %613 = arith.mulf %608, %612 : vector<32x8xf32>
    %cst_166 = arith.constant dense<0.000000e+00> : vector<32x32xf32>
    %614 = tpu.matmul %613, %590, %cst_166 {dimension_numbers = #tpu.dot_dimension_numbers<[1], [0], [0], [1], [0, 0, 1, 1], [], []>} : vector<32x8xf32>, vector<8x32xf32>, vector<32x32xf32> -> vector<32x32xf32>
    %615 = vector.extract_strided_slice %614 {offsets = [0, 0], sizes = [8, 32], strides = [1, 1]} : vector<32x32xf32> to vector<8x32xf32>
    %616 = vector.broadcast %8 : vector<1x32xf32> to vector<8x32xf32>
    %617 = arith.mulf %615, %616 : vector<8x32xf32>
    %618 = vector.extract_strided_slice %614 {offsets = [8, 0], sizes = [8, 32], strides = [1, 1]} : vector<32x32xf32> to vector<8x32xf32>
    %619 = vector.broadcast %15 : vector<1x32xf32> to vector<8x32xf32>
    %620 = arith.mulf %618, %619 : vector<8x32xf32>
    %621 = arith.addf %617, %620 : vector<8x32xf32>
    %622 = vector.extract_strided_slice %614 {offsets = [16, 0], sizes = [8, 32], strides = [1, 1]} : vector<32x32xf32> to vector<8x32xf32>
    %623 = vector.broadcast %22 : vector<1x32xf32> to vector<8x32xf32>
    %624 = arith.mulf %622, %623 : vector<8x32xf32>
    %625 = arith.addf %621, %624 : vector<8x32xf32>
    %626 = vector.extract_strided_slice %614 {offsets = [24, 0], sizes = [8, 32], strides = [1, 1]} : vector<32x32xf32> to vector<8x32xf32>
    %627 = vector.broadcast %29 : vector<1x32xf32> to vector<8x32xf32>
    %628 = arith.mulf %626, %627 : vector<8x32xf32>
    %629 = arith.addf %625, %628 : vector<8x32xf32>
    %c984 = arith.constant 984 : index
    %c0_167 = arith.constant 0 : index
    %630 = vector.load %arg4[%c984, %c0_167] : memref<1384x32xf32, #tpu.memory_space<vmem>>, vector<32x32xf32>
    %cst_168 = arith.constant dense<0.000000e+00> : vector<8x32xf32>
    %631 = tpu.matmul %629, %630, %cst_168 {dimension_numbers = #tpu.dot_dimension_numbers<[1], [0], [0], [1], [0, 0, 1, 1], [], []>} : vector<8x32xf32>, vector<32x32xf32>, vector<8x32xf32> -> vector<8x32xf32>
    %632 = arith.addf %553, %631 : vector<8x32xf32>
    %633 = vector.extract_strided_slice %0 {offsets = [37, 0], sizes = [1, 32], strides = [1, 1]} : vector<52x128xf32> to vector<1x32xf32>
    %634 = vector.broadcast %633 : vector<1x32xf32> to vector<8x32xf32>
    %635 = arith.addf %632, %634 : vector<8x32xf32>
    %636 = vector.extract_strided_slice %0 {offsets = [38, 0], sizes = [1, 32], strides = [1, 1]} : vector<52x128xf32> to vector<1x32xf32>
    %637 = vector.extract_strided_slice %0 {offsets = [39, 0], sizes = [1, 32], strides = [1, 1]} : vector<52x128xf32> to vector<1x32xf32>
    %cst_169 = arith.constant dense<0.000000e+00> : vector<8xf32>
    %638 = vector.multi_reduction <add>, %635, %cst_169 [1] : vector<8x32xf32> to vector<8xf32>
    %639 = vector.shape_cast %638 : vector<8xf32> to vector<8x1xf32>
    %cst_170 = arith.constant 3.200000e+01 : f32
    %640 = vector.broadcast %cst_170 : f32 to vector<8x1xf32>
    %641 = arith.divf %639, %640 : vector<8x1xf32>
    %642 = vector.broadcast %641 : vector<8x1xf32> to vector<8x32xf32>
    %643 = arith.subf %635, %642 : vector<8x32xf32>
    %644 = arith.mulf %643, %643 : vector<8x32xf32>
    %cst_171 = arith.constant dense<0.000000e+00> : vector<8xf32>
    %645 = vector.multi_reduction <add>, %644, %cst_171 [1] : vector<8x32xf32> to vector<8xf32>
    %646 = vector.shape_cast %645 : vector<8xf32> to vector<8x1xf32>
    %cst_172 = arith.constant 3.200000e+01 : f32
    %647 = vector.broadcast %cst_172 : f32 to vector<8x1xf32>
    %648 = arith.divf %646, %647 : vector<8x1xf32>
    %cst_173 = arith.constant 9.99999974E-6 : f32
    %649 = vector.broadcast %cst_173 : f32 to vector<8x1xf32>
    %650 = arith.addf %648, %649 : vector<8x1xf32>
    %651 = math.rsqrt %650 : vector<8x1xf32>
    %652 = vector.broadcast %651 : vector<8x1xf32> to vector<8x32xf32>
    %653 = arith.mulf %643, %652 : vector<8x32xf32>
    %654 = vector.broadcast %636 : vector<1x32xf32> to vector<8x32xf32>
    %655 = arith.mulf %653, %654 : vector<8x32xf32>
    %656 = vector.broadcast %637 : vector<1x32xf32> to vector<8x32xf32>
    %657 = arith.addf %655, %656 : vector<8x32xf32>
    %c96 = arith.constant 96 : index
    %c0_174 = arith.constant 0 : index
    %658 = vector.load %arg5[%c96, %c0_174] : memref<128x128xf32, #tpu.memory_space<vmem>>, vector<32x128xf32>
    %cst_175 = arith.constant dense<0.000000e+00> : vector<8x128xf32>
    %659 = tpu.matmul %657, %658, %cst_175 {dimension_numbers = #tpu.dot_dimension_numbers<[1], [0], [0], [1], [0, 0, 1, 1], [], []>} : vector<8x32xf32>, vector<32x128xf32>, vector<8x128xf32> -> vector<8x128xf32>
    %660 = vector.extract_strided_slice %0 {offsets = [40, 0], sizes = [1, 128], strides = [1, 1]} : vector<52x128xf32> to vector<1x128xf32>
    %661 = vector.broadcast %660 : vector<1x128xf32> to vector<8x128xf32>
    %662 = arith.addf %659, %661 : vector<8x128xf32>
    %663 = arith.mulf %662, %662 : vector<8x128xf32>
    %664 = arith.mulf %662, %663 : vector<8x128xf32>
    %cst_176 = arith.constant 4.471500e-02 : f32
    %665 = vector.broadcast %cst_176 : f32 to vector<8x128xf32>
    %666 = arith.mulf %665, %664 : vector<8x128xf32>
    %667 = arith.addf %662, %666 : vector<8x128xf32>
    %cst_177 = arith.constant 0.797884583 : f32
    %668 = vector.broadcast %cst_177 : f32 to vector<8x128xf32>
    %669 = arith.mulf %668, %667 : vector<8x128xf32>
    %670 = math.tanh %669 : vector<8x128xf32>
    %cst_178 = arith.constant 1.000000e+00 : f32
    %671 = vector.broadcast %cst_178 : f32 to vector<8x128xf32>
    %672 = arith.addf %671, %670 : vector<8x128xf32>
    %cst_179 = arith.constant 5.000000e-01 : f32
    %673 = vector.broadcast %cst_179 : f32 to vector<8x128xf32>
    %674 = arith.mulf %673, %672 : vector<8x128xf32>
    %675 = arith.mulf %662, %674 : vector<8x128xf32>
    %c1016 = arith.constant 1016 : index
    %c0_180 = arith.constant 0 : index
    %676 = vector.load %arg4[%c1016, %c0_180] : memref<1384x32xf32, #tpu.memory_space<vmem>>, vector<128x32xf32>
    %cst_181 = arith.constant dense<0.000000e+00> : vector<8x32xf32>
    %677 = tpu.matmul %675, %676, %cst_181 {dimension_numbers = #tpu.dot_dimension_numbers<[1], [0], [0], [1], [0, 0, 1, 1], [], []>} : vector<8x128xf32>, vector<128x32xf32>, vector<8x32xf32> -> vector<8x32xf32>
    %678 = arith.addf %635, %677 : vector<8x32xf32>
    %679 = vector.extract_strided_slice %0 {offsets = [41, 0], sizes = [1, 32], strides = [1, 1]} : vector<52x128xf32> to vector<1x32xf32>
    %680 = vector.broadcast %679 : vector<1x32xf32> to vector<8x32xf32>
    %681 = arith.addf %678, %680 : vector<8x32xf32>
    %682 = tpu.iota {dimensions = array<i32: 0>} : vector<8x1xi32>
    %cst_182 = arith.constant 1.000000e+00 : f32
    %683 = vector.broadcast %cst_182 : f32 to vector<8x1xf32>
    %cst_183 = arith.constant 1.000000e+00 : f32
    %684 = vector.broadcast %cst_183 : f32 to vector<8x1xf32>
    %c0_i32_184 = arith.constant 0 : i32
    %685 = vector.broadcast %c0_i32_184 : i32 to vector<8x1xi32>
    %686 = arith.cmpi ne, %682, %685 : vector<8x1xi32>
    %687 = arith.extui %686 : vector<8x1xi1> to vector<8x1xi32>
    %688 = arith.sitofp %687 : vector<8x1xi32> to vector<8x1xf32>
    %689 = arith.mulf %683, %688 : vector<8x1xf32>
    %c3_i32 = arith.constant 3 : i32
    %690 = vector.broadcast %c3_i32 : i32 to vector<8x1xi32>
    %691 = arith.cmpi ne, %682, %690 : vector<8x1xi32>
    %692 = arith.extui %691 : vector<8x1xi1> to vector<8x1xi32>
    %693 = arith.sitofp %692 : vector<8x1xi32> to vector<8x1xf32>
    %694 = arith.mulf %684, %693 : vector<8x1xf32>
    %c4_i32 = arith.constant 4 : i32
    %695 = vector.broadcast %c4_i32 : i32 to vector<8x1xi32>
    %696 = arith.cmpi ne, %682, %695 : vector<8x1xi32>
    %697 = arith.extui %696 : vector<8x1xi1> to vector<8x1xi32>
    %698 = arith.sitofp %697 : vector<8x1xi32> to vector<8x1xf32>
    %699 = arith.mulf %689, %698 : vector<8x1xf32>
    %c7_i32_185 = arith.constant 7 : i32
    %700 = vector.broadcast %c7_i32_185 : i32 to vector<8x1xi32>
    %701 = arith.cmpi ne, %682, %700 : vector<8x1xi32>
    %702 = arith.extui %701 : vector<8x1xi1> to vector<8x1xi32>
    %703 = arith.sitofp %702 : vector<8x1xi32> to vector<8x1xf32>
    %704 = arith.mulf %694, %703 : vector<8x1xf32>
    %705 = vector.extract_strided_slice %681 {offsets = [7, 0], sizes = [1, 32], strides = [1, 1]} : vector<8x32xf32> to vector<1x32xf32>
    %706 = vector.extract_strided_slice %681 {offsets = [0, 0], sizes = [7, 32], strides = [1, 1]} : vector<8x32xf32> to vector<7x32xf32>
    %707 = tpu.concatenate %705, %706 in 0 : vector<1x32xf32>, vector<7x32xf32> -> vector<8x32xf32>
    %708 = vector.broadcast %699 : vector<8x1xf32> to vector<8x32xf32>
    %709 = arith.mulf %707, %708 : vector<8x32xf32>
    %710 = vector.extract_strided_slice %681 {offsets = [1, 0], sizes = [7, 32], strides = [1, 1]} : vector<8x32xf32> to vector<7x32xf32>
    %711 = vector.extract_strided_slice %681 {offsets = [0, 0], sizes = [1, 32], strides = [1, 1]} : vector<8x32xf32> to vector<1x32xf32>
    %712 = tpu.concatenate %710, %711 in 0 : vector<7x32xf32>, vector<1x32xf32> -> vector<8x32xf32>
    %713 = vector.broadcast %704 : vector<8x1xf32> to vector<8x32xf32>
    %714 = arith.mulf %712, %713 : vector<8x32xf32>
    %715 = vector.extract_strided_slice %0 {offsets = [49, 0], sizes = [1, 32], strides = [1, 1]} : vector<52x128xf32> to vector<1x32xf32>
    %c1224 = arith.constant 1224 : index
    %c0_186 = arith.constant 0 : index
    %716 = vector.load %arg4[%c1224, %c0_186] : memref<1384x32xf32, #tpu.memory_space<vmem>>, vector<32x32xf32>
    %cst_187 = arith.constant dense<0.000000e+00> : vector<8x32xf32>
    %717 = tpu.matmul %681, %716, %cst_187 {dimension_numbers = #tpu.dot_dimension_numbers<[1], [0], [0], [1], [0, 0, 1, 1], [], []>} : vector<8x32xf32>, vector<32x32xf32>, vector<8x32xf32> -> vector<8x32xf32>
    %c1288 = arith.constant 1288 : index
    %c0_188 = arith.constant 0 : index
    %718 = vector.load %arg4[%c1288, %c0_188] : memref<1384x32xf32, #tpu.memory_space<vmem>>, vector<32x32xf32>
    %cst_189 = arith.constant dense<0.000000e+00> : vector<8x32xf32>
    %719 = tpu.matmul %709, %718, %cst_189 {dimension_numbers = #tpu.dot_dimension_numbers<[1], [0], [0], [1], [0, 0, 1, 1], [], []>} : vector<8x32xf32>, vector<32x32xf32>, vector<8x32xf32> -> vector<8x32xf32>
    %720 = arith.addf %717, %719 : vector<8x32xf32>
    %721 = vector.broadcast %715 : vector<1x32xf32> to vector<8x32xf32>
    %722 = arith.addf %720, %721 : vector<8x32xf32>
    %c1256 = arith.constant 1256 : index
    %c0_190 = arith.constant 0 : index
    %723 = vector.load %arg4[%c1256, %c0_190] : memref<1384x32xf32, #tpu.memory_space<vmem>>, vector<32x32xf32>
    %cst_191 = arith.constant dense<0.000000e+00> : vector<8x32xf32>
    %724 = tpu.matmul %681, %723, %cst_191 {dimension_numbers = #tpu.dot_dimension_numbers<[1], [0], [0], [1], [0, 0, 1, 1], [], []>} : vector<8x32xf32>, vector<32x32xf32>, vector<8x32xf32> -> vector<8x32xf32>
    %c1192 = arith.constant 1192 : index
    %c0_192 = arith.constant 0 : index
    %725 = vector.load %arg4[%c1192, %c0_192] : memref<1384x32xf32, #tpu.memory_space<vmem>>, vector<32x32xf32>
    %cst_193 = arith.constant dense<0.000000e+00> : vector<8x32xf32>
    %726 = tpu.matmul %714, %725, %cst_193 {dimension_numbers = #tpu.dot_dimension_numbers<[1], [0], [0], [1], [0, 0, 1, 1], [], []>} : vector<8x32xf32>, vector<32x32xf32>, vector<8x32xf32> -> vector<8x32xf32>
    %727 = arith.addf %724, %726 : vector<8x32xf32>
    %728 = vector.broadcast %715 : vector<1x32xf32> to vector<8x32xf32>
    %729 = arith.addf %727, %728 : vector<8x32xf32>
    %730 = vector.extract_strided_slice %0 {offsets = [47, 0], sizes = [1, 32], strides = [1, 1]} : vector<52x128xf32> to vector<1x32xf32>
    %731 = vector.extract_strided_slice %0 {offsets = [48, 0], sizes = [1, 32], strides = [1, 1]} : vector<52x128xf32> to vector<1x32xf32>
    %cst_194 = arith.constant dense<0.000000e+00> : vector<8xf32>
    %732 = vector.multi_reduction <add>, %722, %cst_194 [1] : vector<8x32xf32> to vector<8xf32>
    %733 = vector.shape_cast %732 : vector<8xf32> to vector<8x1xf32>
    %cst_195 = arith.constant 3.200000e+01 : f32
    %734 = vector.broadcast %cst_195 : f32 to vector<8x1xf32>
    %735 = arith.divf %733, %734 : vector<8x1xf32>
    %736 = vector.broadcast %735 : vector<8x1xf32> to vector<8x32xf32>
    %737 = arith.subf %722, %736 : vector<8x32xf32>
    %738 = arith.mulf %737, %737 : vector<8x32xf32>
    %cst_196 = arith.constant dense<0.000000e+00> : vector<8xf32>
    %739 = vector.multi_reduction <add>, %738, %cst_196 [1] : vector<8x32xf32> to vector<8xf32>
    %740 = vector.shape_cast %739 : vector<8xf32> to vector<8x1xf32>
    %cst_197 = arith.constant 3.200000e+01 : f32
    %741 = vector.broadcast %cst_197 : f32 to vector<8x1xf32>
    %742 = arith.divf %740, %741 : vector<8x1xf32>
    %cst_198 = arith.constant 9.99999974E-6 : f32
    %743 = vector.broadcast %cst_198 : f32 to vector<8x1xf32>
    %744 = arith.addf %742, %743 : vector<8x1xf32>
    %745 = math.rsqrt %744 : vector<8x1xf32>
    %746 = vector.broadcast %745 : vector<8x1xf32> to vector<8x32xf32>
    %747 = arith.mulf %737, %746 : vector<8x32xf32>
    %748 = vector.broadcast %730 : vector<1x32xf32> to vector<8x32xf32>
    %749 = arith.mulf %747, %748 : vector<8x32xf32>
    %750 = vector.broadcast %731 : vector<1x32xf32> to vector<8x32xf32>
    %751 = arith.addf %749, %750 : vector<8x32xf32>
    %c1320 = arith.constant 1320 : index
    %c0_199 = arith.constant 0 : index
    %752 = vector.load %arg4[%c1320, %c0_199] : memref<1384x32xf32, #tpu.memory_space<vmem>>, vector<32x32xf32>
    %cst_200 = arith.constant dense<0.000000e+00> : vector<8x32xf32>
    %753 = tpu.matmul %751, %752, %cst_200 {dimension_numbers = #tpu.dot_dimension_numbers<[1], [0], [0], [1], [0, 0, 1, 1], [], []>} : vector<8x32xf32>, vector<32x32xf32>, vector<8x32xf32> -> vector<8x32xf32>
    %c1352 = arith.constant 1352 : index
    %c0_201 = arith.constant 0 : index
    %754 = vector.load %arg4[%c1352, %c0_201] : memref<1384x32xf32, #tpu.memory_space<vmem>>, vector<32x32xf32>
    %cst_202 = arith.constant dense<0.000000e+00> : vector<8x32xf32>
    %755 = tpu.matmul %753, %754, %cst_202 {dimension_numbers = #tpu.dot_dimension_numbers<[1], [0], [0], [1], [0, 0, 1, 1], [], []>} : vector<8x32xf32>, vector<32x32xf32>, vector<8x32xf32> -> vector<8x32xf32>
    %756 = vector.extract_strided_slice %0 {offsets = [50, 0], sizes = [1, 32], strides = [1, 1]} : vector<52x128xf32> to vector<1x32xf32>
    %757 = vector.broadcast %756 : vector<1x32xf32> to vector<8x32xf32>
    %758 = arith.addf %755, %757 : vector<8x32xf32>
    %cst_203 = arith.constant 0.000000e+00 : f32
    %759 = vector.broadcast %cst_203 : f32 to vector<8x32xf32>
    %760 = arith.maximumf %758, %759 : vector<8x32xf32>
    %c32_204 = arith.constant 32 : index
    %c0_205 = arith.constant 0 : index
    %761 = vector.load %arg6[%c32_204, %c0_205] : memref<72x16xf32, #tpu.memory_space<vmem>>, vector<32x16xf32>
    %cst_206 = arith.constant dense<0.000000e+00> : vector<8x16xf32>
    %762 = tpu.matmul %760, %761, %cst_206 {dimension_numbers = #tpu.dot_dimension_numbers<[1], [0], [0], [1], [0, 0, 1, 1], [], []>} : vector<8x32xf32>, vector<32x16xf32>, vector<8x16xf32> -> vector<8x16xf32>
    %763 = vector.extract_strided_slice %0 {offsets = [51, 0], sizes = [1, 16], strides = [1, 1]} : vector<52x128xf32> to vector<1x16xf32>
    %764 = vector.broadcast %763 : vector<1x16xf32> to vector<8x16xf32>
    %765 = arith.addf %762, %764 : vector<8x16xf32>
    %766 = vector.extract_strided_slice %0 {offsets = [47, 0], sizes = [1, 32], strides = [1, 1]} : vector<52x128xf32> to vector<1x32xf32>
    %767 = vector.extract_strided_slice %0 {offsets = [48, 0], sizes = [1, 32], strides = [1, 1]} : vector<52x128xf32> to vector<1x32xf32>
    %cst_207 = arith.constant dense<0.000000e+00> : vector<8xf32>
    %768 = vector.multi_reduction <add>, %729, %cst_207 [1] : vector<8x32xf32> to vector<8xf32>
    %769 = vector.shape_cast %768 : vector<8xf32> to vector<8x1xf32>
    %cst_208 = arith.constant 3.200000e+01 : f32
    %770 = vector.broadcast %cst_208 : f32 to vector<8x1xf32>
    %771 = arith.divf %769, %770 : vector<8x1xf32>
    %772 = vector.broadcast %771 : vector<8x1xf32> to vector<8x32xf32>
    %773 = arith.subf %729, %772 : vector<8x32xf32>
    %774 = arith.mulf %773, %773 : vector<8x32xf32>
    %cst_209 = arith.constant dense<0.000000e+00> : vector<8xf32>
    %775 = vector.multi_reduction <add>, %774, %cst_209 [1] : vector<8x32xf32> to vector<8xf32>
    %776 = vector.shape_cast %775 : vector<8xf32> to vector<8x1xf32>
    %cst_210 = arith.constant 3.200000e+01 : f32
    %777 = vector.broadcast %cst_210 : f32 to vector<8x1xf32>
    %778 = arith.divf %776, %777 : vector<8x1xf32>
    %cst_211 = arith.constant 9.99999974E-6 : f32
    %779 = vector.broadcast %cst_211 : f32 to vector<8x1xf32>
    %780 = arith.addf %778, %779 : vector<8x1xf32>
    %781 = math.rsqrt %780 : vector<8x1xf32>
    %782 = vector.broadcast %781 : vector<8x1xf32> to vector<8x32xf32>
    %783 = arith.mulf %773, %782 : vector<8x32xf32>
    %784 = vector.broadcast %766 : vector<1x32xf32> to vector<8x32xf32>
    %785 = arith.mulf %783, %784 : vector<8x32xf32>
    %786 = vector.broadcast %767 : vector<1x32xf32> to vector<8x32xf32>
    %787 = arith.addf %785, %786 : vector<8x32xf32>
    %c1320_212 = arith.constant 1320 : index
    %c0_213 = arith.constant 0 : index
    %788 = vector.load %arg4[%c1320_212, %c0_213] : memref<1384x32xf32, #tpu.memory_space<vmem>>, vector<32x32xf32>
    %cst_214 = arith.constant dense<0.000000e+00> : vector<8x32xf32>
    %789 = tpu.matmul %787, %788, %cst_214 {dimension_numbers = #tpu.dot_dimension_numbers<[1], [0], [0], [1], [0, 0, 1, 1], [], []>} : vector<8x32xf32>, vector<32x32xf32>, vector<8x32xf32> -> vector<8x32xf32>
    %c1352_215 = arith.constant 1352 : index
    %c0_216 = arith.constant 0 : index
    %790 = vector.load %arg4[%c1352_215, %c0_216] : memref<1384x32xf32, #tpu.memory_space<vmem>>, vector<32x32xf32>
    %cst_217 = arith.constant dense<0.000000e+00> : vector<8x32xf32>
    %791 = tpu.matmul %789, %790, %cst_217 {dimension_numbers = #tpu.dot_dimension_numbers<[1], [0], [0], [1], [0, 0, 1, 1], [], []>} : vector<8x32xf32>, vector<32x32xf32>, vector<8x32xf32> -> vector<8x32xf32>
    %792 = vector.extract_strided_slice %0 {offsets = [50, 0], sizes = [1, 32], strides = [1, 1]} : vector<52x128xf32> to vector<1x32xf32>
    %793 = vector.broadcast %792 : vector<1x32xf32> to vector<8x32xf32>
    %794 = arith.addf %791, %793 : vector<8x32xf32>
    %cst_218 = arith.constant 0.000000e+00 : f32
    %795 = vector.broadcast %cst_218 : f32 to vector<8x32xf32>
    %796 = arith.maximumf %794, %795 : vector<8x32xf32>
    %c32_219 = arith.constant 32 : index
    %c0_220 = arith.constant 0 : index
    %797 = vector.load %arg6[%c32_219, %c0_220] : memref<72x16xf32, #tpu.memory_space<vmem>>, vector<32x16xf32>
    %cst_221 = arith.constant dense<0.000000e+00> : vector<8x16xf32>
    %798 = tpu.matmul %796, %797, %cst_221 {dimension_numbers = #tpu.dot_dimension_numbers<[1], [0], [0], [1], [0, 0, 1, 1], [], []>} : vector<8x32xf32>, vector<32x16xf32>, vector<8x16xf32> -> vector<8x16xf32>
    %799 = vector.extract_strided_slice %0 {offsets = [51, 0], sizes = [1, 16], strides = [1, 1]} : vector<52x128xf32> to vector<1x16xf32>
    %800 = vector.broadcast %799 : vector<1x16xf32> to vector<8x16xf32>
    %801 = arith.addf %798, %800 : vector<8x16xf32>
    %802 = tpu.concatenate %765, %801 in 1 : vector<8x16xf32>, vector<8x16xf32> -> vector<8x32xf32>
    %c0_222 = arith.constant 0 : index
    %c0_223 = arith.constant 0 : index
    %803 = vector.load %arg8[%c0_222, %c0_223] : memref<8x32xf32, #tpu.memory_space<vmem>>, vector<8x32xf32>
    tpu.vector_store %arg8[%c0_222, %c0_223], %802 {strides = array<i32>} : memref<8x32xf32, #tpu.memory_space<vmem>>, vector<8x32xf32>,
    return
  }
}

</mosaic_0001>

<bundles_post_ra>
// kernel: transformer_vqvae_forward.1
= control target key start
LH: loop header
LB: loop body
LE: loop exit
PB: predicated region body
PF: predicated region fallthrough
CT: control target
= control target key end

     0   :  { %vm9061_vm0 = vcmask 130048   ;;  %v7423_v4 = vmov 0   ;;  %s9050_s0 = inlined_call_operand.vmem [shape: f32[16,16], index: 0, kind: input, shape index: {}]   ;;  %s9051_s1 = inlined_call_operand.vmem [shape: f32[16,1], index: 1, kind: input, shape index: {}]   ;;  %s9052_s2 = inlined_call_operand.vmem [shape: f32[32,8], index: 2, kind: input, shape index: {}]   ;;  %s9053_s3 = inlined_call_operand.vmem [shape: f32[8,1], index: 3, kind: input, shape index: {}]   ;;  %s9054_s4 = inlined_call_operand.vmem [shape: f32[1384,32], index: 4, kind: input, shape index: {}]   ;;  %s9055_s5 = inlined_call_operand.vmem [shape: f32[128,128], index: 5, kind: input, shape index: {}]   ;;  %s9056_s6 = inlined_call_operand.vmem [shape: f32[72,16], index: 6, kind: input, shape index: {}]   ;;  %s9057_s7 = inlined_call_operand.vmem [shape: f32[52,128], index: 7, kind: input, shape index: {}]   ;;  %s9058_s8 = inlined_call_operand.vmem [shape: f32[8,32], index: 8, kind: output, shape index: {0}]   ;;  %s9059_s9 = inlined_call_operand.vmem [shape: s32[8,1], index: 9, kind: output, shape index: {1}]   ;;  %s9060_s10 = inlined_call_operand.hbm [shape: f32[1,1], index: 10, kind: output, shape index: {2}]  }
   0x1   :  { %v70_v0 = vld [vmem:[%s9054_s4] sm:$0xff]  ;;  %v71_v1 = vld [vmem:[%s9054_s4 + $0x8] sm:$0xff]  ;;  %7294 = vset.pattern.permute.xlu0 %v7423_v4  ;;  %v227_v6 = vld [vmem:[%s9054_s4 + $0x38] sm:$0xff]  ;;  %7295 = vset.pattern.permute.xlu1 %v7423_v4 }
   0x2   :  { %v66_v2 = vld [vmem:[%s9050_s0] sm:$0xff]  ;;  %v6964_v3 = vpack.c.bf16 %v71_v1, %v70_v0 }
   0x3   :  { %6355 = vmatprep.mubr.msk.f32.mxu0 %vm9061_vm0, %v66_v2  ;;  %v68_v5 = vld [vmem:[%s9051_s1] sm:$0xff] }
   0x4   :  { %160 = vperm.xlu0 %7294, %v68_v5   ;;  %v228_v7 = vld [vmem:[%s9054_s4 + $0x40] sm:$0xff] }
   0x5   :  { %16 = vsyncpa [#allocation3], 0  ;;  %6965 = vmatprep.subr.bf16.mxu0 %v6964_v3  ;;  %v69_v8 = vld [vmem:[%s9051_s1 + $0x8] sm:$0xff]  ;;  %v6968_v9 = vpack.c.bf16 %v228_v7, %v227_v6  ;;  %v230_v12 = vld [vmem:[%s9054_s4 + $0x50] sm:$0xff]  ;;  %v40_v17 = vlaneseq  ;;  %vm231_vm1 = vcmask 261120   ;;  %vm205_vm3 = vcmask 1040384  }
   0x6   :  { %6967 = vmatpush3.bf16.msra.mxu0 %v6964_v3  ;;  %v67_v10 = vld [vmem:[%s9050_s0 + $0x8] sm:$0xff]  ;;  %v223_v14 = vld [vmem:[%s9054_s4 + $0x18] sm:$0xff]  ;;  %v224_v15 = vld [vmem:[%s9054_s4 + $0x20] sm:$0xff]  ;;  %vm213_vm4 = vcmask 1046528   ;;  %v9065_v38 = vmov 0.0   ;;  %vm529_vm8 = vcmask 254976  }
   0x7   :  { %6969 = vmatprep.subr.bf16.mxu1 %v6968_v9  ;;  %v229_v11 = vld [vmem:[%s9054_s4 + $0x48] sm:$0xff]  ;;  %v6976_v16 = vpack.c.bf16 %v224_v15, %v223_v14  ;;  %v7524_v18 = vshrl.u32 %v40_v17, 7  ;;  %v7532_v20 = vld [vmem:[%s9057_s7] sm:$0xff]  ;;  %v226_v29 = vld [vmem:[%s9054_s4 + $0x30] sm:$0xff]  ;;  %v7425_v57 = vmov 1983009808  }
   0x8   :  { %165 = vperm.xlu0 %7294, %v69_v8   ;;  %6971 = vmatpush3.bf16.msra.mxu1 %v6968_v9  ;;  %v6972_v13 = vpack.c.bf16 %v230_v12, %v229_v11  ;;  %v225_v28 = vld [vmem:[%s9054_s4 + $0x28] sm:$0xff]  ;;  %v392_v40 = vld [vmem:[%s9054_s4 + $0x58] sm:$0xff]  ;;  %v393_v41 = vld [vmem:[%s9054_s4 + $0x60] sm:$0xff]  ;;  %v489_v58 = vunpack.c.l.s4 %v7425_v57  ;;  %vm620_vm9 = vcmask 1041409   ;;  %vm623_vm10 = vcmask 1042434  }
   0x9   :  { %6356 = vmatmul.mubr.msk.f32.vlgmr.msra.gmra.mrb[0].mxu0 %vm9061_vm0, %v67_v10  ;;  %9074 = vst [vmem:[#allocation5_spill] sm:$0xff] %v7524_v18  ;;  %v7527_v19 = vsub.s32 0, %v7524_v18  ;;  %vm173_vm2 = vcmp.ne.s32.totalorder %v7524_v18, 0  ;;  %v172_v31 = vadd.s32 8, %v7524_v18  ;;  %v6980_v35 = vpack.c.bf16 %v226_v29, %v225_v28  ;;  %v394_v49 = vld [vmem:[%s9054_s4 + $0x68] sm:$0xff]  ;;  %v395_v50 = vld [vmem:[%s9054_s4 + $0x70] sm:$0xff] }
   0xa   :  { %6973 = vmatprep.subr.bf16.mxu1 %v6972_v13  ;;  %v7546_v39 = vsel %vm173_vm2, 1.0, %v9065_v38  ;;  %vm179_vm6 = vcmp.ne.s32.totalorder %v7524_v18, 7  ;;  %v6984_v47 = vpack.c.bf16 %v393_v41, %v392_v40  ;;  %v6988_v53 = vpack.c.bf16 %v395_v50, %v394_v49 }
   0xb   :  { %v75_v22 = vrot.slane %v7532_v20, %v7527_v19  ;;  %9075 = vst [vmem:[#allocation6_spill] sm:$0xff] %v7546_v39  ;;  %vm186_vm5 = vcmp.ne.s32.totalorder %v172_v31, 8  ;;  %v7568_v51 = vsel %vm179_vm6, 1.0, %v9065_v38  ;;  %vm194_vm7 = vcmp.ne.s32.totalorder %v172_v31, 15 }
   0xc   :  { %6975 = vmatpush3.bf16.msra.mxu1 %v6972_v13  ;;  %v5971_v48 = vsel %vm186_vm5, 1.0, %v9065_v38  ;;  %9076 = vst [vmem:[#allocation7_spill] sm:$0xff] %v7568_v51  ;;  %v5972_v55 = vsel %vm194_vm7, 1.0, %v9065_v38  ;;  %v7576_v59 = vsub.s32 1, %v7524_v18  ;;  %v490_v60 = vunpack.c.0.s8 %v489_v58 }
   0xd   :  { %6977 = vmatprep.subr.bf16.mxu1 %v6976_v16  ;;  %vm626_vm11 = vcmask 1043459   ;;  %vm629_vm12 = vcmask 1044484   ;;  %vm632_vm13 = vcmask 1045509   ;;  %vm635_vm14 = vcmask 1046534  }
   0xe   :  { %v482_v61 = vrot.slane %v7532_v20, %v7576_v59  ;;  %v493_v62 = vsub.s32 %v490_v60, %v7524_v18  ;;  %vm9062_vm15 = vcmask 1047559   ;;  %vm7427_vm2 = vmmov 0  }
   0xf   :  { %6399 = vmatprep.mubr.msk.f32.mxu0 %vm7427_vm2, %v9065_v38 }
  0x83   :  { %v161_v21 = vpop.permute.xlu0 %160 }
  0x87   :  { %v166_v26 = vpop.permute.xlu0 %165 }
  0xdc   :  { %v6357_v23 = vpop.f32.mrb[0].mxu0 }
  0xdd   :  { %v155_v24 = vadd.f32 %v6357_v23, %v75_v22  ;;  %v149_v25 = vpop.f32.mrb[1].mxu0 }
  0xde   :  { %v150_v27 = vadd.f32 %v149_v25, %v75_v22 }
  0xdf   :  { %v169_v30 = vmul.f32 %v166_v26, %v155_v24 }
  0xe0   :  { %v168_v32 = vmul.f32 %v161_v21, %v150_v27 }
  0xe1   :  { %v202_v33 = vrot.slane %v169_v30, 7  ;;  %v215_v34 = vrot.slane %v169_v30, 1 }
  0xe2   :  { %v206_v36 = vrot.slane %v168_v32, 7  ;;  %v214_v37 = vrot.slane %v168_v32, 1  ;;  %6366 = vmatprep.mubr.msk.f32.mxu1 %vm231_vm1, %v168_v32 }
  0xe3   :  { %6367 = vmatmul.mubr.msk.f32.vlgmr.msra.gmra.mrb[0].mxu1 %vm231_vm1, %v169_v30 }
  0xe4   :  { %6979 = vmatpush3.bf16.msra.mxu1 %v6976_v16  ;;  %v210_v42 = vsel %vm205_vm3, %v202_v33, %v206_v36  ;;  %v207_v43 = vsel %vm205_vm3, %v206_v36, %v202_v33  ;;  %v216_v44 = vsel %vm213_vm4, %v214_v37, %v215_v34  ;;  %v220_v45 = vsel %vm213_vm4, %v215_v34, %v214_v37 }
  0xe5   :  { %6981 = vmatprep.subr.bf16.mxu1 %v6980_v35  ;;  %v211_v46 = vmul.f32 %v7546_v39, %v210_v42  ;;  %v212_v52 = vmul.f32 %v5971_v48, %v207_v43  ;;  %v221_v54 = vmul.f32 %v7568_v51, %v216_v44  ;;  %v222_v56 = vmul.f32 %v5972_v55, %v220_v45 }
  0xe7   :  { %6377 = vmatprep.mubr.msk.f32.mxu1 %vm231_vm1, %v211_v46 }
  0xe8   :  { %6983 = vmatpush3.bf16.msra.mxu1 %v6980_v35 }
  0xe9   :  { %6985 = vmatprep.subr.bf16.mxu1 %v6984_v47 }
  0xeb   :  { %6378 = vmatmul.mubr.msk.f32.vlgmr.msra.gmra.mrb[0].mxu1 %vm231_vm1, %v212_v52  ;;  %v586_v52 = vld [vmem:[%s9054_s4 + $0x10] sm:$0xff] }
  0xec   :  { %6987 = vmatpush3.bf16.msra.mxu1 %v6984_v47  ;;  %6388 = vmatprep.mubr.msk.f32.mxu1 %vm231_vm1, %v221_v54 }
  0xed   :  { %6989 = vmatprep.subr.bf16.mxu1 %v6988_v53 }
  0xf0   :  { %6991 = vmatpush3.bf16.msra.mxu1 %v6988_v53 }
  0xf3   :  { %6389 = vmatmul.mubr.msk.f32.vlgmr.msra.gmra.mrb[0].mxu1 %vm231_vm1, %v222_v56 }
 0x1c6   :  { %v6390_v63 = vpop.f32.mrb[0].mxu1 }
 0x1c7   :  { %v484_v0 = vadd.f32 %v6390_v63, %v482_v61  ;;  %v468_v1 = vpop.f32.mrb[1].mxu1 }
 0x1c8   :  { %v483_v2 = vadd.f32 %v482_v61, %v468_v1  ;;  %v591_v1 = vrot.slane %v586_v52, 4 }
 0x1c9   :  { %v504_v3 = vcombine.high %v484_v0, %v484_v0  ;;  %v511_v4 = vrot.slane %v484_v0, %v493_v62 }
 0x1ca   :  { %v487_v5 = vcombine.high %v483_v2, %v483_v2  ;;  %v494_v6 = vrot.slane %v483_v2, %v493_v62  ;;  %v588_v2 = vrot.slane %v586_v52, 1 }
 0x1cb   :  { %v518_v7 = vrot.slane %v504_v3, %v493_v62  ;;  %v519_v8 = vcombine.high %v511_v4, %v511_v4  ;;  %v558_v9 = vsel %vm529_vm8, %v511_v4, -inf  ;;  %v589_v3 = vrot.slane %v586_v52, 2 }
 0x1cc   :  { %v559_v10 = vrot.slane %v558_v9, 4  ;;  %v501_v11 = vrot.slane %v487_v5, %v493_v62  ;;  %v502_v12 = vcombine.high %v494_v6, %v494_v6  ;;  %v530_v13 = vsel %vm529_vm8, %v494_v6, -inf }
 0x1cd   :  { %v520_v14 = vcombine.high %v518_v7, %v518_v7  ;;  %v565_v15 = vsel %vm529_vm8, %v519_v8, -inf  ;;  %v572_v16 = vsel %vm529_vm8, %v518_v7, -inf  ;;  %v531_v21 = vrot.slane %v530_v13, 4 }
 0x1ce   :  { %v560_v22 = vmax.f32 %v558_v9, %v559_v10  ;;  %v566_v23 = vrot.slane %v565_v15, 4  ;;  %v573_v24 = vrot.slane %v572_v16, 4  ;;  %v503_v25 = vcombine.high %v501_v11, %v501_v11 }
 0x1cf   :  { %v579_v26 = vsel %vm529_vm8, %v520_v14, -inf  ;;  %v532_v27 = vmax.f32 %v530_v13, %v531_v21  ;;  %v537_v28 = vsel %vm529_vm8, %v502_v12, -inf  ;;  %v544_v29 = vsel %vm529_vm8, %v501_v11, -inf }
 0x1d0   :  { %v561_v30 = vrot.slane %v560_v22, 2  ;;  %v567_v31 = vmax.f32 %v565_v15, %v566_v23  ;;  %v574_v32 = vmax.f32 %v572_v16, %v573_v24  ;;  %v580_v33 = vrot.slane %v579_v26, 4 }
 0x1d1   :  { %v533_v34 = vrot.slane %v532_v27, 2  ;;  %v538_v35 = vrot.slane %v537_v28, 4  ;;  %v545_v36 = vrot.slane %v544_v29, 4  ;;  %v551_v37 = vsel %vm529_vm8, %v503_v25, -inf }
 0x1d2   :  { %v562_v40 = vmax.f32 %v560_v22, %v561_v30  ;;  %v568_v41 = vrot.slane %v567_v31, 2  ;;  %v575_v42 = vrot.slane %v574_v32, 2  ;;  %v581_v43 = vmax.f32 %v579_v26, %v580_v33 }
 0x1d3   :  { %v534_v44 = vmax.f32 %v532_v27, %v533_v34  ;;  %v539_v45 = vmax.f32 %v537_v28, %v538_v35  ;;  %v546_v46 = vmax.f32 %v544_v29, %v545_v36  ;;  %v552_v47 = vrot.slane %v551_v37, 4 }
 0x1d4   :  { %v569_v48 = vmax.f32 %v567_v31, %v568_v41  ;;  %v576_v49 = vmax.f32 %v574_v32, %v575_v42  ;;  %v582_v50 = vrot.slane %v581_v43, 2  ;;  %v563_v56 = vrot.slane %v562_v40, 1 }
 0x1d5   :  { %v540_v53 = vrot.slane %v539_v45, 2  ;;  %v547_v54 = vrot.slane %v546_v46, 2  ;;  %v553_v55 = vmax.f32 %v551_v37, %v552_v47  ;;  %v535_v58 = vrot.slane %v534_v44, 1 }
 0x1d6   :  { %v583_v57 = vmax.f32 %v581_v43, %v582_v50  ;;  %v570_v60 = vrot.slane %v569_v48, 1  ;;  %v577_v0 = vrot.slane %v576_v49, 1  ;;  %v564_v8 = vmax.f32 %v562_v40, %v563_v56 }
 0x1d7   :  { %v541_v61 = vmax.f32 %v539_v45, %v540_v53  ;;  %v548_v62 = vmax.f32 %v546_v46, %v547_v54  ;;  %v554_v63 = vrot.slane %v553_v55, 2  ;;  %v592_v9 = vrot.slane %v586_v52, 5 }
 0x1d8   :  { %v584_v4 = vrot.slane %v583_v57, 1  ;;  %v536_v10 = vmax.f32 %v534_v44, %v535_v58  ;;  %v590_v11 = vrot.slane %v586_v52, 3  ;;  %v571_v12 = vmax.f32 %v569_v48, %v570_v60 }
 0x1d9   :  { %v542_v5 = vrot.slane %v541_v61, 1  ;;  %v549_v6 = vrot.slane %v548_v62, 1  ;;  %v555_v7 = vmax.f32 %v553_v55, %v554_v63  ;;  %v578_v16 = vmax.f32 %v576_v49, %v577_v0 }
 0x1da   :  { %v593_v21 = vrot.slane %v586_v52, 6  ;;  %v594_v22 = vrot.slane %v586_v52, 7  ;;  %v585_v26 = vmax.f32 %v583_v57, %v584_v4  ;;  %v7596_v27 = vadd.f32 %v591_v1, %v564_v8 }
 0x1db   :  { %v543_v13 = vmax.f32 %v541_v61, %v542_v5  ;;  %v550_v14 = vmax.f32 %v548_v62, %v549_v6  ;;  %v556_v15 = vrot.slane %v555_v7, 1  ;;  %v7598_v28 = vadd.f32 %v586_v52, %v536_v10 }
 0x1dc   :  { %v7600_v29 = vadd.f32 %v592_v9, %v571_v12  ;;  %v7606_v33 = vadd.f32 %v593_v21, %v578_v16  ;;  %v7608_v34 = vadd.f32 %v594_v22, %v585_v26  ;;  %v628_v40 = vrot.slane %v7596_v27, 4 }
 0x1dd   :  { %v557_v23 = vmax.f32 %v555_v7, %v556_v15  ;;  %v7592_v24 = vadd.f32 %v588_v2, %v543_v13  ;;  %v7594_v25 = vadd.f32 %v589_v3, %v550_v14 }
 0x1de   :  { %v631_v42 = vrot.slane %v7600_v29, 3  ;;  %v634_v44 = vrot.slane %v7606_v33, 2  ;;  %v637_v46 = vrot.slane %v7608_v34, 1 }
 0x1df   :  { %v7602_v30 = vadd.f32 %v590_v11, %v557_v23  ;;  %v619_v31 = vrot.slane %v7592_v24, 7  ;;  %v622_v32 = vrot.slane %v7594_v25, 6 }
 0x1e1   :  { %v621_v35 = vsel %vm620_vm9, %v619_v31, %v7598_v28  ;;  %v625_v36 = vrot.slane %v7602_v30, 5 }
 0x1e2   :  { %v624_v37 = vsel %vm623_vm10, %v622_v32, %v621_v35 }
 0x1e3   :  { %v627_v41 = vsel %vm626_vm11, %v625_v36, %v624_v37 }
 0x1e4   :  { %v630_v43 = vsel %vm629_vm12, %v628_v40, %v627_v41 }
 0x1e5   :  { %v633_v45 = vsel %vm632_vm13, %v631_v42, %v630_v43  ;;  %v755_v42 = vld [vmem:[%s9054_s4 + $0x78] sm:$0xff]  ;;  %v756_v43 = vld [vmem:[%s9054_s4 + $0x80] sm:$0xff] }
 0x1e6   :  { %v636_v47 = vsel %vm635_vm14, %v634_v44, %v633_v45  ;;  %v757_v44 = vld [vmem:[%s9054_s4 + $0x88] sm:$0xff]  ;;  %v9063_v45 = vmov 0.0|0.0  }
 0x1e7   :  { %v639_v48 = vsel %vm9062_vm15, %v637_v46, %v636_v47  ;;  %6992 = vmatprep.subr.bf16.mxu0 %v9063_v45  ;;  %v6993_v46 = vpack.c.bf16 %v756_v43, %v755_v42  ;;  %v758_v47 = vld [vmem:[%s9054_s4 + $0x90] sm:$0xff] }
 0x1e8   :  { %v641_v49 = vsel %vm231_vm1, %v639_v48, 0.0  ;;  %v6996_v48 = vpack.c.bf16 %v758_v47, %v757_v44  ;;  %v857_v47 = vld [vmem:[%s9054_s4 + $0x98] sm:$0xff] }
 0x1e9   :  { %642 = vadd.xlane.f32.xlu1 %v641_v49  ;;  %6994 = vmatpush3.bf16.msra.mxu0 %v6993_v46 }
 0x1ea   :  { %6995 = vmatprep.subr.bf16.mxu0 %v9063_v45 }
 0x1ed   :  { %6997 = vmatpush3.bf16.msra.mxu0 %v6996_v48  ;;  %v858_v48 = vld [vmem:[%s9054_s4 + $0xa0] sm:$0xff] }
 0x1ee   :  { %6998 = vmatprep.subr.bf16.mxu0 %v9063_v45 }
 0x276   :  { %v643_v50 = vpop.xlane.xlu1 %642 }
 0x277   :  { %v645_v52 = vmul.f32 0.03125, %v643_v50 }
 0x279   :  { %v647_v53 = vrot.slane %v645_v52, 1  ;;  %v648_v54 = vrot.slane %v645_v52, 2  ;;  %v649_v55 = vrot.slane %v645_v52, 3  ;;  %v650_v56 = vrot.slane %v645_v52, 4 }
 0x27a   :  { %v651_v57 = vrot.slane %v645_v52, 5  ;;  %v652_v58 = vrot.slane %v645_v52, 6  ;;  %v653_v60 = vrot.slane %v645_v52, 7  ;;  %v662_v61 = vsub.f32 %v7598_v28, %v645_v52 }
 0x27b   :  { %v663_v62 = vsub.f32 %v7592_v24, %v647_v53  ;;  %v664_v63 = vsub.f32 %v7594_v25, %v648_v54  ;;  %v665_v0 = vsub.f32 %v7602_v30, %v649_v55  ;;  %v666_v1 = vsub.f32 %v7596_v27, %v650_v56 }
 0x27c   :  { %v667_v2 = vsub.f32 %v7600_v29, %v651_v57  ;;  %v668_v3 = vsub.f32 %v7606_v33, %v652_v58  ;;  %v669_v4 = vsub.f32 %v7608_v34, %v653_v60  ;;  %v670_v9 = vmul.f32 %v662_v61, %v662_v61 }
 0x27d   :  { %v671_v5 = vmul.f32 %v663_v62, %v663_v62  ;;  %v672_v6 = vmul.f32 %v664_v63, %v664_v63  ;;  %v673_v7 = vmul.f32 %v665_v0, %v665_v0  ;;  %v674_v8 = vmul.f32 %v666_v1, %v666_v1 }
 0x27e   :  { %v675_v10 = vmul.f32 %v667_v2, %v667_v2  ;;  %v676_v13 = vmul.f32 %v668_v3, %v668_v3  ;;  %v677_v14 = vmul.f32 %v669_v4, %v669_v4  ;;  %v7658_v53 = vsub.s32 2, %v7524_v18 }
 0x27f   :  { %v686_v11 = vrot.slane %v671_v5, 7  ;;  %v688_v12 = vrot.slane %v672_v6, 6  ;;  %v690_v16 = vrot.slane %v673_v7, 5  ;;  %v692_v22 = vrot.slane %v674_v8, 4 }
 0x280   :  { %v694_v26 = vrot.slane %v675_v10, 3  ;;  %v696_v32 = vrot.slane %v676_v13, 2  ;;  %v698_v36 = vrot.slane %v677_v14, 1  ;;  %v7661_v54 = vsub.s32 3, %v7524_v18 }
 0x281   :  { %v687_v15 = vsel %vm620_vm9, %v686_v11, %v670_v9  ;;  %v734_v56 = vrot.slane %v7532_v20, %v7658_v53 }
 0x282   :  { %v689_v21 = vsel %vm623_vm10, %v688_v12, %v687_v15  ;;  %v746_v57 = vrot.slane %v7532_v20, %v7661_v54 }
 0x283   :  { %v691_v23 = vsel %vm626_vm11, %v690_v16, %v689_v21 }
 0x284   :  { %v693_v31 = vsel %vm629_vm12, %v692_v22, %v691_v23 }
 0x285   :  { %v695_v35 = vsel %vm632_vm13, %v694_v26, %v693_v31 }
 0x286   :  { %v697_v37 = vsel %vm635_vm14, %v696_v32, %v695_v35 }
 0x287   :  { %v699_v40 = vsel %vm9062_vm15, %v698_v36, %v697_v37 }
 0x288   :  { %v701_v41 = vsel %vm231_vm1, %v699_v40, 0.0 }
 0x289   :  { %702 = vadd.xlane.f32.xlu1 %v701_v41 }
 0x316   :  { %v703_v49 = vpop.xlane.xlu1 %702 }
 0x317   :  { %v704_v50 = vmul.f32 0.03125, %v703_v49 }
 0x319   :  { %v705_v52 = vadd.f32 1e-05, %v704_v50 }
 0x31b   :  { %7296 = vrsqrt.f32 %v705_v52 }
 0x325   :  { %v7297_v55 = vpop.eup %7296 }
 0x326   :  { %v708_v58 = vrot.slane %v7297_v55, 1  ;;  %v709_v60 = vrot.slane %v7297_v55, 2  ;;  %v710_v5 = vrot.slane %v7297_v55, 3  ;;  %v711_v6 = vrot.slane %v7297_v55, 4 }
 0x327   :  { %v712_v7 = vrot.slane %v7297_v55, 5  ;;  %v713_v8 = vrot.slane %v7297_v55, 6  ;;  %v714_v9 = vrot.slane %v7297_v55, 7  ;;  %v723_v10 = vmul.f32 %v7297_v55, %v662_v61 }
 0x328   :  { %v724_v11 = vmul.f32 %v708_v58, %v663_v62  ;;  %v725_v12 = vmul.f32 %v709_v60, %v664_v63  ;;  %v726_v13 = vmul.f32 %v710_v5, %v665_v0  ;;  %v727_v14 = vmul.f32 %v711_v6, %v666_v1  ;;  %v859_v5 = vld [vmem:[%s9054_s4 + $0xa8] sm:$0xff]  ;;  %v860_v6 = vld [vmem:[%s9054_s4 + $0xb0] sm:$0xff] }
 0x329   :  { %v728_v15 = vmul.f32 %v712_v7, %v667_v2  ;;  %v729_v16 = vmul.f32 %v713_v8, %v668_v3  ;;  %v730_v21 = vmul.f32 %v714_v9, %v669_v4  ;;  %v735_v22 = vmul.f32 %v734_v56, %v723_v10  ;;  %v935_v9 = vld [vmem:[%s9054_s4 + $0xb8] sm:$0xff]  ;;  %v936_v10 = vld [vmem:[%s9054_s4 + $0xc0] sm:$0xff] }
 0x32a   :  { %v736_v23 = vmul.f32 %v734_v56, %v724_v11  ;;  %v737_v26 = vmul.f32 %v734_v56, %v725_v12  ;;  %v738_v31 = vmul.f32 %v734_v56, %v726_v13  ;;  %v739_v32 = vmul.f32 %v734_v56, %v727_v14  ;;  %v937_v12 = vld [vmem:[%s9054_s4 + $0xc8] sm:$0xff]  ;;  %v938_v13 = vld [vmem:[%s9054_s4 + $0xd0] sm:$0xff] }
 0x32b   :  { %v740_v35 = vmul.f32 %v734_v56, %v728_v15  ;;  %v741_v36 = vmul.f32 %v734_v56, %v729_v16  ;;  %v742_v37 = vmul.f32 %v734_v56, %v730_v21  ;;  %v747_v61 = vadd.f32 %v746_v57, %v735_v22 }
 0x32c   :  { %v748_v40 = vadd.f32 %v746_v57, %v736_v23  ;;  %v749_v41 = vadd.f32 %v746_v57, %v737_v26  ;;  %v750_v42 = vadd.f32 %v746_v57, %v738_v31  ;;  %v751_v43 = vadd.f32 %v746_v57, %v739_v32 }
 0x32d   :  { %v752_v62 = vadd.f32 %v746_v57, %v740_v35  ;;  %v753_v1 = vadd.f32 %v746_v57, %v741_v36  ;;  %v754_v2 = vadd.f32 %v746_v57, %v742_v37  ;;  %v6999_v58 = vpack.c.bf16 %v858_v48, %v857_v47 }
 0x32e   :  { %v771_v63 = vrot.slane %v748_v40, 7  ;;  %v773_v0 = vrot.slane %v749_v41, 6  ;;  %v775_v4 = vrot.slane %v750_v42, 5  ;;  %v777_v46 = vrot.slane %v751_v43, 4 }
 0x32f   :  { %v779_v50 = vrot.slane %v752_v62, 3  ;;  %v781_v55 = vrot.slane %v753_v1, 2  ;;  %v783_v57 = vrot.slane %v754_v2, 1  ;;  %v7002_v8 = vpack.c.bf16 %v860_v6, %v859_v5 }
 0x330   :  { %v772_v3 = vsel %vm620_vm9, %v771_v63, %v747_v61  ;;  %v7005_v11 = vpack.c.bf16 %v936_v10, %v935_v9  ;;  %v7008_v14 = vpack.c.bf16 %v938_v13, %v937_v12  ;;  %v7709_v15 = vand.u32 127, %v40_v17 }
 0x331   :  { %v774_v44 = vsel %vm623_vm10, %v773_v0, %v772_v3  ;;  %v7712_v16 = vsub.s32 4, %v7524_v18  ;;  %v7721_v32 = vsub.s32 5, %v7524_v18  ;;  %v7734_v41 = vsub.s32 6, %v7524_v18 }
 0x332   :  { %v776_v49 = vsel %vm626_vm11, %v775_v4, %v774_v44  ;;  %9077 = vst [vmem:[#allocation8_spill] sm:$0xff] %v7709_v15  ;;  %vm43_vm3 = vcmp.lt.s32.totalorder %v7709_v15, 8  ;;  %vm47_vm4 = vcmp.ge.s32.totalorder %v7709_v15, 8  ;;  %vm48_vm5 = vcmp.lt.s32.totalorder %v7709_v15, 16 }
 0x333   :  { %v778_v52 = vsel %vm629_vm12, %v777_v46, %v776_v49  ;;  %v762_v21 = vrot.slane %v7532_v20, %v7712_v16  ;;  %v7718_v23 = vsel %vm43_vm3, 1.0, %v9065_v38  ;;  %9078 = vst [vmem:[#allocation9_spill] sm:$0xff] %v7721_v32  ;;  %v864_v35 = vrot.slane %v7532_v20, %v7721_v32  ;;  %vm49_vm8 = vmand %vm47_vm4, %vm48_vm5  ;;  %v7762_v46 = vld [vmem:[%s9052_s2 + $0x8] sm:$0xff]  ;;  %v7767_v49 = vld [vmem:[%s9052_s2] sm:$0xff] }
 0x334   :  { %v780_v56 = vsel %vm632_vm13, %v779_v50, %v778_v52  ;;  %vm52_vm6 = vcmp.ge.s32.totalorder %v7709_v15, 16  ;;  %vm53_vm7 = vcmp.lt.s32.totalorder %v7709_v15, 24  ;;  %vm57_vm0 = vcmp.ge.s32.totalorder %v7709_v15, 24 }
 0x335   :  { %v782_v60 = vsel %vm635_vm14, %v781_v55, %v780_v56  ;;  %vm54_vm3 = vmand %vm52_vm6, %vm53_vm7  ;;  %v7737_v42 = vsel %vm49_vm8, 1.0, %v9065_v38  ;;  %v942_v62 = vrot.slane %v7532_v20, %v7734_v41 }
 0x336   :  { %v784_v7 = vsel %vm9062_vm15, %v783_v57, %v782_v60  ;;  %vm58_vm15 = vcmp.lt.s32.totalorder %v7709_v15, 32  ;;  %v7741_v43 = vsel %vm54_vm3, 1.0, %v9065_v38  ;;  %v7775_v60 = vld [vmem:[%s9052_s2 + $0x10] sm:$0xff] }
 0x337   :  { %6400 = vmatmul.mubr.msk.f32.vlgmr.msra.gmra.mrb[2].mxu0 %vm231_vm1, %v784_v7  ;;  %vm59_vm4 = vmand %vm57_vm0, %vm58_vm15  ;;  %vm1125_vm0 = vcmask 64512   ;;  %vm9079_vm15 = vcmask 1047559  }
 0x338   :  { %7000 = vmatpush3.bf16.msra.mxu0 %v6999_v58  ;;  %6410 = vmatprep.mubr.msk.f32.mxu0 %vm7427_vm2, %v9065_v38  ;;  %v7750_v0 = vsel %vm59_vm4, 1.0, %v9065_v38  ;;  %vm9080_vm5 = vmmov %vm9079_vm15 }
 0x339   :  { %7001 = vmatprep.subr.bf16.mxu0 %v9063_v45  ;;  %vm9081_vm6 = vmmov %vm9080_vm5 }
 0x33a   :  { %vm9084_vm7 = vmmov %vm9080_vm5 }
 0x33b   :  { %vm9085_vm8 = vmmov %vm9080_vm5 }
 0x33c   :  { %7003 = vmatpush3.bf16.msra.mxu0 %v7002_v8  ;;  %v7781_v8 = vld [vmem:[%s9052_s2 + $0x18] sm:$0xff]  ;;  %vm9086_vm3 = vmmov %vm9080_vm5 }
 0x33d   :  { %7004 = vmatprep.subr.bf16.mxu0 %v9063_v45  ;;  %vm9087_vm4 = vmmov %vm9086_vm3 }
 0x33f   :  { %6411 = vmatmul.mubr.msk.f32.vlgmr.msra.gmra.mrb[4].mxu0 %vm231_vm1, %v784_v7 }
 0x340   :  { %7006 = vmatpush3.bf16.msra.mxu0 %v7005_v11  ;;  %6421 = vmatprep.mubr.msk.f32.mxu0 %vm7427_vm2, %v9065_v38 }
 0x341   :  { %7007 = vmatprep.subr.bf16.mxu0 %v9063_v45 }
 0x344   :  { %7009 = vmatpush3.bf16.msra.mxu0 %v7008_v14 }
 0x347   :  { %6422 = vmatmul.mubr.msk.f32.vlgmr.msra.gmra.mrb[6].mxu0 %vm231_vm1, %v784_v7 }
 0x40a   :  { %v853_v22 = vpop.f32.mrb[2].mxu0 }
 0x40b   :  { %v854_v26 = vadd.f32 %v853_v22, %v762_v21  ;;  %v6401_v31 = vpop.f32.mrb[3].mxu0 }
 0x40d   :  { %v1013_v17 = vmul.f32 %v7718_v23, %v854_v26  ;;  %v1014_v61 = vmul.f32 %v7737_v42, %v854_v26  ;;  %v1015_v63 = vmul.f32 %v7741_v43, %v854_v26  ;;  %v1016_v4 = vmul.f32 %v7750_v0, %v854_v26 }
 0x40f   :  { %6426 = vmatprep.mubr.msk.f32.mxu1 %vm231_vm1, %v1013_v17 }
 0x412   :  { %v931_v36 = vpop.f32.mrb[4].mxu0 }
 0x413   :  { %v932_v37 = vadd.f32 %v931_v36, %v864_v35  ;;  %v6412_v40 = vpop.f32.mrb[5].mxu0 }
 0x415   :  { %6424 = vmatprep.subr.msk.mxu1 %vm231_vm1, %v932_v37 }
 0x416   :  { %6425 = vmatpush3.xpose.msk.msra.mxu1 %vm231_vm1, %v932_v37 }
 0x417   :  { %7010 = vmatprep.subr.bf16.mxu1 %v9063_v45 }
 0x419   :  { %6427 = vmatmul.mubr.msk.f32.vlgmr.msra.gmra.mrb[2].mxu1 %vm231_vm1, %v1014_v61 }
 0x41a   :  { %v1009_v1 = vpop.f32.mrb[6].mxu0  ;;  %6429 = vmatprep.mubr.msk.f32.mxu1 %vm231_vm1, %v1015_v63 }
 0x41b   :  { %v1010_v2 = vadd.f32 %v1009_v1, %v942_v62  ;;  %v6423_v3 = vpop.f32.mrb[7].mxu0 }
 0x41d   :  { %6430 = vmatmul.mubr.msk.f32.gmra.mrb[4].mxu1 %vm231_vm1, %v1016_v4  ;;  %6432 = vmatprep.subr.mxu0 %v1010_v2 }
 0x41e   :  { %6433 = vmatpush3.msra.mxu0 %v1010_v2  ;;  %6448 = vmatprep.mubr.msk.f32.mxu1 %vm7427_vm2, %v9065_v38 }
 0x41f   :  { %7016 = vmatprep.subr.bf16.mxu0 %v9063_v45 }
 0x4ec   :  { %v6428_v44 = vpop.f32.mrb[2].mxu1 }
 0x4ed   :  { %v1118_v47 = vmul.f32 0.35355338, %v6428_v44  ;;  %v1098_v48 = vpop.f32.mrb[3].mxu1 }
 0x4ee   :  { %v1117_v50 = vmul.f32 0.35355338, %v1098_v48 }
 0x4ef   :  { %v1122_v52 = vadd.f32 %v1118_v47, %v7762_v46 }
 0x4f0   :  { %v6431_v55 = vpop.f32.mrb[4].mxu1  ;;  %v1121_v56 = vadd.f32 %v1117_v50, %v7767_v49 }
 0x4f1   :  { %v1108_v57 = vpop.f32.mrb[5].mxu1  ;;  %v1129_v58 = vsel %vm1125_vm0, %v1122_v52, -inf  ;;  %v1120_v5 = vmul.f32 0.35355338, %v6431_v55 }
 0x4f2   :  { %v1119_v6 = vmul.f32 0.35355338, %v1108_v57  ;;  %1130 = vmax.xlane.f32.xlu1 %v1129_v58  ;;  %v1126_v7 = vsel %vm1125_vm0, %v1121_v56, -inf }
 0x4f3   :  { %1127 = vmax.xlane.f32.xlu0 %v1126_v7  ;;  %v1124_v11 = vadd.f32 %v1120_v5, %v7781_v8 }
 0x4f4   :  { %v1123_v9 = vadd.f32 %v1119_v6, %v7775_v60 }
 0x4f5   :  { %v1135_v12 = vsel %vm1125_vm0, %v1124_v11, -inf }
 0x4f6   :  { %v1132_v10 = vsel %vm1125_vm0, %v1123_v9, -inf }
 0x4f7   :  { %1133 = vmax.xlane.f32.xlu1 %v1132_v10 }
 0x4fb   :  { %1136 = vmax.xlane.f32.xlu1 %v1135_v12  ;;  %v1275_v12 = vld [vmem:[%s9054_s4 + $0xe0] sm:$0xff] }
 0x57f   :  { %v1131_v13 = vpop.xlane.xlu1 %1130 }
 0x580   :  { %v1139_v14 = vsub.f32 %v1122_v52, %v1131_v13  ;;  %v1128_v21 = vpop.xlane.xlu0 %1127 }
 0x581   :  { %v1138_v22 = vsub.f32 %v1121_v56, %v1128_v21  ;;  %v1277_v21 = vld [vmem:[%s9054_s4 + $0xf0] sm:$0xff] }
 0x582   :  { %v1144_v26 = vmul.f32 1.442695, %v1139_v14  ;;  %v1276_v14 = vld [vmem:[%s9054_s4 + $0xe8] sm:$0xff] }
 0x583   :  { %v1142_v31 = vmul.f32 1.442695, %v1138_v22  ;;  %v7014_v22 = vpack.c.bf16 %v1277_v21, %v1276_v14 }
 0x584   :  { %7298 = vpow2.f32 %v1144_v26  ;;  %v1134_v17 = vpop.xlane.xlu1 %1133 }
 0x585   :  { %v1140_v35 = vsub.f32 %v1123_v9, %v1134_v17  ;;  %7300 = vpow2.f32 %v1142_v31 }
 0x587   :  { %v1146_v36 = vmul.f32 1.442695, %v1140_v35 }
 0x588   :  { %v1137_v37 = vpop.xlane.xlu1 %1136 }
 0x589   :  { %v1141_v40 = vsub.f32 %v1124_v11, %v1137_v37  ;;  %7302 = vpow2.f32 %v1146_v36  ;;  %v1274_v11 = vld [vmem:[%s9054_s4 + $0xd8] sm:$0xff] }
 0x58a   :  { %v7011_v13 = vpack.c.bf16 %v1275_v12, %v1274_v11 }
 0x58b   :  { %v1148_v61 = vmul.f32 1.442695, %v1141_v40 }
 0x58c   :  { %7012 = vmatpush3.bf16.msra.mxu1 %v7011_v13 }
 0x58d   :  { %7304 = vpow2.f32 %v1148_v61  ;;  %7013 = vmatprep.subr.bf16.mxu1 %v9063_v45 }
 0x58e   :  { %v7299_v62 = vpop.eup %7298 }
 0x58f   :  { %v1153_v63 = vsel %vm1125_vm0, %v7299_v62, 0.0  ;;  %v7301_v1 = vpop.eup %7300 }
 0x590   :  { %1154 = vadd.xlane.f32.xlu1 %v1153_v63  ;;  %v1150_v2 = vsel %vm1125_vm0, %v7301_v1, 0.0  ;;  %7015 = vmatpush3.bf16.msra.mxu1 %v7014_v22 }
 0x591   :  { %7022 = vmatprep.subr.bf16.mxu1 %v9063_v45 }
 0x593   :  { %v7303_v3 = vpop.eup %7302 }
 0x594   :  { %1151 = vadd.xlane.f32.xlu1 %v1150_v2  ;;  %v1156_v4 = vsel %vm1125_vm0, %v7303_v3, 0.0  ;;  %v7819_v2 = vsub.s32 7, %v7524_v18 }
 0x597   :  { %v7305_v44 = vpop.eup %7304 }
 0x598   :  { %1157 = vadd.xlane.f32.xlu1 %v1156_v4  ;;  %v1159_v47 = vsel %vm1125_vm0, %v7305_v44, 0.0 }
 0x59c   :  { %1160 = vadd.xlane.f32.xlu1 %v1159_v47 }
 0x61d   :  { %v1155_v48 = vpop.xlane.xlu1 %1154 }
 0x61e   :  { %7306 = vrcp.f32 %v1155_v48 }
 0x621   :  { %v1152_v50 = vpop.xlane.xlu1 %1151 }
 0x622   :  { %7308 = vrcp.f32 %v1152_v50 }
 0x625   :  { %v1158_v52 = vpop.xlane.xlu1 %1157 }
 0x626   :  { %7310 = vrcp.f32 %v1158_v52 }
 0x628   :  { %v7307_v56 = vpop.eup %7306 }
 0x629   :  { %v1161_v55 = vpop.xlane.xlu1 %1160  ;;  %v1167_v5 = vmul.f32 %v7307_v56, %v7299_v62 }
 0x62a   :  { %7312 = vrcp.f32 %v1161_v55 }
 0x62c   :  { %v7309_v57 = vpop.eup %7308 }
 0x62d   :  { %v1166_v58 = vmul.f32 %v7309_v57, %v7301_v1 }
 0x62f   :  { %6434 = vmatprep.mubr.msk.f32.mxu0 %vm1125_vm0, %v1166_v58 }
 0x630   :  { %v7311_v6 = vpop.eup %7310  ;;  %6435 = vmatmul.mubr.msk.f32.vlgmr.msra.gmra.mrb[8].mxu0 %vm1125_vm0, %v1167_v5 }
 0x631   :  { %v1168_v7 = vmul.f32 %v7311_v6, %v7303_v3  ;;  %v1378_v3 = vrot.slane %v7532_v20, %v7819_v2 }
 0x633   :  { %6437 = vmatprep.mubr.msk.f32.mxu0 %vm1125_vm0, %v1168_v7 }
 0x634   :  { %v7313_v9 = vpop.eup %7312 }
 0x635   :  { %v1169_v10 = vmul.f32 %v7313_v9, %v7305_v44 }
 0x637   :  { %6438 = vmatmul.mubr.msk.f32.gmra.mrb[10].mxu0 %vm1125_vm0, %v1169_v10 }
 0x638   :  { %6459 = vmatprep.mubr.msk.f32.mxu0 %vm7427_vm2, %v9065_v38 }
 0x703   :  { %v6436_v26 = vpop.f32.mrb[8].mxu0 }
 0x704   :  { %v1268_v31 = vmul.f32 %v6436_v26, %v7737_v42  ;;  %v1248_v17 = vpop.f32.mrb[9].mxu0 }
 0x705   :  { %v1267_v35 = vmul.f32 %v7718_v23, %v1248_v17 }
 0x707   :  { %v1269_v36 = vadd.f32 %v1268_v31, %v1267_v35 }
 0x70a   :  { %v6439_v37 = vpop.f32.mrb[10].mxu0 }
 0x70b   :  { %v1258_v40 = vpop.f32.mrb[11].mxu0  ;;  %v1272_v62 = vmul.f32 %v6439_v37, %v7750_v0 }
 0x70c   :  { %v1270_v61 = vmul.f32 %v7741_v43, %v1258_v40 }
 0x70e   :  { %v1271_v63 = vadd.f32 %v1270_v61, %v1269_v36 }
 0x710   :  { %v1273_v1 = vadd.f32 %v1272_v62, %v1271_v63 }
 0x712   :  { %6449 = vmatmul.mubr.msk.f32.vlgmr.msra.gmra.mrb[6].mxu1 %vm231_vm1, %v1273_v1 }
 0x713   :  { %6494 = vmatprep.mubr.msk.f32.mxu1 %vm7427_vm2, %v9065_v38 }
 0x7e5   :  { %v1347_v4 = vpop.f32.mrb[6].mxu1 }
 0x7e6   :  { %v1352_v44 = vrot.slane %v1347_v4, 1  ;;  %v1353_v47 = vrot.slane %v1347_v4, 2  ;;  %v1354_v48 = vrot.slane %v1347_v4, 3  ;;  %v1355_v50 = vrot.slane %v1347_v4, 4  ;;  %v6450_v52 = vpop.f32.mrb[7].mxu1 }
 0x7e7   :  { %v1367_v55 = vadd.f32 %v1347_v4, %v7598_v28  ;;  %v1356_v56 = vrot.slane %v1347_v4, 5  ;;  %v1357_v57 = vrot.slane %v1347_v4, 6  ;;  %v1358_v58 = vrot.slane %v1347_v4, 7 }
 0x7e8   :  { %v1368_v5 = vadd.f32 %v1352_v44, %v7592_v24  ;;  %v1369_v6 = vadd.f32 %v1353_v47, %v7594_v25  ;;  %v1370_v7 = vadd.f32 %v1354_v48, %v7602_v30  ;;  %v1371_v9 = vadd.f32 %v1355_v50, %v7596_v27 }
 0x7e9   :  { %v1372_v20 = vadd.f32 %v1356_v56, %v7600_v29  ;;  %v1373_v10 = vadd.f32 %v1357_v57, %v7606_v33  ;;  %v1374_v12 = vadd.f32 %v1358_v58, %v7608_v34  ;;  %v7839_v24 = vadd.f32 %v1378_v3, %v1367_v55 }
 0x7ea   :  { %v7830_v11 = vadd.f32 %v1378_v3, %v1368_v5  ;;  %v7833_v28 = vadd.f32 %v1378_v3, %v1369_v6  ;;  %v7835_v13 = vadd.f32 %v1378_v3, %v1370_v7  ;;  %v7837_v14 = vadd.f32 %v1378_v3, %v1371_v9 }
 0x7eb   :  { %v7841_v25 = vadd.f32 %v1378_v3, %v1372_v20  ;;  %v7845_v30 = vadd.f32 %v1378_v3, %v1373_v10  ;;  %v7847_v33 = vadd.f32 %v1378_v3, %v1374_v12 }
 0x7ec   :  { %v1395_v27 = vrot.slane %v7830_v11, 7  ;;  %v1397_v29 = vrot.slane %v7833_v28, 6  ;;  %v1399_v21 = vrot.slane %v7835_v13, 5  ;;  %v1401_v26 = vrot.slane %v7837_v14, 4 }
 0x7ed   :  { %v1403_v17 = vrot.slane %v7841_v25, 3  ;;  %v1405_v36 = vrot.slane %v7845_v30, 2  ;;  %v1407_v40 = vrot.slane %v7847_v33, 1 }
 0x7ee   :  { %v1396_v34 = vsel %vm620_vm9, %v1395_v27, %v7839_v24 }
 0x7ef   :  { %v1398_v22 = vsel %vm623_vm10, %v1397_v29, %v1396_v34 }
 0x7f0   :  { %v1400_v31 = vsel %vm626_vm11, %v1399_v21, %v1398_v22 }
 0x7f1   :  { %v1402_v35 = vsel %vm629_vm12, %v1401_v26, %v1400_v31 }
 0x7f2   :  { %v1404_v37 = vsel %vm632_vm13, %v1403_v17, %v1402_v35 }
 0x7f3   :  { %v1406_v61 = vsel %vm635_vm14, %v1405_v36, %v1404_v37 }
 0x7f4   :  { %v1408_v62 = vsel %vm9079_vm15, %v1407_v40, %v1406_v61  ;;  %vm9088_vm15 = vmmov %vm9086_vm3 }
 0x7f5   :  { %v1410_v63 = vsel %vm231_vm1, %v1408_v62, 0.0 }
 0x7f6   :  { %1411 = vadd.xlane.f32.xlu1 %v1410_v63 }
 0x883   :  { %v1412_v1 = vpop.xlane.xlu1 %1411 }
 0x884   :  { %v1413_v3 = vmul.f32 0.03125, %v1412_v1 }
 0x886   :  { %v1415_v4 = vrot.slane %v1413_v3, 1  ;;  %v1416_v44 = vrot.slane %v1413_v3, 2  ;;  %v1417_v47 = vrot.slane %v1413_v3, 3  ;;  %v1418_v48 = vrot.slane %v1413_v3, 4 }
 0x887   :  { %v1419_v50 = vrot.slane %v1413_v3, 5  ;;  %v1420_v52 = vrot.slane %v1413_v3, 6  ;;  %v1421_v55 = vrot.slane %v1413_v3, 7  ;;  %v1430_v56 = vsub.f32 %v7839_v24, %v1413_v3 }
 0x888   :  { %v1431_v57 = vsub.f32 %v7830_v11, %v1415_v4  ;;  %v1432_v58 = vsub.f32 %v7833_v28, %v1416_v44  ;;  %v1433_v5 = vsub.f32 %v7835_v13, %v1417_v47  ;;  %v1434_v6 = vsub.f32 %v7837_v14, %v1418_v48 }
 0x889   :  { %v1435_v7 = vsub.f32 %v7841_v25, %v1419_v50  ;;  %v1436_v9 = vsub.f32 %v7845_v30, %v1420_v52  ;;  %v1437_v20 = vsub.f32 %v7847_v33, %v1421_v55  ;;  %v1438_v34 = vmul.f32 %v1430_v56, %v1430_v56  ;;  %v1523_v50 = vld [vmem:[%s9055_s5] sm:$0xff]  ;;  %v1524_v52 = vld [vmem:[%s9055_s5 + $0x8] sm:$0xff]  ;;  %v1525_v55 = vld [vmem:[%s9055_s5 + $0x10] sm:$0xff] }
 0x88a   :  { %v1439_v10 = vmul.f32 %v1431_v57, %v1431_v57  ;;  %v1440_v12 = vmul.f32 %v1432_v58, %v1432_v58  ;;  %v1441_v27 = vmul.f32 %v1433_v5, %v1433_v5  ;;  %v1442_v29 = vmul.f32 %v1434_v6, %v1434_v6 }
 0x88b   :  { %v1443_v21 = vmul.f32 %v1435_v7, %v1435_v7  ;;  %v1444_v31 = vmul.f32 %v1436_v9, %v1436_v9  ;;  %v1445_v17 = vmul.f32 %v1437_v20, %v1437_v20 }
 0x88c   :  { %v1454_v22 = vrot.slane %v1439_v10, 7  ;;  %v1456_v26 = vrot.slane %v1440_v12, 6  ;;  %v1458_v36 = vrot.slane %v1441_v27, 5  ;;  %v1460_v40 = vrot.slane %v1442_v29, 4  ;;  %v1526_v12 = vld [vmem:[%s9055_s5 + $0x18] sm:$0xff] }
 0x88d   :  { %v1462_v62 = vrot.slane %v1443_v21, 3  ;;  %v1464_v1 = vrot.slane %v1444_v31, 2  ;;  %v1466_v4 = vrot.slane %v1445_v17, 1  ;;  %v7017_v10 = vpack.c.bf16 %v1524_v52, %v1523_v50  ;;  %v1634_v29 = vld [vmem:[%s9054_s4 + $0xf8] sm:$0xff]  ;;  %v7903_v17 = vld [vmem:[%s9057_s7 + $0x8] sm:$0xff] }
 0x88e   :  { %v1455_v35 = vsel %vm620_vm9, %v1454_v22, %v1438_v34  ;;  %v7020_v27 = vpack.c.bf16 %v1526_v12, %v1525_v55  ;;  %v1635_v34 = vld [vmem:[%s9054_s4 + $0x100] sm:$0xff] }
 0x88f   :  { %v1457_v37 = vsel %vm623_vm10, %v1456_v26, %v1455_v35  ;;  %7018 = vmatpush3.bf16.msra.mxu0 %v7017_v10  ;;  %v7023_v21 = vpack.c.bf16 %v1635_v34, %v1634_v29 }
 0x890   :  { %v1459_v61 = vsel %vm626_vm11, %v1458_v36, %v1457_v37  ;;  %7019 = vmatprep.subr.bf16.mxu0 %v9063_v45  ;;  %v1502_v36 = vrot.slane %v7903_v17, %v7527_v19  ;;  %v1514_v37 = vrot.slane %v7903_v17, %v7576_v59 }
 0x891   :  { %v1461_v63 = vsel %vm629_vm12, %v1460_v40, %v1459_v61  ;;  %7024 = vmatpush3.bf16.msra.mxu1 %v7023_v21 }
 0x892   :  { %v1463_v3 = vsel %vm632_vm13, %v1462_v62, %v1461_v63  ;;  %7025 = vmatprep.subr.bf16.mxu1 %v9063_v45 }
 0x893   :  { %v1465_v44 = vsel %vm635_vm14, %v1464_v1, %v1463_v3  ;;  %7021 = vmatpush3.bf16.msra.mxu0 %v7020_v27 }
 0x894   :  { %v1467_v47 = vsel %vm9080_vm5, %v1466_v4, %v1465_v44  ;;  %7046 = vmatprep.subr.bf16.mxu0 %v9063_v45  ;;  %vm9089_vm5 = vmmov %vm9086_vm3 }
 0x895   :  { %v1469_v48 = vsel %vm231_vm1, %v1467_v47, 0.0 }
 0x896   :  { %1470 = vadd.xlane.f32.xlu0 %v1469_v48 }
 0x923   :  { %v1471_v22 = vpop.xlane.xlu0 %1470 }
 0x924   :  { %v1472_v26 = vmul.f32 0.03125, %v1471_v22 }
 0x926   :  { %v1473_v31 = vadd.f32 1e-05, %v1472_v26 }
 0x928   :  { %7314 = vrsqrt.f32 %v1473_v31 }
 0x932   :  { %v7315_v35 = vpop.eup %7314 }
 0x933   :  { %v1476_v40 = vrot.slane %v7315_v35, 1  ;;  %v1477_v61 = vrot.slane %v7315_v35, 2  ;;  %v1478_v62 = vrot.slane %v7315_v35, 3  ;;  %v1479_v63 = vrot.slane %v7315_v35, 4 }
 0x934   :  { %v1480_v1 = vrot.slane %v7315_v35, 5  ;;  %v1481_v3 = vrot.slane %v7315_v35, 6  ;;  %v1482_v4 = vrot.slane %v7315_v35, 7  ;;  %v1491_v44 = vmul.f32 %v7315_v35, %v1430_v56 }
 0x935   :  { %v1492_v47 = vmul.f32 %v1476_v40, %v1431_v57  ;;  %v1493_v48 = vmul.f32 %v1477_v61, %v1432_v58  ;;  %v1494_v50 = vmul.f32 %v1478_v62, %v1433_v5  ;;  %v1495_v52 = vmul.f32 %v1479_v63, %v1434_v6 }
 0x936   :  { %v1496_v55 = vmul.f32 %v1480_v1, %v1435_v7  ;;  %v1497_v10 = vmul.f32 %v1481_v3, %v1436_v9  ;;  %v1498_v12 = vmul.f32 %v1482_v4, %v1437_v20  ;;  %v1503_v27 = vmul.f32 %v1502_v36, %v1491_v44  ;;  %v1638_v44 = vld [vmem:[%s9054_s4 + $0x118] sm:$0xff] }
 0x937   :  { %v1504_v29 = vmul.f32 %v1502_v36, %v1492_v47  ;;  %v1505_v34 = vmul.f32 %v1502_v36, %v1493_v48  ;;  %v1506_v21 = vmul.f32 %v1502_v36, %v1494_v50  ;;  %v1507_v22 = vmul.f32 %v1502_v36, %v1495_v52  ;;  %v1639_v47 = vld [vmem:[%s9054_s4 + $0x120] sm:$0xff]  ;;  %v1640_v50 = vld [vmem:[%s9054_s4 + $0x128] sm:$0xff]  ;;  %v1641_v52 = vld [vmem:[%s9054_s4 + $0x130] sm:$0xff] }
 0x938   :  { %v1508_v26 = vmul.f32 %v1502_v36, %v1496_v55  ;;  %v1509_v31 = vmul.f32 %v1502_v36, %v1497_v10  ;;  %v1510_v45 = vmul.f32 %v1502_v36, %v1498_v12  ;;  %v1515_v56 = vadd.f32 %v1514_v37, %v1503_v27  ;;  %v1642_v10 = vld [vmem:[%s9054_s4 + $0x138] sm:$0xff]  ;;  %v1643_v12 = vld [vmem:[%s9054_s4 + $0x140] sm:$0xff]  ;;  %v1644_v27 = vld [vmem:[%s9054_s4 + $0x148] sm:$0xff] }
 0x939   :  { %v1516_v38 = vadd.f32 %v1514_v37, %v1504_v29  ;;  %v1517_v51 = vadd.f32 %v1514_v37, %v1505_v34  ;;  %v1518_v39 = vadd.f32 %v1514_v37, %v1506_v21  ;;  %v1519_v18 = vadd.f32 %v1514_v37, %v1507_v22  ;;  %v1645_v34 = vld [vmem:[%s9054_s4 + $0x150] sm:$0xff]  ;;  %v1646_v22 = vld [vmem:[%s9054_s4 + $0x158] sm:$0xff] }
 0x93a   :  { %v1520_v57 = vadd.f32 %v1514_v37, %v1508_v26  ;;  %v1521_v6 = vadd.f32 %v1514_v37, %v1509_v31  ;;  %v1522_v7 = vadd.f32 %v1514_v37, %v1510_v45  ;;  %v9082_v45 = vmov 0.0   ;;  %v1647_v26 = vld [vmem:[%s9054_s4 + $0x160] sm:$0xff] }
 0x93b   :  { %v1539_v58 = vrot.slane %v1516_v38, 7  ;;  %v1541_v5 = vrot.slane %v1517_v51, 6  ;;  %v1543_v20 = vrot.slane %v1518_v39, 5  ;;  %v1545_v40 = vrot.slane %v1519_v18, 4  ;;  %v1636_v18 = vld [vmem:[%s9054_s4 + $0x108] sm:$0xff]  ;;  %v1637_v39 = vld [vmem:[%s9054_s4 + $0x110] sm:$0xff] }
 0x93c   :  { %v1547_v62 = vrot.slane %v1520_v57, 3  ;;  %v1549_v63 = vrot.slane %v1521_v6, 2  ;;  %v1551_v3 = vrot.slane %v1522_v7, 1  ;;  %v7026_v37 = vpack.c.bf16 %v1637_v39, %v1636_v18  ;;  %v1649_v57 = vld [vmem:[%s9054_s4 + $0x170] sm:$0xff] }
 0x93d   :  { %v1540_v9 = vsel %vm620_vm9, %v1539_v58, %v1515_v56  ;;  %v9083_v4 = vmov 0.0|0.0   ;;  %v7029_v48 = vpack.c.bf16 %v1639_v47, %v1638_v44  ;;  %v7032_v55 = vpack.c.bf16 %v1641_v52, %v1640_v50  ;;  %v1648_v56 = vld [vmem:[%s9054_s4 + $0x168] sm:$0xff] }
 0x93e   :  { %v1542_v35 = vsel %vm623_vm10, %v1541_v5, %v1540_v9  ;;  %7027 = vmatpush3.bf16.msra.mxu1 %v7026_v37  ;;  %v7035_v29 = vpack.c.bf16 %v1643_v12, %v1642_v10  ;;  %v7038_v21 = vpack.c.bf16 %v1645_v34, %v1644_v27  ;;  %v7041_v31 = vpack.c.bf16 %v1647_v26, %v1646_v22 }
 0x93f   :  { %v1544_v61 = vsel %vm626_vm11, %v1543_v20, %v1542_v35  ;;  %7028 = vmatprep.subr.bf16.mxu1 %v9083_v4  ;;  %v7044_v58 = vpack.c.bf16 %v1649_v57, %v1648_v56  ;;  %v1530_v5 = vrot.slane %v7903_v17, %v7658_v53 }
 0x940   :  { %v1546_v36 = vsel %vm629_vm12, %v1545_v40, %v1544_v61 }
 0x941   :  { %v1548_v1 = vsel %vm632_vm13, %v1547_v62, %v1546_v36 }
 0x942   :  { %v1550_v38 = vsel %vm635_vm14, %v1549_v63, %v1548_v1  ;;  %7030 = vmatpush3.bf16.msra.mxu1 %v7029_v48 }
 0x943   :  { %v1552_v51 = vsel %vm9081_vm6, %v1551_v3, %v1550_v38  ;;  %7031 = vmatprep.subr.bf16.mxu1 %v9083_v4  ;;  %vm9091_vm6 = vmmov %vm9086_vm3 }
 0x944   :  { %6460 = vmatmul.mubr.msk.f32.vlgmr.msra.gmra.mrb[12].mxu0 %vm231_vm1, %v1552_v51  ;;  %v1747_v51 = vrot.slane %v7903_v17, %v7661_v54 }
 0x945   :  { %6505 = vmatprep.mubr.msk.f32.mxu0 %vm7427_vm2, %v9082_v45 }
 0x946   :  { %7033 = vmatpush3.bf16.msra.mxu1 %v7032_v55 }
 0x947   :  { %7034 = vmatprep.subr.bf16.mxu1 %v9083_v4 }
 0x94a   :  { %7036 = vmatpush3.bf16.msra.mxu1 %v7035_v29 }
 0x94b   :  { %7037 = vmatprep.subr.bf16.mxu1 %v9083_v4 }
 0x94e   :  { %7039 = vmatpush3.bf16.msra.mxu1 %v7038_v21 }
 0x94f   :  { %7040 = vmatprep.subr.bf16.mxu1 %v9083_v4 }
 0x952   :  { %7042 = vmatpush3.bf16.msra.mxu1 %v7041_v31 }
 0x953   :  { %7043 = vmatprep.subr.bf16.mxu1 %v9083_v4 }
 0x956   :  { %7045 = vmatpush3.bf16.msra.mxu1 %v7044_v58 }
 0xa17   :  { %v1621_v6 = vpop.f32.mrb[12].mxu0 }
 0xa18   :  { %v1622_v7 = vadd.f32 %v1621_v6, %v1530_v5  ;;  %v6461_v9 = vpop.f32.mrb[13].mxu0 }
 0xa1a   :  { %v1625_v20 = vmul.f32 %v1622_v7, %v1622_v7 }
 0xa1c   :  { %v1626_v35 = vmul.f32 %v1625_v20, %v1622_v7 }
 0xa1e   :  { %v1627_v40 = vmul.f32 0.044715, %v1626_v35 }
 0xa20   :  { %v1628_v61 = vadd.f32 %v1627_v40, %v1622_v7 }
 0xa22   :  { %v1629_v62 = vmul.f32 0.7978846, %v1628_v61 }
 0xa24   :  { %7316 = vtanh.f32 %v1629_v62 }
 0xa2e   :  { %v7317_v36 = vpop.eup %7316 }
 0xa2f   :  { %v1631_v63 = vadd.f32 1.0, %v7317_v36 }
 0xa31   :  { %v1632_v1 = vmul.f32 0.5, %v1631_v63 }
 0xa33   :  { %v1633_v3 = vmul.f32 %v1632_v1, %v1622_v7 }
 0xa35   :  { %6495 = vmatmul.mubr.f32.vlgmr.msra.gmra.mrb[8].mxu1 %v1633_v3 }
 0xb08   :  { %v1716_v38 = vpop.f32.mrb[8].mxu1 }
 0xb09   :  { %v1721_v18 = vrot.slane %v1716_v38, 1  ;;  %v1722_v39 = vrot.slane %v1716_v38, 2  ;;  %v1723_v37 = vrot.slane %v1716_v38, 3  ;;  %v1724_v44 = vrot.slane %v1716_v38, 4  ;;  %v6496_v47 = vpop.f32.mrb[9].mxu1 }
 0xb0a   :  { %v1736_v48 = vadd.f32 %v1716_v38, %v7839_v24  ;;  %v1725_v50 = vrot.slane %v1716_v38, 5  ;;  %v1726_v52 = vrot.slane %v1716_v38, 6  ;;  %v1727_v55 = vrot.slane %v1716_v38, 7 }
 0xb0b   :  { %v1737_v10 = vadd.f32 %v1721_v18, %v7830_v11  ;;  %v1738_v12 = vadd.f32 %v1722_v39, %v7833_v28  ;;  %v1739_v27 = vadd.f32 %v1723_v37, %v7835_v13  ;;  %v1740_v29 = vadd.f32 %v1724_v44, %v7837_v14 }
 0xb0c   :  { %v1741_v34 = vadd.f32 %v1725_v50, %v7841_v25  ;;  %v1742_v21 = vadd.f32 %v1726_v52, %v7845_v30  ;;  %v1743_v26 = vadd.f32 %v1727_v55, %v7847_v33  ;;  %v7987_v11 = vadd.f32 %v1747_v51, %v1736_v48 }
 0xb0d   :  { %v7978_v22 = vadd.f32 %v1747_v51, %v1737_v10  ;;  %v7981_v24 = vadd.f32 %v1747_v51, %v1738_v12  ;;  %v7983_v31 = vadd.f32 %v1747_v51, %v1739_v27  ;;  %v7985_v56 = vadd.f32 %v1747_v51, %v1740_v29 }
 0xb0e   :  { %v7989_v28 = vadd.f32 %v1747_v51, %v1741_v34  ;;  %v7993_v25 = vadd.f32 %v1747_v51, %v1742_v21  ;;  %v7995_v30 = vadd.f32 %v1747_v51, %v1743_v26 }
 0xb0f   :  { %v1764_v13 = vrot.slane %v7978_v22, 7  ;;  %v1766_v14 = vrot.slane %v7981_v24, 6  ;;  %v1768_v57 = vrot.slane %v7983_v31, 5  ;;  %v1770_v5 = vrot.slane %v7985_v56, 4 }
 0xb10   :  { %v1772_v7 = vrot.slane %v7989_v28, 3  ;;  %v1774_v20 = vrot.slane %v7993_v25, 2  ;;  %v1776_v40 = vrot.slane %v7995_v30, 1 }
 0xb11   :  { %v1765_v33 = vsel %vm620_vm9, %v1764_v13, %v7987_v11 }
 0xb12   :  { %v1767_v58 = vsel %vm623_vm10, %v1766_v14, %v1765_v33 }
 0xb13   :  { %v1769_v6 = vsel %vm626_vm11, %v1768_v57, %v1767_v58 }
 0xb14   :  { %v1771_v9 = vsel %vm629_vm12, %v1770_v5, %v1769_v6 }
 0xb15   :  { %v1773_v35 = vsel %vm632_vm13, %v1772_v7, %v1771_v9 }
 0xb16   :  { %v1775_v61 = vsel %vm635_vm14, %v1774_v20, %v1773_v35 }
 0xb17   :  { %v1777_v62 = vsel %vm9084_vm7, %v1776_v40, %v1775_v61  ;;  %vm9092_vm7 = vmmov %vm9086_vm3 }
 0xb18   :  { %v1779_v36 = vsel %vm231_vm1, %v1777_v62, 0.0 }
 0xb19   :  { %1780 = vadd.xlane.f32.xlu1 %v1779_v36 }
 0xba6   :  { %v1781_v63 = vpop.xlane.xlu1 %1780 }
 0xba7   :  { %v1782_v1 = vmul.f32 0.03125, %v1781_v63 }
 0xba9   :  { %v1784_v3 = vrot.slane %v1782_v1, 1  ;;  %v1785_v38 = vrot.slane %v1782_v1, 2  ;;  %v1786_v51 = vrot.slane %v1782_v1, 3  ;;  %v1787_v18 = vrot.slane %v1782_v1, 4 }
 0xbaa   :  { %v1788_v39 = vrot.slane %v1782_v1, 5  ;;  %v1789_v37 = vrot.slane %v1782_v1, 6  ;;  %v1790_v44 = vrot.slane %v1782_v1, 7  ;;  %v1799_v47 = vsub.f32 %v7987_v11, %v1782_v1 }
 0xbab   :  { %v1800_v48 = vsub.f32 %v7978_v22, %v1784_v3  ;;  %v1801_v50 = vsub.f32 %v7981_v24, %v1785_v38  ;;  %v1802_v52 = vsub.f32 %v7983_v31, %v1786_v51  ;;  %v1803_v55 = vsub.f32 %v7985_v56, %v1787_v18  ;;  %v1892_v51 = vld [vmem:[%s9054_s4 + $0x178] sm:$0xff]  ;;  %v1893_v18 = vld [vmem:[%s9054_s4 + $0x180] sm:$0xff] }
 0xbac   :  { %v1804_v10 = vsub.f32 %v7989_v28, %v1788_v39  ;;  %v1805_v12 = vsub.f32 %v7993_v25, %v1789_v37  ;;  %v1806_v27 = vsub.f32 %v7995_v30, %v1790_v44  ;;  %v1807_v13 = vmul.f32 %v1799_v47, %v1799_v47  ;;  %v1894_v39 = vld [vmem:[%s9054_s4 + $0x188] sm:$0xff]  ;;  %v1895_v44 = vld [vmem:[%s9054_s4 + $0x190] sm:$0xff] }
 0xbad   :  { %v1808_v29 = vmul.f32 %v1800_v48, %v1800_v48  ;;  %v1809_v34 = vmul.f32 %v1801_v50, %v1801_v50  ;;  %v1810_v21 = vmul.f32 %v1802_v52, %v1802_v52  ;;  %v1811_v26 = vmul.f32 %v1803_v55, %v1803_v55 }
 0xbae   :  { %v1812_v14 = vmul.f32 %v1804_v10, %v1804_v10  ;;  %v1813_v58 = vmul.f32 %v1805_v12, %v1805_v12  ;;  %v1814_v5 = vmul.f32 %v1806_v27, %v1806_v27  ;;  %v7047_v37 = vpack.c.bf16 %v1893_v18, %v1892_v51 }
 0xbaf   :  { %v1823_v33 = vrot.slane %v1808_v29, 7  ;;  %v1825_v57 = vrot.slane %v1809_v34, 6  ;;  %v1827_v7 = vrot.slane %v1810_v21, 5  ;;  %v1829_v20 = vrot.slane %v1811_v26, 4 }
 0xbb0   :  { %v1831_v40 = vrot.slane %v1812_v14, 3  ;;  %v1833_v62 = vrot.slane %v1813_v58, 2  ;;  %v1835_v63 = vrot.slane %v1814_v5, 1  ;;  %7048 = vmatpush3.bf16.msra.mxu0 %v7047_v37  ;;  %v7050_v29 = vpack.c.bf16 %v1895_v44, %v1894_v39 }
 0xbb1   :  { %v1824_v6 = vsel %vm620_vm9, %v1823_v33, %v1807_v13  ;;  %7049 = vmatprep.subr.bf16.mxu0 %v9083_v4  ;;  %v1871_v14 = vrot.slane %v7903_v17, %v7712_v16  ;;  %v1883_v33 = vrot.slane %v7903_v17, %v7721_v32 }
 0xbb2   :  { %v1826_v9 = vsel %vm623_vm10, %v1825_v57, %v1824_v6 }
 0xbb3   :  { %v1828_v35 = vsel %vm626_vm11, %v1827_v7, %v1826_v9 }
 0xbb4   :  { %v1830_v61 = vsel %vm629_vm12, %v1829_v20, %v1828_v35  ;;  %7051 = vmatpush3.bf16.msra.mxu0 %v7050_v29 }
 0xbb5   :  { %v1832_v36 = vsel %vm632_vm13, %v1831_v40, %v1830_v61  ;;  %7052 = vmatprep.subr.bf16.mxu0 %v9083_v4 }
 0xbb6   :  { %v1834_v1 = vsel %vm635_vm14, %v1833_v62, %v1832_v36 }
 0xbb7   :  { %v1836_v3 = vsel %vm9085_vm8, %v1835_v63, %v1834_v1 }
 0xbb8   :  { %v1838_v38 = vsel %vm231_vm1, %v1836_v3, 0.0 }
 0xbb9   :  { %1839 = vadd.xlane.f32.xlu0 %v1838_v38 }
 0xc46   :  { %v1840_v34 = vpop.xlane.xlu0 %1839 }
 0xc47   :  { %v1841_v21 = vmul.f32 0.03125, %v1840_v34 }
 0xc49   :  { %v1842_v26 = vadd.f32 1e-05, %v1841_v21 }
 0xc4b   :  { %7318 = vrsqrt.f32 %v1842_v26 }
 0xc55   :  { %v7319_v13 = vpop.eup %7318 }
 0xc56   :  { %v1845_v57 = vrot.slane %v7319_v13, 1  ;;  %v1846_v58 = vrot.slane %v7319_v13, 2  ;;  %v1847_v5 = vrot.slane %v7319_v13, 3  ;;  %v1848_v6 = vrot.slane %v7319_v13, 4 }
 0xc57   :  { %v1849_v7 = vrot.slane %v7319_v13, 5  ;;  %v1850_v9 = vrot.slane %v7319_v13, 6  ;;  %v1851_v20 = vrot.slane %v7319_v13, 7  ;;  %v1860_v35 = vmul.f32 %v7319_v13, %v1799_v47 }
 0xc58   :  { %v1861_v40 = vmul.f32 %v1845_v57, %v1800_v48  ;;  %v1862_v61 = vmul.f32 %v1846_v58, %v1801_v50  ;;  %v1863_v62 = vmul.f32 %v1847_v5, %v1802_v52  ;;  %v1864_v36 = vmul.f32 %v1848_v6, %v1803_v55  ;;  %v1995_v58 = vld [vmem:[%s9054_s4 + $0x1a0] sm:$0xff] }
 0xc59   :  { %v1865_v63 = vmul.f32 %v1849_v7, %v1804_v10  ;;  %v1866_v1 = vmul.f32 %v1850_v9, %v1805_v12  ;;  %v1867_v3 = vmul.f32 %v1851_v20, %v1806_v27  ;;  %v1872_v38 = vmul.f32 %v1871_v14, %v1860_v35  ;;  %v1996_v35 = vld [vmem:[%s9054_s4 + $0x1a8] sm:$0xff] }
 0xc5a   :  { %v1873_v51 = vmul.f32 %v1871_v14, %v1861_v40  ;;  %v1874_v18 = vmul.f32 %v1871_v14, %v1862_v61  ;;  %v1875_v39 = vmul.f32 %v1871_v14, %v1863_v62  ;;  %v1876_v37 = vmul.f32 %v1871_v14, %v1864_v36  ;;  %v1997_v40 = vld [vmem:[%s9054_s4 + $0x1b0] sm:$0xff]  ;;  %v2072_v36 = vld [vmem:[%s9054_s4 + $0x1b8] sm:$0xff] }
 0xc5b   :  { %v1877_v44 = vmul.f32 %v1871_v14, %v1865_v63  ;;  %v1878_v29 = vmul.f32 %v1871_v14, %v1866_v1  ;;  %v1879_v34 = vmul.f32 %v1871_v14, %v1867_v3  ;;  %v1884_v47 = vadd.f32 %v1883_v33, %v1872_v38  ;;  %v1994_v14 = vld [vmem:[%s9054_s4 + $0x198] sm:$0xff]  ;;  %v2073_v63 = vld [vmem:[%s9054_s4 + $0x1c0] sm:$0xff]  ;;  %v2074_v3 = vld [vmem:[%s9054_s4 + $0x1c8] sm:$0xff] }
 0xc5c   :  { %v1885_v21 = vadd.f32 %v1883_v33, %v1873_v51  ;;  %v1886_v26 = vadd.f32 %v1883_v33, %v1874_v18  ;;  %v1887_v15 = vadd.f32 %v1883_v33, %v1875_v39  ;;  %v1888_v32 = vadd.f32 %v1883_v33, %v1876_v37  ;;  %v2075_v38 = vld [vmem:[%s9054_s4 + $0x1d0] sm:$0xff] }
 0xc5d   :  { %v1889_v48 = vadd.f32 %v1883_v33, %v1877_v44  ;;  %v1890_v55 = vadd.f32 %v1883_v33, %v1878_v29  ;;  %v1891_v10 = vadd.f32 %v1883_v33, %v1879_v34  ;;  %v7053_v20 = vpack.c.bf16 %v1995_v58, %v1994_v14 }
 0xc5e   :  { %v1908_v50 = vrot.slane %v1885_v21, 7  ;;  %v1910_v52 = vrot.slane %v1886_v26, 6  ;;  %v1912_v27 = vrot.slane %v1887_v15, 5  ;;  %v1914_v57 = vrot.slane %v1888_v32, 4 }
 0xc5f   :  { %v1916_v6 = vrot.slane %v1889_v48, 3  ;;  %v1918_v33 = vrot.slane %v1890_v55, 2  ;;  %v1920_v15 = vrot.slane %v1891_v10, 1  ;;  %v7056_v62 = vpack.c.bf16 %v1997_v40, %v1996_v35  ;;  %v8095_v48 = vld [vmem:[%s9057_s7 + $0x10] sm:$0xff] }
 0xc60   :  { %v1909_v12 = vsel %vm620_vm9, %v1908_v50, %v1884_v47  ;;  %v7059_v1 = vpack.c.bf16 %v2073_v63, %v2072_v36  ;;  %v7062_v51 = vpack.c.bf16 %v2075_v38, %v2074_v3  ;;  %v1899_v18 = vrot.slane %v7903_v17, %v7734_v41 }
 0xc61   :  { %v1911_v13 = vsel %vm623_vm10, %v1910_v52, %v1909_v12  ;;  %v2001_v34 = vrot.slane %v7903_v17, %v7819_v2  ;;  %v2079_v52 = vrot.slane %v8095_v48, %v7527_v19 }
 0xc62   :  { %v1913_v5 = vsel %vm626_vm11, %v1912_v27, %v1911_v13 }
 0xc63   :  { %v1915_v7 = vsel %vm629_vm12, %v1914_v57, %v1913_v5 }
 0xc64   :  { %v1917_v9 = vsel %vm632_vm13, %v1916_v6, %v1915_v7 }
 0xc65   :  { %v1919_v32 = vsel %vm635_vm14, %v1918_v33, %v1917_v9 }
 0xc66   :  { %v1921_v61 = vsel %vm9086_vm3, %v1920_v15, %v1919_v32 }
 0xc67   :  { %6506 = vmatmul.mubr.msk.f32.vlgmr.msra.gmra.mrb[14].mxu0 %vm231_vm1, %v1921_v61 }
 0xc68   :  { %7054 = vmatpush3.bf16.msra.mxu0 %v7053_v20  ;;  %6516 = vmatprep.mubr.msk.f32.mxu0 %vm7427_vm2, %v9082_v45 }
 0xc69   :  { %7055 = vmatprep.subr.bf16.mxu0 %v9083_v4 }
 0xc6c   :  { %7057 = vmatpush3.bf16.msra.mxu0 %v7056_v62 }
 0xc6d   :  { %7058 = vmatprep.subr.bf16.mxu0 %v9083_v4 }
 0xc6f   :  { %6517 = vmatmul.mubr.msk.f32.vlgmr.msra.gmra.mrb[16].mxu0 %vm231_vm1, %v1921_v61 }
 0xc70   :  { %7060 = vmatpush3.bf16.msra.mxu0 %v7059_v1  ;;  %6527 = vmatprep.mubr.msk.f32.mxu0 %vm7427_vm2, %v9082_v45 }
 0xc71   :  { %7061 = vmatprep.subr.bf16.mxu0 %v9083_v4 }
 0xc74   :  { %7063 = vmatpush3.bf16.msra.mxu0 %v7062_v51 }
 0xc77   :  { %6528 = vmatmul.mubr.msk.f32.vlgmr.msra.gmra.mrb[18].mxu0 %vm231_vm1, %v1921_v61 }
 0xd3a   :  { %v1990_v39 = vpop.f32.mrb[14].mxu0 }
 0xd3b   :  { %v1991_v37 = vadd.f32 %v1990_v39, %v1899_v18  ;;  %v6507_v44 = vpop.f32.mrb[15].mxu0 }
 0xd3d   :  { %v2150_v29 = vmul.f32 %v7718_v23, %v1991_v37  ;;  %v2151_v50 = vmul.f32 %v7737_v42, %v1991_v37  ;;  %v2152_v17 = vmul.f32 %v7741_v43, %v1991_v37  ;;  %v2153_v27 = vmul.f32 %v7750_v0, %v1991_v37 }
 0xd3f   :  { %6532 = vmatprep.mubr.msk.f32.mxu0 %vm231_vm1, %v2150_v29 }
 0xd42   :  { %v2068_v21 = vpop.f32.mrb[16].mxu0 }
 0xd43   :  { %v2069_v26 = vadd.f32 %v2068_v21, %v2001_v34  ;;  %v6518_v47 = vpop.f32.mrb[17].mxu0 }
 0xd45   :  { %6530 = vmatprep.subr.msk.mxu0 %vm231_vm1, %v2069_v26 }
 0xd46   :  { %6531 = vmatpush3.xpose.msk.msra.mxu0 %vm231_vm1, %v2069_v26 }
 0xd47   :  { %7064 = vmatprep.subr.bf16.mxu0 %v9083_v4 }
 0xd49   :  { %6533 = vmatmul.mubr.msk.f32.vlgmr.msra.gmra.mrb[20].mxu0 %vm231_vm1, %v2151_v50 }
 0xd4a   :  { %v2146_v55 = vpop.f32.mrb[18].mxu0  ;;  %6535 = vmatprep.mubr.msk.f32.mxu0 %vm231_vm1, %v2152_v17 }
 0xd4b   :  { %v2147_v10 = vadd.f32 %v2146_v55, %v2079_v52  ;;  %v6529_v12 = vpop.f32.mrb[19].mxu0 }
 0xd4d   :  { %6536 = vmatmul.mubr.msk.f32.gmra.mrb[22].mxu0 %vm231_vm1, %v2153_v27  ;;  %6538 = vmatprep.subr.mxu1 %v2147_v10 }
 0xd4e   :  { %6539 = vmatpush3.msra.mxu1 %v2147_v10  ;;  %6554 = vmatprep.mubr.msk.f32.mxu0 %vm7427_vm2, %v9082_v45 }
 0xd4f   :  { %7070 = vmatprep.subr.bf16.mxu1 %v9083_v4 }
 0xe1c   :  { %v6534_v13 = vpop.f32.mrb[20].mxu0 }
 0xe1d   :  { %v2255_v57 = vmul.f32 0.35355338, %v6534_v13  ;;  %v2235_v14 = vpop.f32.mrb[21].mxu0 }
 0xe1e   :  { %v2254_v58 = vmul.f32 0.35355338, %v2235_v14 }
 0xe1f   :  { %v2259_v5 = vadd.f32 %v2255_v57, %v7762_v46 }
 0xe20   :  { %v6537_v6 = vpop.f32.mrb[22].mxu0  ;;  %v2258_v7 = vadd.f32 %v2254_v58, %v7767_v49 }
 0xe21   :  { %v2257_v33 = vmul.f32 0.35355338, %v6537_v6  ;;  %v2245_v9 = vpop.f32.mrb[23].mxu0  ;;  %v2265_v15 = vsel %vm1125_vm0, %v2259_v5, -inf }
 0xe22   :  { %v2256_v20 = vmul.f32 0.35355338, %v2245_v9  ;;  %2266 = vmax.xlane.f32.xlu0 %v2265_v15  ;;  %v2262_v32 = vsel %vm1125_vm0, %v2258_v7, -inf  ;;  %v2412_v15 = vld [vmem:[%s9054_s4 + $0x1e8] sm:$0xff] }
 0xe23   :  { %2263 = vmax.xlane.f32.xlu1 %v2262_v32  ;;  %v2261_v35 = vadd.f32 %v2257_v33, %v7781_v8  ;;  %v2411_v33 = vld [vmem:[%s9054_s4 + $0x1e0] sm:$0xff] }
 0xe24   :  { %v2260_v40 = vadd.f32 %v2256_v20, %v7775_v60  ;;  %v2413_v20 = vld [vmem:[%s9054_s4 + $0x1f0] sm:$0xff] }
 0xe25   :  { %v2271_v61 = vsel %vm1125_vm0, %v2261_v35, -inf  ;;  %v7068_v32 = vpack.c.bf16 %v2413_v20, %v2412_v15 }
 0xe26   :  { %2272 = vmax.xlane.f32.xlu0 %v2271_v61  ;;  %v2268_v46 = vsel %vm1125_vm0, %v2260_v40, -inf }
 0xe27   :  { %2269 = vmax.xlane.f32.xlu1 %v2268_v46 }
 0xeaf   :  { %v2267_v49 = vpop.xlane.xlu0 %2266 }
 0xeb0   :  { %v2275_v62 = vsub.f32 %v2259_v5, %v2267_v49  ;;  %v2264_v36 = vpop.xlane.xlu1 %2263 }
 0xeb1   :  { %v2274_v63 = vsub.f32 %v2258_v7, %v2264_v36  ;;  %v2410_v7 = vld [vmem:[%s9054_s4 + $0x1d8] sm:$0xff] }
 0xeb2   :  { %v2280_v1 = vmul.f32 1.442695, %v2275_v62  ;;  %v7065_v9 = vpack.c.bf16 %v2411_v33, %v2410_v7 }
 0xeb3   :  { %v2278_v3 = vmul.f32 1.442695, %v2274_v63  ;;  %v2273_v38 = vpop.xlane.xlu0 %2272 }
 0xeb4   :  { %7320 = vpow2.f32 %v2280_v1  ;;  %v2277_v51 = vsub.f32 %v2261_v35, %v2273_v38  ;;  %v2270_v18 = vpop.xlane.xlu1 %2269  ;;  %7066 = vmatpush3.bf16.msra.mxu0 %v7065_v9 }
 0xeb5   :  { %7322 = vpow2.f32 %v2278_v3  ;;  %v2276_v8 = vsub.f32 %v2260_v40, %v2270_v18  ;;  %7067 = vmatprep.subr.bf16.mxu0 %v9083_v4 }
 0xeb6   :  { %v2284_v39 = vmul.f32 1.442695, %v2277_v51  ;;  %v2514_v51 = vrot.slane %v8095_v48, %v7576_v59 }
 0xeb7   :  { %v2282_v60 = vmul.f32 1.442695, %v2276_v8 }
 0xeb8   :  { %7324 = vpow2.f32 %v2284_v39  ;;  %7069 = vmatpush3.bf16.msra.mxu0 %v7068_v32 }
 0xeb9   :  { %7326 = vpow2.f32 %v2282_v60  ;;  %7076 = vmatprep.subr.bf16.mxu0 %v9083_v4 }
 0xebe   :  { %v7321_v37 = vpop.eup %7320 }
 0xebf   :  { %v7323_v44 = vpop.eup %7322  ;;  %v2289_v29 = vsel %vm1125_vm0, %v7321_v37, 0.0 }
 0xec0   :  { %2290 = vadd.xlane.f32.xlu0 %v2289_v29  ;;  %v2286_v34 = vsel %vm1125_vm0, %v7323_v44, 0.0 }
 0xec1   :  { %2287 = vadd.xlane.f32.xlu1 %v2286_v34 }
 0xec2   :  { %v7325_v21 = vpop.eup %7324 }
 0xec3   :  { %v7327_v26 = vpop.eup %7326  ;;  %v2295_v47 = vsel %vm1125_vm0, %v7325_v21, 0.0 }
 0xec4   :  { %2296 = vadd.xlane.f32.xlu0 %v2295_v47  ;;  %v2292_v50 = vsel %vm1125_vm0, %v7327_v26, 0.0 }
 0xec5   :  { %2293 = vadd.xlane.f32.xlu1 %v2292_v50 }
 0xf4d   :  { %v2291_v52 = vpop.xlane.xlu0 %2290 }
 0xf4e   :  { %7328 = vrcp.f32 %v2291_v52  ;;  %v2288_v17 = vpop.xlane.xlu1 %2287 }
 0xf4f   :  { %7330 = vrcp.f32 %v2288_v17 }
 0xf51   :  { %v2297_v55 = vpop.xlane.xlu0 %2296 }
 0xf52   :  { %7332 = vrcp.f32 %v2297_v55  ;;  %v2294_v10 = vpop.xlane.xlu1 %2293 }
 0xf53   :  { %7334 = vrcp.f32 %v2294_v10 }
 0xf58   :  { %v7329_v12 = vpop.eup %7328 }
 0xf59   :  { %v7331_v27 = vpop.eup %7330  ;;  %v2303_v57 = vmul.f32 %v7329_v12, %v7321_v37 }
 0xf5a   :  { %v2302_v13 = vmul.f32 %v7331_v27, %v7323_v44 }
 0xf5c   :  { %v7333_v14 = vpop.eup %7332  ;;  %6540 = vmatprep.mubr.msk.f32.mxu1 %vm1125_vm0, %v2302_v13 }
 0xf5d   :  { %v7335_v58 = vpop.eup %7334  ;;  %6541 = vmatmul.mubr.msk.f32.vlgmr.msra.gmra.mrb[10].mxu1 %vm1125_vm0, %v2303_v57  ;;  %v2305_v6 = vmul.f32 %v7333_v14, %v7325_v21 }
 0xf5e   :  { %v2304_v5 = vmul.f32 %v7335_v58, %v7327_v26 }
 0xf60   :  { %6543 = vmatprep.mubr.msk.f32.mxu1 %vm1125_vm0, %v2304_v5 }
 0xf61   :  { %6544 = vmatmul.mubr.msk.f32.gmra.mrb[12].mxu1 %vm1125_vm0, %v2305_v6 }
 0xf62   :  { %6565 = vmatprep.mubr.msk.f32.mxu1 %vm7427_vm2, %v9082_v45 }
0x1030   :  { %v6542_v35 = vpop.f32.mrb[10].mxu1 }
0x1031   :  { %v2404_v40 = vmul.f32 %v6542_v35, %v7737_v42  ;;  %v2384_v61 = vpop.f32.mrb[11].mxu1 }
0x1032   :  { %v2403_v46 = vmul.f32 %v7718_v23, %v2384_v61 }
0x1034   :  { %v2405_v49 = vadd.f32 %v2404_v40, %v2403_v46  ;;  %v6545_v62 = vpop.f32.mrb[12].mxu1 }
0x1035   :  { %v2394_v36 = vpop.f32.mrb[13].mxu1  ;;  %v2408_v1 = vmul.f32 %v6545_v62, %v7750_v0 }
0x1036   :  { %v2406_v63 = vmul.f32 %v7741_v43, %v2394_v36 }
0x1038   :  { %v2407_v3 = vadd.f32 %v2406_v63, %v2405_v49 }
0x103a   :  { %v2409_v38 = vadd.f32 %v2408_v1, %v2407_v3 }
0x103c   :  { %6555 = vmatmul.mubr.msk.f32.vlgmr.msra.gmra.mrb[24].mxu0 %vm231_vm1, %v2409_v38 }
0x103d   :  { %6600 = vmatprep.mubr.msk.f32.mxu0 %vm7427_vm2, %v9082_v45 }
0x110f   :  { %v2483_v18 = vpop.f32.mrb[24].mxu0 }
0x1110   :  { %v2488_v8 = vrot.slane %v2483_v18, 1  ;;  %v2489_v39 = vrot.slane %v2483_v18, 2  ;;  %v2490_v60 = vrot.slane %v2483_v18, 3  ;;  %v2491_v37 = vrot.slane %v2483_v18, 4  ;;  %v6556_v44 = vpop.f32.mrb[25].mxu0 }
0x1111   :  { %v2503_v29 = vadd.f32 %v2483_v18, %v7987_v11  ;;  %v2492_v34 = vrot.slane %v2483_v18, 5  ;;  %v2493_v21 = vrot.slane %v2483_v18, 6  ;;  %v2494_v26 = vrot.slane %v2483_v18, 7 }
0x1112   :  { %v2504_v47 = vadd.f32 %v2488_v8, %v7978_v22  ;;  %v2505_v50 = vadd.f32 %v2489_v39, %v7981_v24  ;;  %v2506_v52 = vadd.f32 %v2490_v60, %v7983_v31  ;;  %v2507_v17 = vadd.f32 %v2491_v37, %v7985_v56 }
0x1113   :  { %v2508_v55 = vadd.f32 %v2492_v34, %v7989_v28  ;;  %v2509_v10 = vadd.f32 %v2493_v21, %v7993_v25  ;;  %v2510_v27 = vadd.f32 %v2494_v26, %v7995_v30  ;;  %v8168_v22 = vadd.f32 %v2514_v51, %v2503_v29 }
0x1114   :  { %v8159_v12 = vadd.f32 %v2514_v51, %v2504_v47  ;;  %v8162_v11 = vadd.f32 %v2514_v51, %v2505_v50  ;;  %v8164_v13 = vadd.f32 %v2514_v51, %v2506_v52  ;;  %v8166_v57 = vadd.f32 %v2514_v51, %v2507_v17 }
0x1115   :  { %v8170_v24 = vadd.f32 %v2514_v51, %v2508_v55  ;;  %v8174_v28 = vadd.f32 %v2514_v51, %v2509_v10  ;;  %v8176_v25 = vadd.f32 %v2514_v51, %v2510_v27 }
0x1116   :  { %v2531_v31 = vrot.slane %v8159_v12, 7  ;;  %v2533_v56 = vrot.slane %v8162_v11, 6  ;;  %v2535_v14 = vrot.slane %v8164_v13, 5  ;;  %v2537_v5 = vrot.slane %v8166_v57, 4 }
0x1117   :  { %v2539_v7 = vrot.slane %v8170_v24, 3  ;;  %v2541_v9 = vrot.slane %v8174_v28, 2  ;;  %v2543_v20 = vrot.slane %v8176_v25, 1 }
0x1118   :  { %v2532_v30 = vsel %vm620_vm9, %v2531_v31, %v8168_v22 }
0x1119   :  { %v2534_v58 = vsel %vm623_vm10, %v2533_v56, %v2532_v30 }
0x111a   :  { %v2536_v6 = vsel %vm626_vm11, %v2535_v14, %v2534_v58 }
0x111b   :  { %v2538_v33 = vsel %vm629_vm12, %v2537_v5, %v2536_v6 }
0x111c   :  { %v2540_v15 = vsel %vm632_vm13, %v2539_v7, %v2538_v33 }
0x111d   :  { %v2542_v32 = vsel %vm635_vm14, %v2541_v9, %v2540_v15 }
0x111e   :  { %v2544_v35 = vsel %vm9087_vm4, %v2543_v20, %v2542_v32 }
0x111f   :  { %v2546_v40 = vsel %vm231_vm1, %v2544_v35, 0.0  ;;  %v2659_v35 = vld [vmem:[%s9055_s5 + $0x20] sm:$0xff] }
0x1120   :  { %2547 = vadd.xlane.f32.xlu1 %v2546_v40  ;;  %v2660_v40 = vld [vmem:[%s9055_s5 + $0x28] sm:$0xff] }
0x11ad   :  { %v2548_v61 = vpop.xlane.xlu1 %2547 }
0x11ae   :  { %v2549_v46 = vmul.f32 0.03125, %v2548_v61  ;;  %v2661_v61 = vld [vmem:[%s9055_s5 + $0x30] sm:$0xff] }
0x11b0   :  { %v2551_v49 = vrot.slane %v2549_v46, 1  ;;  %v2552_v62 = vrot.slane %v2549_v46, 2  ;;  %v2553_v36 = vrot.slane %v2549_v46, 3  ;;  %v2554_v63 = vrot.slane %v2549_v46, 4 }
0x11b1   :  { %v2555_v1 = vrot.slane %v2549_v46, 5  ;;  %v2556_v3 = vrot.slane %v2549_v46, 6  ;;  %v2557_v38 = vrot.slane %v2549_v46, 7  ;;  %v2566_v51 = vsub.f32 %v8168_v22, %v2549_v46 }
0x11b2   :  { %v2567_v18 = vsub.f32 %v8159_v12, %v2551_v49  ;;  %v2568_v8 = vsub.f32 %v8162_v11, %v2552_v62  ;;  %v2569_v39 = vsub.f32 %v8164_v13, %v2553_v36  ;;  %v2570_v60 = vsub.f32 %v8166_v57, %v2554_v63  ;;  %v2662_v49 = vld [vmem:[%s9055_s5 + $0x38] sm:$0xff]  ;;  %v2771_v63 = vld [vmem:[%s9054_s4 + $0x200] sm:$0xff] }
0x11b3   :  { %v2571_v37 = vsub.f32 %v8170_v24, %v2555_v1  ;;  %v2572_v44 = vsub.f32 %v8174_v28, %v2556_v3  ;;  %v2573_v29 = vsub.f32 %v8176_v25, %v2557_v38  ;;  %v2574_v50 = vmul.f32 %v2566_v51, %v2566_v51  ;;  %v2770_v36 = vld [vmem:[%s9054_s4 + $0x1f8] sm:$0xff] }
0x11b4   :  { %v2575_v34 = vmul.f32 %v2567_v18, %v2567_v18  ;;  %v2576_v21 = vmul.f32 %v2568_v8, %v2568_v8  ;;  %v2577_v26 = vmul.f32 %v2569_v39, %v2569_v39  ;;  %v2578_v47 = vmul.f32 %v2570_v60, %v2570_v60 }
0x11b5   :  { %v2579_v52 = vmul.f32 %v2571_v37, %v2571_v37  ;;  %v2580_v10 = vmul.f32 %v2572_v44, %v2572_v44  ;;  %v2581_v27 = vmul.f32 %v2573_v29, %v2573_v29  ;;  %v7071_v46 = vpack.c.bf16 %v2660_v40, %v2659_v35 }
0x11b6   :  { %v2590_v17 = vrot.slane %v2575_v34, 7  ;;  %v2592_v55 = vrot.slane %v2576_v21, 6  ;;  %v2594_v56 = vrot.slane %v2577_v26, 5  ;;  %v2596_v14 = vrot.slane %v2578_v47, 4 }
0x11b7   :  { %v2598_v5 = vrot.slane %v2579_v52, 3  ;;  %v2600_v7 = vrot.slane %v2580_v10, 2  ;;  %v2602_v9 = vrot.slane %v2581_v27, 1  ;;  %7072 = vmatpush3.bf16.msra.mxu1 %v7071_v46  ;;  %v7074_v62 = vpack.c.bf16 %v2662_v49, %v2661_v61 }
0x11b8   :  { %v2591_v31 = vsel %vm620_vm9, %v2590_v17, %v2574_v50  ;;  %7073 = vmatprep.subr.bf16.mxu1 %v9083_v4  ;;  %v7077_v1 = vpack.c.bf16 %v2771_v63, %v2770_v36  ;;  %v2638_v26 = vrot.slane %v8095_v48, %v7658_v53  ;;  %v2650_v47 = vrot.slane %v8095_v48, %v7661_v54 }
0x11b9   :  { %v2593_v30 = vsel %vm623_vm10, %v2592_v55, %v2591_v31 }
0x11ba   :  { %v2595_v58 = vsel %vm626_vm11, %v2594_v56, %v2593_v30  ;;  %7078 = vmatpush3.bf16.msra.mxu0 %v7077_v1 }
0x11bb   :  { %v2597_v6 = vsel %vm629_vm12, %v2596_v14, %v2595_v58  ;;  %7075 = vmatpush3.bf16.msra.mxu1 %v7074_v62  ;;  %7079 = vmatprep.subr.bf16.mxu0 %v9083_v4 }
0x11bc   :  { %v2599_v33 = vsel %vm632_vm13, %v2598_v5, %v2597_v6  ;;  %7100 = vmatprep.subr.bf16.mxu1 %v9083_v4 }
0x11bd   :  { %v2601_v15 = vsel %vm635_vm14, %v2600_v7, %v2599_v33 }
0x11be   :  { %v2603_v20 = vsel %vm9088_vm15, %v2602_v9, %v2601_v15 }
0x11bf   :  { %v2605_v32 = vsel %vm231_vm1, %v2603_v20, 0.0 }
0x11c0   :  { %2606 = vadd.xlane.f32.xlu0 %v2605_v32 }
0x124d   :  { %v2607_v3 = vpop.xlane.xlu0 %2606 }
0x124e   :  { %v2608_v38 = vmul.f32 0.03125, %v2607_v3 }
0x1250   :  { %v2609_v34 = vadd.f32 1e-05, %v2608_v38 }
0x1252   :  { %7336 = vrsqrt.f32 %v2609_v34 }
0x125c   :  { %v7337_v21 = vpop.eup %7336 }
0x125d   :  { %v2612_v50 = vrot.slane %v7337_v21, 1  ;;  %v2613_v52 = vrot.slane %v7337_v21, 2  ;;  %v2614_v17 = vrot.slane %v7337_v21, 3  ;;  %v2615_v55 = vrot.slane %v7337_v21, 4 }
0x125e   :  { %v2616_v10 = vrot.slane %v7337_v21, 5  ;;  %v2617_v27 = vrot.slane %v7337_v21, 6  ;;  %v2618_v31 = vrot.slane %v7337_v21, 7  ;;  %v2627_v56 = vmul.f32 %v7337_v21, %v2566_v51 }
0x125f   :  { %v2628_v30 = vmul.f32 %v2612_v50, %v2567_v18  ;;  %v2629_v14 = vmul.f32 %v2613_v52, %v2568_v8  ;;  %v2630_v58 = vmul.f32 %v2614_v17, %v2569_v39  ;;  %v2631_v5 = vmul.f32 %v2615_v55, %v2570_v60 }
0x1260   :  { %v2632_v6 = vmul.f32 %v2616_v10, %v2571_v37  ;;  %v2633_v7 = vmul.f32 %v2617_v27, %v2572_v44  ;;  %v2634_v33 = vmul.f32 %v2618_v31, %v2573_v29  ;;  %v2639_v9 = vmul.f32 %v2638_v26, %v2627_v56  ;;  %v2773_v10 = vld [vmem:[%s9054_s4 + $0x210] sm:$0xff]  ;;  %v2774_v31 = vld [vmem:[%s9054_s4 + $0x218] sm:$0xff]  ;;  %v2775_v56 = vld [vmem:[%s9054_s4 + $0x220] sm:$0xff] }
0x1261   :  { %v2640_v15 = vmul.f32 %v2638_v26, %v2628_v30  ;;  %v2641_v20 = vmul.f32 %v2638_v26, %v2629_v14  ;;  %v2642_v32 = vmul.f32 %v2638_v26, %v2630_v58  ;;  %v2643_v35 = vmul.f32 %v2638_v26, %v2631_v5  ;;  %v2776_v14 = vld [vmem:[%s9054_s4 + $0x228] sm:$0xff]  ;;  %v2777_v58 = vld [vmem:[%s9054_s4 + $0x230] sm:$0xff] }
0x1262   :  { %v2644_v40 = vmul.f32 %v2638_v26, %v2632_v6  ;;  %v2645_v61 = vmul.f32 %v2638_v26, %v2633_v7  ;;  %v2646_v46 = vmul.f32 %v2638_v26, %v2634_v33  ;;  %v2651_v51 = vadd.f32 %v2650_v47, %v2639_v9  ;;  %v2778_v6 = vld [vmem:[%s9054_s4 + $0x238] sm:$0xff]  ;;  %v2779_v7 = vld [vmem:[%s9054_s4 + $0x240] sm:$0xff]  ;;  %v2780_v33 = vld [vmem:[%s9054_s4 + $0x248] sm:$0xff] }
0x1263   :  { %v2652_v49 = vadd.f32 %v2650_v47, %v2640_v15  ;;  %v2653_v62 = vadd.f32 %v2650_v47, %v2641_v20  ;;  %v2654_v36 = vadd.f32 %v2650_v47, %v2642_v32  ;;  %v2655_v63 = vadd.f32 %v2650_v47, %v2643_v35  ;;  %v2781_v15 = vld [vmem:[%s9054_s4 + $0x250] sm:$0xff]  ;;  %v2782_v32 = vld [vmem:[%s9054_s4 + $0x258] sm:$0xff]  ;;  %v2783_v35 = vld [vmem:[%s9054_s4 + $0x260] sm:$0xff] }
0x1264   :  { %v2656_v18 = vadd.f32 %v2650_v47, %v2644_v40  ;;  %v2657_v60 = vadd.f32 %v2650_v47, %v2645_v61  ;;  %v2658_v37 = vadd.f32 %v2650_v47, %v2646_v46  ;;  %v2772_v47 = vld [vmem:[%s9054_s4 + $0x208] sm:$0xff]  ;;  %v7083_v30 = vpack.c.bf16 %v2775_v56, %v2774_v31  ;;  %v2785_v46 = vld [vmem:[%s9054_s4 + $0x270] sm:$0xff] }
0x1265   :  { %v2675_v8 = vrot.slane %v2652_v49, 7  ;;  %v2677_v39 = vrot.slane %v2653_v62, 6  ;;  %v2679_v29 = vrot.slane %v2654_v36, 5  ;;  %v2681_v3 = vrot.slane %v2655_v63, 4  ;;  %v2784_v61 = vld [vmem:[%s9054_s4 + $0x268] sm:$0xff] }
0x1266   :  { %v2683_v34 = vrot.slane %v2656_v18, 3  ;;  %v2685_v26 = vrot.slane %v2657_v60, 2  ;;  %v2687_v52 = vrot.slane %v2658_v37, 1  ;;  %v7080_v27 = vpack.c.bf16 %v2773_v10, %v2772_v47 }
0x1267   :  { %v2676_v44 = vsel %vm620_vm9, %v2675_v8, %v2651_v51  ;;  %v7086_v5 = vpack.c.bf16 %v2777_v58, %v2776_v14  ;;  %v7089_v9 = vpack.c.bf16 %v2779_v7, %v2778_v6  ;;  %v7092_v20 = vpack.c.bf16 %v2781_v15, %v2780_v33 }
0x1268   :  { %v2678_v1 = vsel %vm623_vm10, %v2677_v39, %v2676_v44  ;;  %7081 = vmatpush3.bf16.msra.mxu0 %v7080_v27  ;;  %v7095_v40 = vpack.c.bf16 %v2783_v35, %v2782_v32  ;;  %v7098_v49 = vpack.c.bf16 %v2785_v46, %v2784_v61  ;;  %v2666_v62 = vrot.slane %v8095_v48, %v7712_v16 }
0x1269   :  { %v2680_v38 = vsel %vm626_vm11, %v2679_v29, %v2678_v1  ;;  %7082 = vmatprep.subr.bf16.mxu0 %v9083_v4 }
0x126a   :  { %v2682_v21 = vsel %vm629_vm12, %v2681_v3, %v2680_v38 }
0x126b   :  { %v2684_v50 = vsel %vm632_vm13, %v2683_v34, %v2682_v21  ;;  %v9090_v34 = vld [vmem:[#allocation9_spill] sm:$0xff] }
0x126c   :  { %v2686_v17 = vsel %vm635_vm14, %v2685_v26, %v2684_v50  ;;  %7084 = vmatpush3.bf16.msra.mxu0 %v7083_v30  ;;  %v2883_v21 = vrot.slane %v8095_v48, %v9090_v34 }
0x126d   :  { %v2688_v55 = vsel %vm9089_vm5, %v2687_v52, %v2686_v17  ;;  %7085 = vmatprep.subr.bf16.mxu0 %v9083_v4  ;;  %vm3402_vm5 = vcmask 0  }
0x126e   :  { %6566 = vmatmul.mubr.msk.f32.vlgmr.msra.gmra.mrb[14].mxu1 %vm231_vm1, %v2688_v55 }
0x126f   :  { %6611 = vmatprep.mubr.msk.f32.mxu1 %vm7427_vm2, %v9082_v45 }
0x1270   :  { %7087 = vmatpush3.bf16.msra.mxu0 %v7086_v5 }
0x1271   :  { %7088 = vmatprep.subr.bf16.mxu0 %v9083_v4 }
0x1274   :  { %7090 = vmatpush3.bf16.msra.mxu0 %v7089_v9 }
0x1275   :  { %7091 = vmatprep.subr.bf16.mxu0 %v9083_v4 }
0x1278   :  { %7093 = vmatpush3.bf16.msra.mxu0 %v7092_v20 }
0x1279   :  { %7094 = vmatprep.subr.bf16.mxu0 %v9083_v4 }
0x127c   :  { %7096 = vmatpush3.bf16.msra.mxu0 %v7095_v40 }
0x127d   :  { %7097 = vmatprep.subr.bf16.mxu0 %v9083_v4 }
0x1280   :  { %7099 = vmatpush3.bf16.msra.mxu0 %v7098_v49 }
0x1281   :  { %7115 = vmatprep.subr.bf16.mxu0 %v9083_v4 }
0x1341   :  { %v2757_v36 = vpop.f32.mrb[14].mxu1 }
0x1342   :  { %v2758_v63 = vadd.f32 %v2757_v36, %v2666_v62  ;;  %v6567_v51 = vpop.f32.mrb[15].mxu1 }
0x1344   :  { %v2761_v18 = vmul.f32 %v2758_v63, %v2758_v63 }
0x1346   :  { %v2762_v8 = vmul.f32 %v2761_v18, %v2758_v63 }
0x1348   :  { %v2763_v39 = vmul.f32 0.044715, %v2762_v8 }
0x134a   :  { %v2764_v60 = vadd.f32 %v2763_v39, %v2758_v63 }
0x134c   :  { %v2765_v37 = vmul.f32 0.7978846, %v2764_v60 }
0x134e   :  { %7338 = vtanh.f32 %v2765_v37 }
0x1358   :  { %v7339_v44 = vpop.eup %7338 }
0x1359   :  { %v2767_v29 = vadd.f32 1.0, %v7339_v44 }
0x135b   :  { %v2768_v1 = vmul.f32 0.5, %v2767_v29 }
0x135d   :  { %v2769_v3 = vmul.f32 %v2768_v1, %v2758_v63 }
0x135f   :  { %6601 = vmatmul.mubr.f32.vlgmr.msra.gmra.mrb[26].mxu0 %v2769_v3 }
0x1360   :  { %6650 = vmatprep.mubr.msk.f32.mxu0 %vm7427_vm2, %v9082_v45 }
0x1432   :  { %v2852_v38 = vpop.f32.mrb[26].mxu0 }
0x1433   :  { %v2857_v26 = vrot.slane %v2852_v38, 1  ;;  %v2858_v50 = vrot.slane %v2852_v38, 2  ;;  %v2859_v52 = vrot.slane %v2852_v38, 3  ;;  %v6602_v17 = vpop.f32.mrb[27].mxu0  ;;  %v2860_v55 = vrot.slane %v2852_v38, 4 }
0x1434   :  { %v2861_v47 = vrot.slane %v2852_v38, 5  ;;  %v2862_v10 = vrot.slane %v2852_v38, 6  ;;  %v2863_v27 = vrot.slane %v2852_v38, 7  ;;  %v2872_v31 = vadd.f32 %v2852_v38, %v8168_v22 }
0x1435   :  { %v2873_v56 = vadd.f32 %v2857_v26, %v8159_v12  ;;  %v2874_v30 = vadd.f32 %v2858_v50, %v8162_v11  ;;  %v2875_v14 = vadd.f32 %v2859_v52, %v8164_v13  ;;  %v2876_v58 = vadd.f32 %v2860_v55, %v8166_v57 }
0x1436   :  { %v2877_v48 = vadd.f32 %v2861_v47, %v8170_v24  ;;  %v2878_v5 = vadd.f32 %v2862_v10, %v8174_v28  ;;  %v2879_v6 = vadd.f32 %v2863_v27, %v8176_v25  ;;  %v2884_v20 = vadd.f32 %v2883_v21, %v2872_v31 }
0x1437   :  { %v2885_v7 = vadd.f32 %v2883_v21, %v2873_v56  ;;  %v2886_v33 = vadd.f32 %v2883_v21, %v2874_v30  ;;  %v2887_v9 = vadd.f32 %v2883_v21, %v2875_v14  ;;  %v2888_v15 = vadd.f32 %v2883_v21, %v2876_v58 }
0x1438   :  { %v2889_v22 = vadd.f32 %v2883_v21, %v2877_v48  ;;  %v2890_v35 = vadd.f32 %v2883_v21, %v2878_v5  ;;  %v2891_v11 = vadd.f32 %v2883_v21, %v2879_v6 }
0x1439   :  { %v2900_v32 = vrot.slane %v2885_v7, 7  ;;  %v2902_v12 = vrot.slane %v2886_v33, 6  ;;  %v2904_v40 = vrot.slane %v2887_v9, 5  ;;  %v2906_v24 = vrot.slane %v2888_v15, 4 }
0x143a   :  { %v2908_v61 = vrot.slane %v2889_v22, 3  ;;  %v2910_v46 = vrot.slane %v2890_v35, 2  ;;  %v2912_v62 = vrot.slane %v2891_v11, 1 }
0x143b   :  { %v2901_v13 = vsel %vm620_vm9, %v2900_v32, %v2884_v20 }
0x143c   :  { %v2903_v57 = vsel %vm623_vm10, %v2902_v12, %v2901_v13 }
0x143d   :  { %v2905_v28 = vsel %vm626_vm11, %v2904_v40, %v2903_v57 }
0x143e   :  { %v2907_v25 = vsel %vm629_vm12, %v2906_v24, %v2905_v28  ;;  %v3028_v24 = vld [vmem:[%s9054_s4 + $0x478] sm:$0xff]  ;;  %v3029_v28 = vld [vmem:[%s9054_s4 + $0x480] sm:$0xff] }
0x143f   :  { %v2909_v49 = vsel %vm632_vm13, %v2908_v61, %v2907_v25  ;;  %v3030_v61 = vld [vmem:[%s9054_s4 + $0x488] sm:$0xff]  ;;  %v7101_v25 = vpack.c.bf16 %v3029_v28, %v3028_v24  ;;  %v3126_v24 = vld [vmem:[%s9056_s6] sm:$0xff] }
0x1440   :  { %v2911_v36 = vsel %vm635_vm14, %v2910_v46, %v2909_v49  ;;  %v3031_v46 = vld [vmem:[%s9054_s4 + $0x490] sm:$0xff]  ;;  %v3127_v28 = vld [vmem:[%s9056_s6 + $0x8] sm:$0xff] }
0x1441   :  { %v2913_v63 = vsel %vm9091_vm6, %v2912_v62, %v2911_v36  ;;  %7102 = vmatpush3.bf16.msra.mxu1 %v7101_v25  ;;  %v7104_v49 = vpack.c.bf16 %v3031_v46, %v3030_v61 }
0x1442   :  { %v2915_v51 = vsel %vm231_vm1, %v2913_v63, 0.0  ;;  %7103 = vmatprep.subr.bf16.mxu1 %v9083_v4 }
0x1443   :  { %2916 = vadd.xlane.f32.xlu1 %v2915_v51  ;;  %v8339_v51 = vld [vmem:[%s9057_s7 + $0x28] sm:$0xff] }
0x1445   :  { %7105 = vmatpush3.bf16.msra.mxu1 %v7104_v49 }
0x1446   :  { %7106 = vmatprep.subr.bf16.mxu1 %v9083_v4 }
0x14d0   :  { %v2917_v18 = vpop.xlane.xlu1 %2916 }
0x14d1   :  { %v2918_v8 = vmul.f32 0.03125, %v2917_v18 }
0x14d3   :  { %v2920_v39 = vrot.slane %v2918_v8, 1  ;;  %v2921_v60 = vrot.slane %v2918_v8, 2  ;;  %v2922_v37 = vrot.slane %v2918_v8, 3  ;;  %v2923_v44 = vrot.slane %v2918_v8, 4 }
0x14d4   :  { %v2924_v29 = vrot.slane %v2918_v8, 5  ;;  %v2925_v1 = vrot.slane %v2918_v8, 6  ;;  %v2926_v3 = vrot.slane %v2918_v8, 7  ;;  %v2935_v38 = vsub.f32 %v2884_v20, %v2918_v8 }
0x14d5   :  { %v2936_v21 = vsub.f32 %v2885_v7, %v2920_v39  ;;  %v2937_v26 = vsub.f32 %v2886_v33, %v2921_v60  ;;  %v2938_v50 = vsub.f32 %v2887_v9, %v2922_v37  ;;  %v2939_v52 = vsub.f32 %v2888_v15, %v2923_v44 }
0x14d6   :  { %v2940_v17 = vsub.f32 %v2889_v22, %v2924_v29  ;;  %v2941_v55 = vsub.f32 %v2890_v35, %v2925_v1  ;;  %v2942_v47 = vsub.f32 %v2891_v11, %v2926_v3  ;;  %v2943_v30 = vmul.f32 %v2935_v38, %v2935_v38 }
0x14d7   :  { %v2944_v10 = vmul.f32 %v2936_v21, %v2936_v21  ;;  %v2945_v27 = vmul.f32 %v2937_v26, %v2937_v26  ;;  %v2946_v31 = vmul.f32 %v2938_v50, %v2938_v50  ;;  %v2947_v56 = vmul.f32 %v2939_v52, %v2939_v52 }
0x14d8   :  { %v2948_v14 = vmul.f32 %v2940_v17, %v2940_v17  ;;  %v2949_v5 = vmul.f32 %v2941_v55, %v2941_v55  ;;  %v2950_v6 = vmul.f32 %v2942_v47, %v2942_v47  ;;  %v3007_v8 = vrot.slane %v8339_v51, %v7658_v53 }
0x14d9   :  { %v2959_v58 = vrot.slane %v2944_v10, 7  ;;  %v2961_v48 = vrot.slane %v2945_v27, 6  ;;  %v2963_v20 = vrot.slane %v2946_v31, 5  ;;  %v2965_v33 = vrot.slane %v2947_v56, 4 }
0x14da   :  { %v2967_v15 = vrot.slane %v2948_v14, 3  ;;  %v2969_v12 = vrot.slane %v2949_v5, 2  ;;  %v2971_v11 = vrot.slane %v2950_v6, 1  ;;  %v3019_v39 = vrot.slane %v8339_v51, %v7661_v54 }
0x14db   :  { %v2960_v32 = vsel %vm620_vm9, %v2959_v58, %v2943_v30 }
0x14dc   :  { %v2962_v7 = vsel %vm623_vm10, %v2961_v48, %v2960_v32 }
0x14dd   :  { %v2964_v9 = vsel %vm626_vm11, %v2963_v20, %v2962_v7 }
0x14de   :  { %v2966_v22 = vsel %vm629_vm12, %v2965_v33, %v2964_v9 }
0x14df   :  { %v2968_v35 = vsel %vm632_vm13, %v2967_v15, %v2966_v22 }
0x14e0   :  { %v2970_v13 = vsel %vm635_vm14, %v2969_v12, %v2968_v35 }
0x14e1   :  { %v2972_v40 = vsel %vm9092_vm7, %v2971_v11, %v2970_v13 }
0x14e2   :  { %v2974_v57 = vsel %vm231_vm1, %v2972_v40, 0.0 }
0x14e3   :  { %2975 = vadd.xlane.f32.xlu0 %v2974_v57 }
0x1570   :  { %v2976_v62 = vpop.xlane.xlu0 %2975 }
0x1571   :  { %v2977_v36 = vmul.f32 0.03125, %v2976_v62 }
0x1573   :  { %v2978_v63 = vadd.f32 1e-05, %v2977_v36 }
0x1575   :  { %7340 = vrsqrt.f32 %v2978_v63  ;;  %v7107_v63 = vpack.c.bf16 %v3127_v28, %v3126_v24 }
0x157f   :  { %v7341_v18 = vpop.eup %7340 }
0x1580   :  { %v2981_v60 = vrot.slane %v7341_v18, 1  ;;  %v2982_v37 = vrot.slane %v7341_v18, 2  ;;  %v2983_v44 = vrot.slane %v7341_v18, 3  ;;  %v2984_v29 = vrot.slane %v7341_v18, 4 }
0x1581   :  { %v2985_v1 = vrot.slane %v7341_v18, 5  ;;  %v2986_v3 = vrot.slane %v7341_v18, 6  ;;  %v2987_v10 = vrot.slane %v7341_v18, 7  ;;  %v2996_v27 = vmul.f32 %v7341_v18, %v2935_v38 }
0x1582   :  { %v2997_v31 = vmul.f32 %v2981_v60, %v2936_v21  ;;  %v2998_v56 = vmul.f32 %v2982_v37, %v2937_v26  ;;  %v2999_v30 = vmul.f32 %v2983_v44, %v2938_v50  ;;  %v3000_v14 = vmul.f32 %v2984_v29, %v2939_v52 }
0x1583   :  { %v3001_v58 = vmul.f32 %v2985_v1, %v2940_v17  ;;  %v3002_v48 = vmul.f32 %v2986_v3, %v2941_v55  ;;  %v3003_v5 = vmul.f32 %v2987_v10, %v2942_v47  ;;  %v3008_v6 = vmul.f32 %v3007_v8, %v2996_v27  ;;  %v3207_v1 = vld [vmem:[%s9056_s6 + $0x40] sm:$0xff] }
0x1584   :  { %v3009_v32 = vmul.f32 %v3007_v8, %v2997_v31  ;;  %v3010_v20 = vmul.f32 %v3007_v8, %v2998_v56  ;;  %v3011_v7 = vmul.f32 %v3007_v8, %v2999_v30  ;;  %v3012_v33 = vmul.f32 %v3007_v8, %v3000_v14  ;;  %v3374_v14 = vld [vmem:[%s9053_s3] sm:$0xff] }
0x1585   :  { %v3013_v9 = vmul.f32 %v3007_v8, %v3001_v58  ;;  %v3014_v15 = vmul.f32 %v3007_v8, %v3002_v48  ;;  %v3015_v22 = vmul.f32 %v3007_v8, %v3003_v5  ;;  %v3020_v38 = vadd.f32 %v3019_v39, %v3008_v6  ;;  %v3128_v8 = vld [vmem:[%s9056_s6 + $0x10] sm:$0xff] }
0x1586   :  { %v3021_v12 = vadd.f32 %v3019_v39, %v3009_v32  ;;  %v3022_v35 = vadd.f32 %v3019_v39, %v3010_v20  ;;  %v3023_v11 = vadd.f32 %v3019_v39, %v3011_v7  ;;  %v3024_v13 = vadd.f32 %v3019_v39, %v3012_v33 }
0x1587   :  { %v3025_v21 = vadd.f32 %v3019_v39, %v3013_v9  ;;  %v3026_v52 = vadd.f32 %v3019_v39, %v3014_v15  ;;  %v3027_v17 = vadd.f32 %v3019_v39, %v3015_v22  ;;  %v3129_v39 = vld [vmem:[%s9056_s6 + $0x18] sm:$0xff]  ;;  %v3133_v3 = vrot.slane %v8339_v51, %v7712_v16 }
0x1588   :  { %v3040_v26 = vrot.slane %v3021_v12, 7  ;;  %v3042_v50 = vrot.slane %v3022_v35, 6  ;;  %v3044_v47 = vrot.slane %v3023_v11, 5  ;;  %v3046_v57 = vrot.slane %v3024_v13, 4  ;;  %v9097_v15 = vld [vmem:[#allocation8_spill] sm:$0xff] }
0x1589   :  { %v3048_v25 = vrot.slane %v3025_v21, 3  ;;  %v3050_v49 = vrot.slane %v3026_v52, 2  ;;  %v3052_v36 = vrot.slane %v3027_v17, 1  ;;  %v7110_v37 = vpack.c.bf16 %v3129_v39, %v3128_v8  ;;  %v3413_v35 = vld [vmem:[%s9054_s4 + $0x498] sm:$0xff]  ;;  %v3414_v11 = vld [vmem:[%s9054_s4 + $0x4a0] sm:$0xff]  ;;  %v3519_v39 = vld [vmem:[%s9054_s4 + $0x288] sm:$0xff] }
0x158a   :  { %v3041_v55 = vsel %vm620_vm9, %v3040_v26, %v3020_v38  ;;  %vm9093_vm9 = vmmov %vm9086_vm3  ;;  %v3291_v58 = vrot.slane %v8339_v51, %v9090_v34  ;;  %v7113_v13 = vpack.c.bf16 %v3414_v11, %v3413_v35  ;;  %v3418_v52 = vrot.slane %v8339_v51, %v7734_v41 }
0x158b   :  { %v3043_v40 = vsel %vm623_vm10, %v3042_v50, %v3041_v55  ;;  %vm9094_vm10 = vcmask 130048   ;;  %v3492_v55 = vld [vmem:[%s9054_s4 + $0x10] sm:$0xff] }
0x158c   :  { %v3045_v61 = vsel %vm626_vm11, %v3044_v47, %v3043_v40  ;;  %vm9095_vm11 = vmmov %vm9094_vm10 }
0x158d   :  { %v3047_v46 = vsel %vm629_vm12, %v3046_v57, %v3045_v61  ;;  %vm9096_vm12 = vmmov %vm9094_vm10 }
0x158e   :  { %v3049_v62 = vsel %vm632_vm13, %v3048_v25, %v3047_v46  ;;  %vm3404_vm13 = vcmp.gt.f32.partialorder %v3374_v14, 0.5  ;;  %vm9098_vm3 = vmmov %vm9094_vm10 }
0x158f   :  { %v3051_v18 = vsel %vm635_vm14, %v3050_v49, %v3049_v62  ;;  %vm3384_vm14 = vcmask 7168   ;;  %v3517_v49 = vld [vmem:[%s9054_s4 + $0x278] sm:$0xff]  ;;  %v3518_v62 = vld [vmem:[%s9054_s4 + $0x280] sm:$0xff]  ;;  %vm9102_vm15 = vmmov %vm9098_vm3 }
0x1590   :  { %v3053_v60 = vsel %vm9093_vm9, %v3052_v36, %v3051_v18  ;;  %v7116_v36 = vpack.c.bf16 %v3518_v62, %v3517_v49  ;;  %v3599_v18 = vld [vmem:[%s9054_s4 + $0x2a0] sm:$0xff] }
0x1591   :  { %6612 = vmatmul.mubr.msk.f32.vlgmr.msra.gmra.mrb[16].mxu1 %vm231_vm1, %v3053_v60  ;;  %v3520_v60 = vld [vmem:[%s9054_s4 + $0x290] sm:$0xff] }
0x1592   :  { %7108 = vmatpush3.bf16.msra.mxu1 %v7107_v63  ;;  %6622 = vmatprep.mubr.msk.f32.mxu1 %vm7427_vm2, %v9082_v45  ;;  %v3598_v63 = vld [vmem:[%s9054_s4 + $0x298] sm:$0xff] }
0x1593   :  { %7109 = vmatprep.subr.bf16.mxu1 %v9083_v4  ;;  %v7122_v8 = vpack.c.bf16 %v3599_v18, %v3598_v63  ;;  %7117 = vmatpush3.bf16.msra.mxu0 %v7116_v36  ;;  %v8506_v63 = vld [vmem:[%s9052_s2] sm:$0xff] }
0x1594   :  { %7118 = vmatprep.subr.bf16.mxu0 %v9083_v4 }
0x1596   :  { %7111 = vmatpush3.bf16.msra.mxu1 %v7110_v37  ;;  %v3600_v37 = vld [vmem:[%s9054_s4 + $0x2a8] sm:$0xff] }
0x1597   :  { %6625 = vmatprep.subr.mxu1 %v9082_v45 }
0x1664   :  { %v3122_v44 = vpop.f32.mrb[16].mxu1 }
0x1665   :  { %v6613_v29 = vpop.f32.mrb[17].mxu1  ;;  %6623 = vmatmul.mubr.msk.f32.vlgmr.msra.gmra.mrb[18].mxu1 %vm231_vm1, %v3122_v44  ;;  %v7119_v44 = vpack.c.bf16 %v3520_v60, %v3519_v39 }
0x1666   :  { %6627 = vmatprep.mubr.msk.f32.mxu1 %vm7427_vm2, %v9082_v45  ;;  %6626 = vmatpush3.xpose.msk.msra.mxu1 %vm9094_vm10, %v3207_v1  ;;  %v3601_v29 = vld [vmem:[%s9054_s4 + $0x2b0] sm:$0xff] }
0x1667   :  { %6630 = vmatprep.subr.mxu1 %v9082_v45  ;;  %7120 = vmatpush3.bf16.msra.mxu0 %v7119_v44  ;;  %v8513_v44 = vld [vmem:[%s9052_s2 + $0x8] sm:$0xff] }
0x1668   :  { %7127 = vmatprep.subr.bf16.mxu0 %v9083_v4 }
0x1738   :  { %v3203_v10 = vpop.f32.mrb[18].mxu1 }
0x1739   :  { %v8379_v27 = vadd.f32 %v3203_v10, %v3133_v3  ;;  %v6624_v31 = vpop.f32.mrb[19].mxu1 }
0x173b   :  { %6628 = vmatmul.mubr.msk.f32.vlgmr.msra.gmra.mrb[20].mxu1 %vm9095_vm11, %v8379_v27  ;;  %v3284_v56 = vmul.f32 %v8379_v27, %v8379_v27 }
0x173c   :  { %6631 = vmatpush3.msra.mxu1 %v3207_v1  ;;  %6632 = vmatprep.mubr.msk.f32.mxu1 %vm7427_vm2, %v9082_v45  ;;  %v7125_v1 = vpack.c.bf16 %v3601_v29, %v3600_v37 }
0x173d   :  { %v3285_v30 = vsel %vm9096_vm12, %v3284_v56, 0.0  ;;  %7112 = vmatprep.subr.bf16.mxu1 %v9083_v4  ;;  %v7392_v56 = vld [vmem:[%s9057_s7 + $0x10] sm:$0xff] }
0x173e   :  { %3286 = vadd.xlane.f32.xlu1 %v3285_v30  ;;  %v3510_v30 = vrot.slane %v7392_v56, %v7734_v41 }
0x174f   :  { %3409 = vperm.xlu1 %7295, %v3374_v14  }
0x17cb   :  { %v3287_v48 = vpop.xlane.xlu1 %3286 }
0x17cc   :  { %v3292_v6 = vadd.f32 %v3291_v58, %v3287_v48  ;;  %v3515_v48 = vrot.slane %v7392_v56, %v7819_v2  ;;  %v8527_v56 = vld [vmem:[%s9052_s2 + $0x18] sm:$0xff] }
0x17cf   :  { %v3410_v38 = vpop.permute.xlu1 %3409 }
0x180e   :  { %v3280_v5 = vpop.f32.mrb[20].mxu1 }
0x180f   :  { %v3293_v32 = vmul.f32 2.0, %v3280_v5  ;;  %v6629_v20 = vpop.f32.mrb[21].mxu1  ;;  %v3676_v5 = vld [vmem:[%s9054_s4 + $0x2b8] sm:$0xff] }
0x1811   :  { %v3294_v7 = vsub.f32 %v3292_v6, %v3293_v32  ;;  %v3677_v6 = vld [vmem:[%s9054_s4 + $0x2c0] sm:$0xff] }
0x1812   :  { %v7128_v20 = vpack.c.bf16 %v3677_v6, %v3676_v5 }
0x1813   :  { %v3295_v33 = vsel %vm1125_vm0, %v3294_v7, inf }
0x1814   :  { %3296 = vmin.index.xlane.f32.xlu0 %v3295_v33  ;;  %v3678_v33 = vld [vmem:[%s9054_s4 + $0x2c8] sm:$0xff] }
0x18a1   :  { %v3297_v9 = vpop.xlane.xlu0 %3296 }
0x18a2   :  { %vm3298_vm8 = vcmp.eq.s32.totalorder %v3297_v9, %v9097_v15  ;;  %v3405_v22 = vsel %vm3404_vm13, %v3297_v9, 4294967295  ;;  %v3679_v9 = vld [vmem:[%s9054_s4 + $0x2d0] sm:$0xff] }
0x18a3   :  { %v6011_v12 = vsel %vm3298_vm8, 1.0, %v9082_v45  ;;  %3406 = vst.msk [vmem:[%s9059_s9] sm:$0xff] %vm3384_vm14, %v3405_v22  ;;  %v7131_v15 = vpack.c.bf16 %v3679_v9, %v3678_v33  ;;  %v8481_v22 = vld [vmem:[%s9057_s7 + $0x18] sm:$0xff] }
0x18a4   :  { %6633 = vmatmul.mubr.msk.f32.vlgmr.msra.gmra.mrb[22].mxu1 %vm1125_vm0, %v6011_v12  ;;  %v3524_v12 = vrot.slane %v8481_v22, %v7527_v19  ;;  %v3605_v35 = vrot.slane %v8481_v22, %v7576_v59 }
0x18a5   :  { %6639 = vmatprep.mubr.msk.f32.mxu1 %vm7427_vm2, %v9082_v45  ;;  %7114 = vmatpush3.bf16.msra.mxu1 %v7113_v13 }
0x18a6   :  { %7121 = vmatprep.subr.bf16.mxu1 %v9083_v4 }
0x1977   :  { %v8411_v21 = vpop.f32.mrb[22].mxu1 }
0x1978   :  { %v3412_v26 = vmul.f32 %v3410_v38, %v8411_v21  ;;  %v6634_v50 = vpop.f32.mrb[23].mxu1 }
0x197a   :  { %6640 = vmatmul.mubr.msk.f32.vlgmr.msra.gmra.mrb[24].mxu1 %vm9098_vm3, %v3412_v26 }
0x197b   :  { %6661 = vmatprep.mubr.msk.f32.mxu1 %vm7427_vm2, %v9082_v45  ;;  %7123 = vmatpush3.bf16.msra.mxu1 %v7122_v8 }
0x197c   :  { %7124 = vmatprep.subr.bf16.mxu1 %v9083_v4 }
0x197f   :  { %7126 = vmatpush3.bf16.msra.mxu1 %v7125_v1  ;;  %v8519_v1 = vld [vmem:[%s9052_s2 + $0x10] sm:$0xff] }
0x1a4d   :  { %v3488_v17 = vpop.f32.mrb[24].mxu1 }
0x1a4e   :  { %v3489_v47 = vadd.f32 %v3488_v17, %v3418_v52  ;;  %v6641_v40 = vpop.f32.mrb[25].mxu1 }
0x1a50   :  { %v8422_v57 = vadd.f32 %v3492_v55, %v3489_v47  ;;  %v3683_v47 = vrot.slane %v8481_v22, %v7658_v53 }
0x1a52   :  { %v3494_v24 = vsel %vm231_vm1, %v8422_v57, 0.0 }
0x1a53   :  { %3495 = vadd.xlane.f32.xlu0 %v3494_v24 }
0x1ae0   :  { %v3496_v28 = vpop.xlane.xlu0 %3495 }
0x1ae1   :  { %v3497_v61 = vmul.f32 0.03125, %v3496_v28 }
0x1ae3   :  { %v3498_v25 = vsub.f32 %v8422_v57, %v3497_v61 }
0x1ae5   :  { %v3499_v46 = vmul.f32 %v3498_v25, %v3498_v25 }
0x1ae7   :  { %v3500_v51 = vsel %vm231_vm1, %v3499_v46, 0.0 }
0x1ae8   :  { %3501 = vadd.xlane.f32.xlu0 %v3500_v51 }
0x1b75   :  { %v3502_v3 = vpop.xlane.xlu0 %3501 }
0x1b76   :  { %v3503_v10 = vmul.f32 0.03125, %v3502_v3 }
0x1b78   :  { %v3504_v31 = vadd.f32 1e-05, %v3503_v10 }
0x1b7a   :  { %7342 = vrsqrt.f32 %v3504_v31 }
0x1b84   :  { %v7343_v14 = vpop.eup %7342 }
0x1b85   :  { %v3506_v58 = vmul.f32 %v7343_v14, %v3498_v25 }
0x1b87   :  { %v3511_v32 = vmul.f32 %v3510_v30, %v3506_v58 }
0x1b89   :  { %v3516_v7 = vadd.f32 %v3515_v48, %v3511_v32 }
0x1b8b   :  { %6651 = vmatmul.mubr.msk.f32.vlgmr.msra.gmra.mrb[28].mxu0 %vm231_vm1, %v3516_v7  ;;  %6662 = vmatmul.mubr.msk.f32.vlgmr.msra.gmra.mrb[26].mxu1 %vm231_vm1, %v3516_v7 }
0x1b8c   :  { %7129 = vmatpush3.bf16.msra.mxu0 %v7128_v20  ;;  %6672 = vmatprep.mubr.msk.f32.mxu0 %vm7427_vm2, %v9082_v45 }
0x1b8d   :  { %7130 = vmatprep.subr.bf16.mxu0 %v9083_v4 }
0x1b90   :  { %7132 = vmatpush3.bf16.msra.mxu0 %v7131_v15 }
0x1b93   :  { %6673 = vmatmul.mubr.msk.f32.vlgmr.msra.gmra.mrb[30].mxu0 %vm231_vm1, %v3516_v7 }
0x1c5e   :  { %v3594_v11 = vpop.f32.mrb[28].mxu0  ;;  %v3672_v13 = vpop.f32.mrb[26].mxu1 }
0x1c5f   :  { %v3595_v38 = vadd.f32 %v3594_v11, %v3524_v12  ;;  %v3673_v26 = vadd.f32 %v3672_v13, %v3605_v35  ;;  %v6652_v50 = vpop.f32.mrb[29].mxu0  ;;  %v6663_v52 = vpop.f32.mrb[27].mxu1 }
0x1c61   :  { %6675 = vmatprep.subr.msk.mxu1 %vm231_vm1, %v3673_v26  ;;  %v3754_v17 = vmul.f32 %v7718_v23, %v3595_v38  ;;  %v3755_v55 = vmul.f32 %v7737_v42, %v3595_v38  ;;  %v3756_v40 = vmul.f32 %v7741_v43, %v3595_v38  ;;  %v3757_v25 = vmul.f32 %v7750_v0, %v3595_v38 }
0x1c62   :  { %6676 = vmatpush3.xpose.msk.msra.mxu1 %vm231_vm1, %v3673_v26 }
0x1c63   :  { %6677 = vmatprep.mubr.msk.f32.mxu1 %vm231_vm1, %v3754_v17  ;;  %7133 = vmatprep.subr.bf16.mxu1 %v9083_v4 }
0x1c65   :  { %6678 = vmatmul.mubr.msk.f32.vlgmr.msra.gmra.mrb[28].mxu1 %vm231_vm1, %v3755_v55 }
0x1c66   :  { %v3750_v24 = vpop.f32.mrb[30].mxu0  ;;  %6680 = vmatprep.mubr.msk.f32.mxu1 %vm231_vm1, %v3756_v40 }
0x1c67   :  { %v3751_v28 = vadd.f32 %v3750_v24, %v3683_v47  ;;  %v6674_v61 = vpop.f32.mrb[31].mxu0 }
0x1c69   :  { %6683 = vmatprep.subr.mxu0 %v3751_v28  ;;  %6681 = vmatmul.mubr.msk.f32.gmra.mrb[30].mxu1 %vm231_vm1, %v3757_v25 }
0x1c6a   :  { %6684 = vmatpush3.msra.mxu0 %v3751_v28  ;;  %6699 = vmatprep.mubr.msk.f32.mxu1 %vm7427_vm2, %v9082_v45 }
0x1c6b   :  { %7139 = vmatprep.subr.bf16.mxu0 %v9083_v4 }
0x1d38   :  { %v6679_v46 = vpop.f32.mrb[28].mxu1 }
0x1d39   :  { %v3839_v51 = vpop.f32.mrb[29].mxu1  ;;  %v3859_v49 = vmul.f32 0.35355338, %v6679_v46 }
0x1d3a   :  { %v3858_v62 = vmul.f32 0.35355338, %v3839_v51 }
0x1d3b   :  { %v3863_v29 = vadd.f32 %v8513_v44, %v3859_v49 }
0x1d3c   :  { %v6682_v36 = vpop.f32.mrb[30].mxu1  ;;  %v3862_v18 = vadd.f32 %v8506_v63, %v3858_v62 }
0x1d3d   :  { %v3849_v8 = vpop.f32.mrb[31].mxu1  ;;  %v3861_v39 = vmul.f32 0.35355338, %v6682_v36  ;;  %v3869_v10 = vsel %vm1125_vm0, %v3863_v29, -inf }
0x1d3e   :  { %v3860_v60 = vmul.f32 0.35355338, %v3849_v8  ;;  %v3866_v37 = vsel %vm1125_vm0, %v3862_v18, -inf  ;;  %v4014_v8 = vld [vmem:[%s9054_s4 + $0x2d8] sm:$0xff] }
0x1d3f   :  { %3867 = vmax.xlane.f32.xlu0 %v3866_v37  ;;  %v3865_v30 = vadd.f32 %v8527_v56, %v3861_v39  ;;  %v4015_v39 = vld [vmem:[%s9054_s4 + $0x2e0] sm:$0xff]  ;;  %v4016_v37 = vld [vmem:[%s9054_s4 + $0x2e8] sm:$0xff] }
0x1d40   :  { %v3864_v3 = vadd.f32 %v8519_v1, %v3860_v60  ;;  %v7134_v60 = vpack.c.bf16 %v4015_v39, %v4014_v8 }
0x1d41   :  { %v3875_v14 = vsel %vm1125_vm0, %v3865_v30, -inf }
0x1d42   :  { %v3872_v31 = vsel %vm1125_vm0, %v3864_v3, -inf  ;;  %7135 = vmatpush3.bf16.msra.mxu1 %v7134_v60 }
0x1d43   :  { %3870 = vmax.xlane.f32.xlu0 %v3869_v10  ;;  %3873 = vmax.xlane.f32.xlu1 %v3872_v31 }
0x1d44   :  { %7136 = vmatprep.subr.bf16.mxu1 %v9083_v4 }
0x1d47   :  { %3876 = vmax.xlane.f32.xlu0 %v3875_v14 }
0x1dcc   :  { %v3868_v58 = vpop.xlane.xlu0 %3867 }
0x1dcd   :  { %v3878_v48 = vsub.f32 %v3862_v18, %v3868_v58 }
0x1dcf   :  { %v3882_v20 = vmul.f32 1.442695, %v3878_v48 }
0x1dd0   :  { %v3871_v5 = vpop.xlane.xlu0 %3870  ;;  %v3874_v6 = vpop.xlane.xlu1 %3873 }
0x1dd1   :  { %v3879_v32 = vsub.f32 %v3863_v29, %v3871_v5  ;;  %v3880_v33 = vsub.f32 %v3864_v3, %v3874_v6  ;;  %v4017_v29 = vld [vmem:[%s9054_s4 + $0x2f0] sm:$0xff] }
0x1dd2   :  { %v7137_v3 = vpack.c.bf16 %v4017_v29, %v4016_v37  ;;  %v4212_v37 = vld [vmem:[%s9054_s4 + $0x308] sm:$0xff]  ;;  %v4213_v29 = vld [vmem:[%s9054_s4 + $0x310] sm:$0xff] }
0x1dd3   :  { %v3884_v7 = vmul.f32 1.442695, %v3879_v32  ;;  %v3886_v15 = vmul.f32 1.442695, %v3880_v33  ;;  %v4095_v33 = vrot.slane %v8481_v22, %v7661_v54 }
0x1dd4   :  { %v3877_v9 = vpop.xlane.xlu0 %3876  ;;  %7138 = vmatpush3.bf16.msra.mxu1 %v7137_v3  ;;  %v7149_v3 = vpack.c.bf16 %v4213_v29, %v4212_v37 }
0x1dd5   :  { %7344 = vpow2.f32 %v3884_v7  ;;  %v3881_v12 = vsub.f32 %v3865_v30, %v3877_v9  ;;  %7145 = vmatprep.subr.bf16.mxu1 %v9083_v4 }
0x1dd6   :  { %7346 = vpow2.f32 %v3882_v20 }
0x1dd7   :  { %7348 = vpow2.f32 %v3886_v15  ;;  %v3888_v35 = vmul.f32 1.442695, %v3881_v12 }
0x1dd9   :  { %7350 = vpow2.f32 %v3888_v35 }
0x1ddf   :  { %v7345_v11 = vpop.eup %7344 }
0x1de0   :  { %v3893_v13 = vsel %vm1125_vm0, %v7345_v11, 0.0  ;;  %v7347_v38 = vpop.eup %7346 }
0x1de1   :  { %3894 = vadd.xlane.f32.xlu0 %v3893_v13  ;;  %v3890_v26 = vsel %vm1125_vm0, %v7347_v38, 0.0  ;;  %v7349_v50 = vpop.eup %7348 }
0x1de2   :  { %v3896_v52 = vsel %vm1125_vm0, %v7349_v50, 0.0 }
0x1de3   :  { %v7351_v17 = vpop.eup %7350 }
0x1de4   :  { %v3899_v55 = vsel %vm1125_vm0, %v7351_v17, 0.0 }
0x1de5   :  { %3891 = vadd.xlane.f32.xlu0 %v3890_v26 }
0x1de9   :  { %3897 = vadd.xlane.f32.xlu0 %v3896_v52 }
0x1ded   :  { %3900 = vadd.xlane.f32.xlu0 %v3899_v55 }
0x1e6e   :  { %v3895_v47 = vpop.xlane.xlu0 %3894 }
0x1e6f   :  { %7352 = vrcp.f32 %v3895_v47  ;;  %v4122_v47 = vld [vmem:[%s9055_s5 + $0x50] sm:$0xff] }
0x1e72   :  { %v3892_v40 = vpop.xlane.xlu0 %3891 }
0x1e73   :  { %7354 = vrcp.f32 %v3892_v40  ;;  %v4123_v40 = vld [vmem:[%s9055_s5 + $0x58] sm:$0xff] }
0x1e76   :  { %v3898_v24 = vpop.xlane.xlu0 %3897 }
0x1e77   :  { %7356 = vrcp.f32 %v3898_v24  ;;  %v7143_v24 = vpack.c.bf16 %v4123_v40, %v4122_v47 }
0x1e79   :  { %v7353_v61 = vpop.eup %7352 }
0x1e7a   :  { %v3901_v28 = vpop.xlane.xlu0 %3900  ;;  %v3907_v51 = vmul.f32 %v7353_v61, %v7345_v11  ;;  %v4211_v61 = vld [vmem:[%s9054_s4 + $0x300] sm:$0xff] }
0x1e7b   :  { %7358 = vrcp.f32 %v3901_v28  ;;  %v4210_v28 = vld [vmem:[%s9054_s4 + $0x2f8] sm:$0xff] }
0x1e7d   :  { %v7355_v25 = vpop.eup %7354 }
0x1e7e   :  { %v3906_v46 = vmul.f32 %v7355_v25, %v7347_v38  ;;  %v7146_v25 = vpack.c.bf16 %v4211_v61, %v4210_v28 }
0x1e80   :  { %6685 = vmatprep.mubr.msk.f32.mxu0 %vm1125_vm0, %v3906_v46 }
0x1e81   :  { %v7357_v49 = vpop.eup %7356  ;;  %6686 = vmatmul.mubr.msk.f32.vlgmr.msra.gmra.mrb[32].mxu0 %vm1125_vm0, %v3907_v51 }
0x1e82   :  { %v3908_v62 = vmul.f32 %v7357_v49, %v7349_v50 }
0x1e84   :  { %6688 = vmatprep.mubr.msk.f32.mxu0 %vm1125_vm0, %v3908_v62  ;;  %v4113_v62 = vrot.slane %v8481_v22, %v7712_v16 }
0x1e85   :  { %v7359_v36 = vpop.eup %7358 }
0x1e86   :  { %v3909_v18 = vmul.f32 %v7359_v36, %v7351_v17  ;;  %v4120_v17 = vld [vmem:[%s9055_s5 + $0x40] sm:$0xff] }
0x1e88   :  { %6689 = vmatmul.mubr.msk.f32.gmra.mrb[34].mxu0 %vm1125_vm0, %v3909_v18  ;;  %v4118_v18 = vrot.slane %v8481_v22, %v9090_v34 }
0x1e89   :  { %6710 = vmatprep.mubr.msk.f32.mxu0 %vm7427_vm2, %v9082_v45 }
0x1f54   :  { %v6687_v10 = vpop.f32.mrb[32].mxu0 }
0x1f55   :  { %v4008_v31 = vmul.f32 %v6687_v10, %v7737_v42  ;;  %v3988_v30 = vpop.f32.mrb[33].mxu0  ;;  %v4214_v10 = vld [vmem:[%s9054_s4 + $0x318] sm:$0xff] }
0x1f56   :  { %v4007_v14 = vmul.f32 %v7718_v23, %v3988_v30 }
0x1f58   :  { %v4009_v58 = vadd.f32 %v4008_v31, %v4007_v14  ;;  %v4215_v31 = vld [vmem:[%s9054_s4 + $0x320] sm:$0xff]  ;;  %v4216_v14 = vld [vmem:[%s9054_s4 + $0x328] sm:$0xff] }
0x1f59   :  { %v7152_v30 = vpack.c.bf16 %v4215_v31, %v4214_v10  ;;  %v4327_v31 = vld [vmem:[%s9054_s4 + $0x388] sm:$0xff] }
0x1f5b   :  { %v6690_v48 = vpop.f32.mrb[34].mxu0 }
0x1f5c   :  { %v3998_v5 = vpop.f32.mrb[35].mxu0  ;;  %v4012_v32 = vmul.f32 %v6690_v48, %v7750_v0 }
0x1f5d   :  { %v4010_v6 = vmul.f32 %v7741_v43, %v3998_v5  ;;  %v4218_v5 = vld [vmem:[%s9054_s4 + $0x338] sm:$0xff] }
0x1f5f   :  { %v4011_v20 = vadd.f32 %v4010_v6, %v4009_v58  ;;  %v4217_v58 = vld [vmem:[%s9054_s4 + $0x330] sm:$0xff]  ;;  %v4219_v6 = vld [vmem:[%s9054_s4 + $0x340] sm:$0xff] }
0x1f60   :  { %v7155_v48 = vpack.c.bf16 %v4217_v58, %v4216_v14 }
0x1f61   :  { %v4013_v7 = vadd.f32 %v4012_v32, %v4011_v20  ;;  %v4220_v32 = vld [vmem:[%s9054_s4 + $0x348] sm:$0xff]  ;;  %v7158_v20 = vpack.c.bf16 %v4219_v6, %v4218_v5  ;;  %v8675_v6 = vld [vmem:[%s9057_s7 + $0x20] sm:$0xff] }
0x1f63   :  { %6700 = vmatmul.mubr.msk.f32.vlgmr.msra.gmra.mrb[32].mxu1 %vm231_vm1, %v4013_v7  ;;  %v4221_v7 = vld [vmem:[%s9054_s4 + $0x350] sm:$0xff] }
0x1f64   :  { %6745 = vmatprep.mubr.msk.f32.mxu1 %vm7427_vm2, %v9082_v45  ;;  %7147 = vmatpush3.bf16.msra.mxu1 %v7146_v25 }
0x1f65   :  { %7148 = vmatprep.subr.bf16.mxu1 %v9083_v4 }
0x1f68   :  { %7150 = vmatpush3.bf16.msra.mxu1 %v7149_v3 }
0x1f69   :  { %7151 = vmatprep.subr.bf16.mxu1 %v9083_v4 }
0x1f6c   :  { %7153 = vmatpush3.bf16.msra.mxu1 %v7152_v30  ;;  %v4328_v30 = vld [vmem:[%s9054_s4 + $0x390] sm:$0xff] }
0x1f6d   :  { %7154 = vmatprep.subr.bf16.mxu1 %v9083_v4  ;;  %v7173_v14 = vpack.c.bf16 %v4328_v30, %v4327_v31 }
0x1f70   :  { %7156 = vmatpush3.bf16.msra.mxu1 %v7155_v48 }
0x1f71   :  { %7157 = vmatprep.subr.bf16.mxu1 %v9083_v4 }
0x1f74   :  { %7159 = vmatpush3.bf16.msra.mxu1 %v7158_v20 }
0x1f75   :  { %7160 = vmatprep.subr.bf16.mxu1 %v9083_v4 }
0x2036   :  { %v4087_v9 = vpop.f32.mrb[32].mxu1 }
0x2037   :  { %v4091_v15 = vadd.f32 %v4087_v9, %v8422_v57  ;;  %v6701_v12 = vpop.f32.mrb[33].mxu1  ;;  %v4121_v57 = vld [vmem:[%s9055_s5 + $0x48] sm:$0xff]  ;;  %v4222_v9 = vld [vmem:[%s9054_s4 + $0x358] sm:$0xff] }
0x2038   :  { %v7140_v55 = vpack.c.bf16 %v4121_v57, %v4120_v17 }
0x2039   :  { %v8565_v35 = vadd.f32 %v4095_v33, %v4091_v15  ;;  %v7161_v33 = vpack.c.bf16 %v4221_v7, %v4220_v32  ;;  %v4223_v15 = vld [vmem:[%s9054_s4 + $0x360] sm:$0xff]  ;;  %v4318_v32 = vrot.slane %v8675_v6, %v7527_v19 }
0x203a   :  { %7141 = vmatpush3.bf16.msra.mxu0 %v7140_v55  ;;  %v7164_v12 = vpack.c.bf16 %v4223_v15, %v4222_v9  ;;  %v4406_v9 = vld [vmem:[%s9054_s4 + $0x398] sm:$0xff]  ;;  %v4407_v15 = vld [vmem:[%s9054_s4 + $0x3a0] sm:$0xff] }
0x203b   :  { %v4097_v11 = vsel %vm231_vm1, %v8565_v35, 0.0  ;;  %7142 = vmatprep.subr.bf16.mxu0 %v9083_v4  ;;  %7162 = vmatpush3.bf16.msra.mxu1 %v7161_v33  ;;  %v4323_v33 = vrot.slane %v8675_v6, %v7576_v59 }
0x203c   :  { %4098 = vadd.xlane.f32.xlu0 %v4097_v11  ;;  %7163 = vmatprep.subr.bf16.mxu1 %v9083_v4  ;;  %v4224_v11 = vld [vmem:[%s9054_s4 + $0x368] sm:$0xff] }
0x203e   :  { %7144 = vmatpush3.bf16.msra.mxu0 %v7143_v24 }
0x203f   :  { %7169 = vmatprep.subr.bf16.mxu0 %v9083_v4  ;;  %7165 = vmatpush3.bf16.msra.mxu1 %v7164_v12 }
0x2040   :  { %7166 = vmatprep.subr.bf16.mxu1 %v9083_v4 }
0x20c9   :  { %v4099_v13 = vpop.xlane.xlu0 %4098 }
0x20ca   :  { %v4100_v38 = vmul.f32 0.03125, %v4099_v13  ;;  %v4225_v13 = vld [vmem:[%s9054_s4 + $0x370] sm:$0xff] }
0x20cc   :  { %v4101_v26 = vsub.f32 %v8565_v35, %v4100_v38  ;;  %v7167_v38 = vpack.c.bf16 %v4225_v13, %v4224_v11  ;;  %v7176_v11 = vpack.c.bf16 %v4407_v15, %v4406_v9 }
0x20ce   :  { %v4102_v50 = vmul.f32 %v4101_v26, %v4101_v26  ;;  %7168 = vmatpush3.bf16.msra.mxu1 %v7167_v38  ;;  %v4408_v38 = vld [vmem:[%s9054_s4 + $0x3a8] sm:$0xff] }
0x20d0   :  { %v4103_v52 = vsel %vm231_vm1, %v4102_v50, 0.0 }
0x20d1   :  { %4104 = vadd.xlane.f32.xlu0 %v4103_v52 }
0x215e   :  { %v4105_v46 = vpop.xlane.xlu0 %4104 }
0x215f   :  { %v4106_v51 = vmul.f32 0.03125, %v4105_v46 }
0x2161   :  { %v4107_v49 = vadd.f32 1e-05, %v4106_v51  ;;  %v4300_v51 = vrot.slane %v8481_v22, %v7819_v2 }
0x2163   :  { %7360 = vrsqrt.f32 %v4107_v49 }
0x216d   :  { %v7361_v36 = vpop.eup %7360 }
0x216e   :  { %v4109_v8 = vmul.f32 %v7361_v36, %v4101_v26  ;;  %v4127_v26 = vrot.slane %v8481_v22, %v7734_v41  ;;  %v4325_v22 = vld [vmem:[%s9054_s4 + $0x378] sm:$0xff] }
0x2170   :  { %v4114_v39 = vmul.f32 %v4113_v62, %v4109_v8 }
0x2172   :  { %v4119_v60 = vadd.f32 %v4118_v18, %v4114_v39 }
0x2174   :  { %6711 = vmatmul.mubr.msk.f32.vlgmr.msra.gmra.mrb[36].mxu0 %vm231_vm1, %v4119_v60 }
0x2175   :  { %6756 = vmatprep.mubr.msk.f32.mxu0 %vm7427_vm2, %v9082_v45 }
0x2247   :  { %v4197_v50 = vpop.f32.mrb[36].mxu0 }
0x2248   :  { %v4198_v52 = vadd.f32 %v4197_v50, %v4127_v26  ;;  %v6712_v17 = vpop.f32.mrb[37].mxu0  ;;  %v4409_v26 = vld [vmem:[%s9054_s4 + $0x3b0] sm:$0xff] }
0x2249   :  { %v7179_v50 = vpack.c.bf16 %v4409_v26, %v4408_v38  ;;  %v4485_v17 = vld [vmem:[%s9054_s4 + $0x3c0] sm:$0xff] }
0x224a   :  { %v4201_v57 = vmul.f32 %v4198_v52, %v4198_v52 }
0x224c   :  { %v4202_v55 = vmul.f32 %v4201_v57, %v4198_v52 }
0x224e   :  { %v4203_v47 = vmul.f32 0.044715, %v4202_v55  ;;  %v4486_v55 = vld [vmem:[%s9054_s4 + $0x3c8] sm:$0xff] }
0x2250   :  { %v4204_v40 = vadd.f32 %v4203_v47, %v4198_v52  ;;  %v4487_v47 = vld [vmem:[%s9054_s4 + $0x3d0] sm:$0xff] }
0x2252   :  { %v4205_v24 = vmul.f32 0.7978846, %v4204_v40  ;;  %v7185_v40 = vpack.c.bf16 %v4487_v47, %v4486_v55 }
0x2254   :  { %7362 = vtanh.f32 %v4205_v24  ;;  %v4332_v24 = vrot.slane %v8675_v6, %v7658_v53 }
0x225e   :  { %v7363_v28 = vpop.eup %7362 }
0x225f   :  { %v4207_v61 = vadd.f32 1.0, %v7363_v28 }
0x2261   :  { %v4208_v25 = vmul.f32 0.5, %v4207_v61 }
0x2263   :  { %v4209_v46 = vmul.f32 %v4208_v25, %v4198_v52  ;;  %v4484_v52 = vld [vmem:[%s9054_s4 + $0x3b8] sm:$0xff] }
0x2264   :  { %v7182_v57 = vpack.c.bf16 %v4485_v17, %v4484_v52 }
0x2265   :  { %6746 = vmatmul.mubr.f32.vlgmr.msra.gmra.mrb[34].mxu1 %v4209_v46 }
0x2338   :  { %v4292_v49 = vpop.f32.mrb[34].mxu1 }
0x2339   :  { %v4296_v62 = vadd.f32 %v4292_v49, %v8565_v35  ;;  %v6747_v36 = vpop.f32.mrb[35].mxu1  ;;  %v4326_v35 = vld [vmem:[%s9054_s4 + $0x380] sm:$0xff] }
0x233a   :  { %v7170_v10 = vpack.c.bf16 %v4326_v35, %v4325_v22 }
0x233b   :  { %v8652_v18 = vadd.f32 %v4300_v51, %v4296_v62  ;;  %v4413_v51 = vrot.slane %v8675_v6, %v7661_v54 }
0x233c   :  { %7171 = vmatpush3.bf16.msra.mxu0 %v7170_v10 }
0x233d   :  { %v4302_v8 = vsel %vm231_vm1, %v8652_v18, 0.0  ;;  %7172 = vmatprep.subr.bf16.mxu0 %v9083_v4 }
0x233e   :  { %4303 = vadd.xlane.f32.xlu0 %v4302_v8 }
0x2340   :  { %7174 = vmatpush3.bf16.msra.mxu0 %v7173_v14 }
0x2341   :  { %7175 = vmatprep.subr.bf16.mxu0 %v9083_v4 }
0x23cb   :  { %v4304_v39 = vpop.xlane.xlu0 %4303 }
0x23cc   :  { %v4305_v60 = vmul.f32 0.03125, %v4304_v39  ;;  %v4491_v39 = vrot.slane %v8675_v6, %v7712_v16 }
0x23ce   :  { %v4306_v37 = vsub.f32 %v8652_v18, %v4305_v60 }
0x23d0   :  { %v4307_v29 = vmul.f32 %v4306_v37, %v4306_v37 }
0x23d2   :  { %v4308_v3 = vsel %vm231_vm1, %v4307_v29, 0.0 }
0x23d3   :  { %4309 = vadd.xlane.f32.xlu0 %v4308_v3 }
0x2460   :  { %v4310_v58 = vpop.xlane.xlu0 %4309 }
0x2461   :  { %v4311_v48 = vmul.f32 0.03125, %v4310_v58 }
0x2463   :  { %v4312_v5 = vadd.f32 1e-05, %v4311_v48 }
0x2465   :  { %7364 = vrsqrt.f32 %v4312_v5 }
0x246f   :  { %v7365_v20 = vpop.eup %7364 }
0x2470   :  { %v4314_v7 = vmul.f32 %v7365_v20, %v4306_v37 }
0x2472   :  { %v4319_v12 = vmul.f32 %v4318_v32, %v4314_v7 }
0x2474   :  { %v4324_v13 = vadd.f32 %v4323_v33, %v4319_v12 }
0x2476   :  { %6757 = vmatmul.mubr.msk.f32.vlgmr.msra.gmra.mrb[38].mxu0 %vm231_vm1, %v4324_v13 }
0x2477   :  { %7177 = vmatpush3.bf16.msra.mxu0 %v7176_v11  ;;  %6767 = vmatprep.mubr.msk.f32.mxu0 %vm7427_vm2, %v9082_v45 }
0x2478   :  { %7178 = vmatprep.subr.bf16.mxu0 %v9083_v4 }
0x247b   :  { %7180 = vmatpush3.bf16.msra.mxu0 %v7179_v50 }
0x247c   :  { %7181 = vmatprep.subr.bf16.mxu0 %v9083_v4 }
0x247e   :  { %6768 = vmatmul.mubr.msk.f32.vlgmr.msra.gmra.mrb[40].mxu0 %vm231_vm1, %v4324_v13 }
0x247f   :  { %7183 = vmatpush3.bf16.msra.mxu0 %v7182_v57  ;;  %6778 = vmatprep.mubr.msk.f32.mxu0 %vm7427_vm2, %v9082_v45 }
0x2480   :  { %7184 = vmatprep.subr.bf16.mxu0 %v9083_v4 }
0x2483   :  { %7186 = vmatpush3.bf16.msra.mxu0 %v7185_v40 }
0x2486   :  { %6779 = vmatmul.mubr.msk.f32.vlgmr.msra.gmra.mrb[42].mxu0 %vm231_vm1, %v4324_v13 }
0x2549   :  { %v4402_v28 = vpop.f32.mrb[38].mxu0 }
0x254a   :  { %v4403_v61 = vadd.f32 %v4402_v28, %v4332_v24  ;;  %v6758_v25 = vpop.f32.mrb[39].mxu0 }
0x254c   :  { %v4562_v46 = vmul.f32 %v7718_v23, %v4403_v61  ;;  %v4563_v8 = vmul.f32 %v7737_v42, %v4403_v61  ;;  %v4564_v60 = vmul.f32 %v7741_v43, %v4403_v61  ;;  %v4565_v22 = vmul.f32 %v7750_v0, %v4403_v61 }
0x254e   :  { %6783 = vmatprep.mubr.msk.f32.mxu0 %vm231_vm1, %v4562_v46 }
0x2551   :  { %v4480_v49 = vpop.f32.mrb[40].mxu0 }
0x2552   :  { %v4481_v62 = vadd.f32 %v4480_v49, %v4413_v51  ;;  %v6769_v36 = vpop.f32.mrb[41].mxu0 }
0x2554   :  { %6781 = vmatprep.subr.msk.mxu0 %vm231_vm1, %v4481_v62 }
0x2555   :  { %6782 = vmatpush3.xpose.msk.msra.mxu0 %vm231_vm1, %v4481_v62 }
0x2556   :  { %7187 = vmatprep.subr.bf16.mxu0 %v9083_v4 }
0x2558   :  { %6784 = vmatmul.mubr.msk.f32.vlgmr.msra.gmra.mrb[44].mxu0 %vm231_vm1, %v4563_v8 }
0x2559   :  { %v4558_v37 = vpop.f32.mrb[42].mxu0  ;;  %6786 = vmatprep.mubr.msk.f32.mxu0 %vm231_vm1, %v4564_v60 }
0x255a   :  { %v4559_v29 = vadd.f32 %v4558_v37, %v4491_v39  ;;  %v6780_v3 = vpop.f32.mrb[43].mxu0 }
0x255c   :  { %6787 = vmatmul.mubr.msk.f32.gmra.mrb[46].mxu0 %vm231_vm1, %v4565_v22  ;;  %6789 = vmatprep.subr.mxu1 %v4559_v29 }
0x255d   :  { %6790 = vmatpush3.msra.mxu1 %v4559_v29  ;;  %6805 = vmatprep.mubr.msk.f32.mxu0 %vm7427_vm2, %v9082_v45 }
0x255e   :  { %7193 = vmatprep.subr.bf16.mxu1 %v9083_v4 }
0x262b   :  { %v6785_v16 = vpop.f32.mrb[44].mxu0 }
0x262c   :  { %v4667_v35 = vmul.f32 0.35355338, %v6785_v16  ;;  %v4647_v10 = vpop.f32.mrb[45].mxu0 }
0x262d   :  { %v4666_v31 = vmul.f32 0.35355338, %v4647_v10  ;;  %v4823_v10 = vld [vmem:[%s9054_s4 + $0x3e0] sm:$0xff] }
0x262e   :  { %v4671_v30 = vadd.f32 %v8513_v44, %v4667_v35  ;;  %v4822_v35 = vld [vmem:[%s9054_s4 + $0x3d8] sm:$0xff] }
0x262f   :  { %v6788_v14 = vpop.f32.mrb[46].mxu0  ;;  %v4670_v58 = vadd.f32 %v8506_v63, %v4666_v31  ;;  %v7188_v31 = vpack.c.bf16 %v4823_v10, %v4822_v35  ;;  %v5026_v35 = vld [vmem:[%s9054_s4 + $0x438] sm:$0xff]  ;;  %v5027_v10 = vld [vmem:[%s9054_s4 + $0x440] sm:$0xff] }
0x2630   :  { %v4669_v48 = vmul.f32 0.35355338, %v6788_v14  ;;  %v4657_v5 = vpop.f32.mrb[47].mxu0  ;;  %v4677_v32 = vsel %vm1125_vm0, %v4671_v30, -inf  ;;  %v4825_v14 = vld [vmem:[%s9054_s4 + $0x3f0] sm:$0xff] }
0x2631   :  { %v4668_v20 = vmul.f32 0.35355338, %v4657_v5  ;;  %4678 = vmax.xlane.f32.xlu0 %v4677_v32  ;;  %v4674_v7 = vsel %vm1125_vm0, %v4670_v58, -inf  ;;  %7189 = vmatpush3.bf16.msra.mxu0 %v7188_v31  ;;  %v7212_v31 = vpack.c.bf16 %v5027_v10, %v5026_v35  ;;  %v9101_v10 = vld [vmem:[#allocation7_spill] sm:$0xff] }
0x2632   :  { %4675 = vmax.xlane.f32.xlu1 %v4674_v7  ;;  %v4673_v33 = vadd.f32 %v8527_v56, %v4669_v48  ;;  %7190 = vmatprep.subr.bf16.mxu0 %v9083_v4 }
0x2633   :  { %v4672_v9 = vadd.f32 %v8519_v1, %v4668_v20 }
0x2634   :  { %v4683_v15 = vsel %vm1125_vm0, %v4673_v33, -inf }
0x2635   :  { %4684 = vmax.xlane.f32.xlu0 %v4683_v15  ;;  %v4680_v44 = vsel %vm1125_vm0, %v4672_v9, -inf }
0x2636   :  { %4681 = vmax.xlane.f32.xlu1 %v4680_v44 }
0x26be   :  { %v4679_v63 = vpop.xlane.xlu0 %4678 }
0x26bf   :  { %v4687_v12 = vsub.f32 %v4671_v30, %v4679_v63  ;;  %v4676_v11 = vpop.xlane.xlu1 %4675  ;;  %v4824_v30 = vld [vmem:[%s9054_s4 + $0x3e8] sm:$0xff] }
0x26c0   :  { %v4686_v13 = vsub.f32 %v4670_v58, %v4676_v11  ;;  %v7191_v58 = vpack.c.bf16 %v4825_v14, %v4824_v30  ;;  %v5028_v30 = vld [vmem:[%s9054_s4 + $0x448] sm:$0xff]  ;;  %v5029_v14 = vld [vmem:[%s9054_s4 + $0x450] sm:$0xff] }
0x26c1   :  { %v4692_v38 = vmul.f32 1.442695, %v4687_v12 }
0x26c2   :  { %v4690_v26 = vmul.f32 1.442695, %v4686_v13  ;;  %v4685_v50 = vpop.xlane.xlu0 %4684  ;;  %7192 = vmatpush3.bf16.msra.mxu0 %v7191_v58  ;;  %v7215_v58 = vpack.c.bf16 %v5029_v14, %v5028_v30  ;;  %v5285_v14 = vld [vmem:[%s9054_s4 + $0x4e8] sm:$0xff] }
0x26c3   :  { %7366 = vpow2.f32 %v4692_v38  ;;  %v4689_v52 = vsub.f32 %v4673_v33, %v4685_v50  ;;  %v4682_v17 = vpop.xlane.xlu1 %4681  ;;  %7199 = vmatprep.subr.bf16.mxu0 %v9083_v4 }
0x26c4   :  { %7368 = vpow2.f32 %v4690_v26  ;;  %v4688_v56 = vsub.f32 %v4672_v9, %v4682_v17 }
0x26c5   :  { %v4696_v57 = vmul.f32 1.442695, %v4689_v52 }
0x26c6   :  { %v4694_v1 = vmul.f32 1.442695, %v4688_v56 }
0x26c7   :  { %7370 = vpow2.f32 %v4696_v57  ;;  %v4930_v57 = vld [vmem:[%s9055_s5 + $0x70] sm:$0xff] }
0x26c8   :  { %7372 = vpow2.f32 %v4694_v1  ;;  %v4931_v1 = vld [vmem:[%s9055_s5 + $0x78] sm:$0xff] }
0x26cd   :  { %v7367_v55 = vpop.eup %7366 }
0x26ce   :  { %v7369_v47 = vpop.eup %7368  ;;  %v4701_v40 = vsel %vm1125_vm0, %v7367_v55, 0.0 }
0x26cf   :  { %4702 = vadd.xlane.f32.xlu0 %v4701_v40  ;;  %v4698_v24 = vsel %vm1125_vm0, %v7369_v47, 0.0  ;;  %v5019_v40 = vld [vmem:[%s9054_s4 + $0x400] sm:$0xff] }
0x26d0   :  { %4699 = vadd.xlane.f32.xlu1 %v4698_v24 }
0x26d1   :  { %v7371_v28 = vpop.eup %7370 }
0x26d2   :  { %v7373_v61 = vpop.eup %7372  ;;  %v4707_v25 = vsel %vm1125_vm0, %v7371_v28, 0.0 }
0x26d3   :  { %4708 = vadd.xlane.f32.xlu0 %v4707_v25  ;;  %v4704_v46 = vsel %vm1125_vm0, %v7373_v61, 0.0 }
0x26d4   :  { %4705 = vadd.xlane.f32.xlu1 %v4704_v46  ;;  %v4921_v46 = vrot.slane %v8675_v6, %v7734_v41  ;;  %v5021_v41 = vld [vmem:[%s9054_s4 + $0x410] sm:$0xff] }
0x275c   :  { %v4703_v51 = vpop.xlane.xlu0 %4702 }
0x275d   :  { %7374 = vrcp.f32 %v4703_v51  ;;  %v4700_v49 = vpop.xlane.xlu1 %4699 }
0x275e   :  { %7376 = vrcp.f32 %v4700_v49  ;;  %v4926_v49 = vrot.slane %v8675_v6, %v7819_v2 }
0x2760   :  { %v4709_v62 = vpop.xlane.xlu0 %4708 }
0x2761   :  { %7378 = vrcp.f32 %v4709_v62  ;;  %v4706_v36 = vpop.xlane.xlu1 %4705 }
0x2762   :  { %7380 = vrcp.f32 %v4706_v36 }
0x2767   :  { %v7375_v8 = vpop.eup %7374 }
0x2768   :  { %v7377_v39 = vpop.eup %7376  ;;  %v4715_v37 = vmul.f32 %v7375_v8, %v7367_v55  ;;  %v7197_v55 = vpack.c.bf16 %v4931_v1, %v4930_v57  ;;  %v5134_v57 = vld [vmem:[%s9054_s4 + $0x520] sm:$0xff] }
0x2769   :  { %v4714_v60 = vmul.f32 %v7377_v39, %v7369_v47  ;;  %v5018_v47 = vld [vmem:[%s9054_s4 + $0x3f8] sm:$0xff]  ;;  %v5020_v39 = vld [vmem:[%s9054_s4 + $0x408] sm:$0xff] }
0x276a   :  { %v7200_v24 = vpack.c.bf16 %v5019_v40, %v5018_v47 }
0x276b   :  { %v7379_v29 = vpop.eup %7378  ;;  %6791 = vmatprep.mubr.msk.f32.mxu1 %vm1125_vm0, %v4714_v60  ;;  %v7203_v60 = vpack.c.bf16 %v5021_v41, %v5020_v39  ;;  %v5129_v41 = vld [vmem:[%s9054_s4 + $0x4d8] sm:$0xff] }
0x276c   :  { %v7381_v3 = vpop.eup %7380  ;;  %6792 = vmatmul.mubr.msk.f32.vlgmr.msra.gmra.mrb[36].mxu1 %vm1125_vm0, %v4715_v37  ;;  %v4717_v16 = vmul.f32 %v7379_v29, %v7371_v28  ;;  %v5023_v37 = vld [vmem:[%s9054_s4 + $0x420] sm:$0xff] }
0x276d   :  { %v4716_v22 = vmul.f32 %v7381_v3, %v7373_v61  ;;  %v5024_v3 = vld [vmem:[%s9054_s4 + $0x428] sm:$0xff] }
0x276f   :  { %6794 = vmatprep.mubr.msk.f32.mxu1 %vm1125_vm0, %v4716_v22  ;;  %v5025_v22 = vld [vmem:[%s9054_s4 + $0x430] sm:$0xff] }
0x2770   :  { %6795 = vmatmul.mubr.msk.f32.gmra.mrb[38].mxu1 %vm1125_vm0, %v4717_v16  ;;  %v7209_v16 = vpack.c.bf16 %v5025_v22, %v5024_v3  ;;  %v5291_v3 = vld [vmem:[%s9054_s4 + $0x4b8] sm:$0xff]  ;;  %v5292_v22 = vld [vmem:[%s9054_s4 + $0x4c0] sm:$0xff] }
0x2771   :  { %6816 = vmatprep.mubr.msk.f32.mxu1 %vm7427_vm2, %v9082_v45  ;;  %v7239_v35 = vpack.c.bf16 %v5292_v22, %v5291_v3 }
0x283f   :  { %v6793_v48 = vpop.f32.mrb[36].mxu1 }
0x2840   :  { %v4816_v5 = vmul.f32 %v6793_v48, %v7737_v42  ;;  %v4796_v32 = vpop.f32.mrb[37].mxu1  ;;  %v4903_v42 = vrot.slane %v8675_v6, %v9090_v34  ;;  %v4928_v34 = vld [vmem:[%s9055_s5 + $0x60] sm:$0xff]  ;;  %v5022_v6 = vld [vmem:[%s9054_s4 + $0x418] sm:$0xff] }
0x2841   :  { %v4815_v20 = vmul.f32 %v7718_v23, %v4796_v32  ;;  %v7206_v29 = vpack.c.bf16 %v5023_v37, %v5022_v6  ;;  %v5030_v48 = vld [vmem:[%s9054_s4 + $0x458] sm:$0xff]  ;;  %v5289_v6 = vld [vmem:[%s9054_s4 + $0x4a8] sm:$0xff]  ;;  %v5290_v37 = vld [vmem:[%s9054_s4 + $0x4b0] sm:$0xff] }
0x2843   :  { %v4817_v7 = vadd.f32 %v4816_v5, %v4815_v20  ;;  %v6796_v33 = vpop.f32.mrb[38].mxu1  ;;  %v5031_v5 = vld [vmem:[%s9054_s4 + $0x460] sm:$0xff]  ;;  %v5032_v20 = vld [vmem:[%s9054_s4 + $0x468] sm:$0xff] }
0x2844   :  { %v4806_v9 = vpop.f32.mrb[39].mxu1  ;;  %v4820_v44 = vmul.f32 %v6796_v33, %v7750_v0  ;;  %v7218_v32 = vpack.c.bf16 %v5031_v5, %v5030_v48 }
0x2845   :  { %v4818_v15 = vmul.f32 %v7741_v43, %v4806_v9  ;;  %v8863_v9 = vld [vmem:[%s9057_s7 + $0x28] sm:$0xff] }
0x2846   :  { %v5108_v47 = vrot.slane %v8863_v9, %v7576_v59 }
0x2847   :  { %v4819_v63 = vadd.f32 %v4818_v15, %v4817_v7  ;;  %v5033_v7 = vld [vmem:[%s9054_s4 + $0x470] sm:$0xff]  ;;  %v4935_v15 = vrot.slane %v8863_v9, %v7527_v19 }
0x2848   :  { %v7221_v33 = vpack.c.bf16 %v5033_v7, %v5032_v20  ;;  %v5288_v20 = vld [vmem:[%s9054_s4 + $0x500] sm:$0xff] }
0x2849   :  { %v4821_v12 = vadd.f32 %v4820_v44, %v4819_v63 }
0x284b   :  { %6806 = vmatmul.mubr.msk.f32.vlgmr.msra.gmra.mrb[48].mxu0 %vm231_vm1, %v4821_v12 }
0x284c   :  { %6851 = vmatprep.mubr.msk.f32.mxu0 %vm7427_vm2, %v9082_v45  ;;  %7201 = vmatpush3.bf16.msra.mxu0 %v7200_v24 }
0x284d   :  { %7202 = vmatprep.subr.bf16.mxu0 %v9083_v4 }
0x2850   :  { %7204 = vmatpush3.bf16.msra.mxu0 %v7203_v60 }
0x2851   :  { %7205 = vmatprep.subr.bf16.mxu0 %v9083_v4 }
0x2854   :  { %7207 = vmatpush3.bf16.msra.mxu0 %v7206_v29  ;;  %v7236_v29 = vpack.c.bf16 %v5290_v37, %v5289_v6 }
0x2855   :  { %7208 = vmatprep.subr.bf16.mxu0 %v9083_v4 }
0x2858   :  { %7210 = vmatpush3.bf16.msra.mxu0 %v7209_v16 }
0x2859   :  { %7211 = vmatprep.subr.bf16.mxu0 %v9083_v4 }
0x285c   :  { %7213 = vmatpush3.bf16.msra.mxu0 %v7212_v31 }
0x285d   :  { %7214 = vmatprep.subr.bf16.mxu0 %v9083_v4 }
0x2860   :  { %7216 = vmatpush3.bf16.msra.mxu0 %v7215_v58  ;;  %v5286_v58 = vld [vmem:[%s9054_s4 + $0x4f0] sm:$0xff] }
0x2861   :  { %7217 = vmatprep.subr.bf16.mxu0 %v9083_v4  ;;  %v7242_v48 = vpack.c.bf16 %v5286_v58, %v5285_v14 }
0x2864   :  { %7219 = vmatpush3.bf16.msra.mxu0 %v7218_v32  ;;  %v5287_v32 = vld [vmem:[%s9054_s4 + $0x4f8] sm:$0xff] }
0x2865   :  { %7220 = vmatprep.subr.bf16.mxu0 %v9083_v4  ;;  %v7245_v7 = vpack.c.bf16 %v5288_v20, %v5287_v32 }
0x2868   :  { %7222 = vmatpush3.bf16.msra.mxu0 %v7221_v33 }
0x2869   :  { %7247 = vmatprep.subr.bf16.mxu0 %v9083_v4 }
0x291e   :  { %v4895_v11 = vpop.f32.mrb[48].mxu0 }
0x291f   :  { %v4899_v23 = vadd.f32 %v4895_v11, %v8652_v18  ;;  %v6807_v13 = vpop.f32.mrb[49].mxu0  ;;  %v4929_v18 = vld [vmem:[%s9055_s5 + $0x68] sm:$0xff] }
0x2920   :  { %v7194_v56 = vpack.c.bf16 %v4929_v18, %v4928_v34  ;;  %v5132_v34 = vld [vmem:[%s9054_s4 + $0x510] sm:$0xff] }
0x2921   :  { %v8777_v38 = vadd.f32 %v4903_v42, %v4899_v23 }
0x2922   :  { %7195 = vmatpush3.bf16.msra.mxu1 %v7194_v56  ;;  %v5133_v56 = vld [vmem:[%s9054_s4 + $0x518] sm:$0xff] }
0x2923   :  { %v4905_v43 = vsel %vm231_vm1, %v8777_v38, 0.0  ;;  %7196 = vmatprep.subr.bf16.mxu1 %v9083_v4  ;;  %v7227_v1 = vpack.c.bf16 %v5134_v57, %v5133_v56  ;;  %v7398_v57 = vld [vmem:[%s9053_s3] sm:$0xff] }
0x2924   :  { %4906 = vadd.xlane.f32.xlu1 %v4905_v43 }
0x2926   :  { %7198 = vmatpush3.bf16.msra.mxu1 %v7197_v55  ;;  %v9099_v55 = vld [vmem:[#allocation5_spill] sm:$0xff] }
0x2927   :  { %7223 = vmatprep.subr.bf16.mxu1 %v9083_v4  ;;  %vm5113_vm0 = vcmp.ne.s32.totalorder %v9099_v55, 4  ;;  %vm5110_vm4 = vcmp.ne.s32.totalorder %v9099_v55, 3 }
0x2928   :  { %v6043_v40 = vsel %vm5113_vm0, 1.0, %v9082_v45  ;;  %v6042_v16 = vsel %vm5110_vm4, 1.0, %v9082_v45 }
0x2929   :  { %v5117_v31 = vmul.f32 %v6042_v16, %v9101_v10  ;;  %v5461_v10 = vld [vmem:[%s9054_s4 + $0x530] sm:$0xff] }
0x29b1   :  { %v4907_v0 = vpop.xlane.xlu1 %4906 }
0x29b2   :  { %v4908_v26 = vmul.f32 0.03125, %v4907_v0 }
0x29b4   :  { %v4909_v50 = vsub.f32 %v8777_v38, %v4908_v26 }
0x29b6   :  { %v4910_v52 = vmul.f32 %v4909_v50, %v4909_v50 }
0x29b8   :  { %v4911_v17 = vsel %vm231_vm1, %v4910_v52, 0.0 }
0x29b9   :  { %4912 = vadd.xlane.f32.xlu0 %v4911_v17  ;;  %v5131_v17 = vld [vmem:[%s9054_s4 + $0x508] sm:$0xff] }
0x29ba   :  { %v7224_v18 = vpack.c.bf16 %v5132_v34, %v5131_v17 }
0x2a46   :  { %v4913_v28 = vpop.xlane.xlu0 %4912 }
0x2a47   :  { %v4914_v61 = vmul.f32 0.03125, %v4913_v28 }
0x2a49   :  { %v4915_v25 = vadd.f32 1e-05, %v4914_v61 }
0x2a4b   :  { %7382 = vrsqrt.f32 %v4915_v25  ;;  %v9100_v25 = vld [vmem:[#allocation6_spill] sm:$0xff] }
0x2a55   :  { %v7383_v51 = vpop.eup %7382 }
0x2a56   :  { %v4917_v62 = vmul.f32 %v7383_v51, %v4909_v50 }
0x2a58   :  { %v4922_v36 = vmul.f32 %v4921_v46, %v4917_v62  ;;  %v5116_v46 = vmul.f32 %v6043_v40, %v9100_v25  ;;  %v5128_v62 = vld [vmem:[%s9054_s4 + $0x4d0] sm:$0xff] }
0x2a5a   :  { %v4927_v8 = vadd.f32 %v4926_v49, %v4922_v36  ;;  %v5127_v49 = vld [vmem:[%s9054_s4 + $0x4c8] sm:$0xff] }
0x2a5c   :  { %6817 = vmatmul.mubr.msk.f32.vlgmr.msra.gmra.mrb[40].mxu1 %vm231_vm1, %v4927_v8  ;;  %v7230_v8 = vpack.c.bf16 %v5128_v62, %v5127_v49 }
0x2a5d   :  { %6862 = vmatprep.mubr.msk.f32.mxu1 %vm7427_vm2, %v9082_v45  ;;  %7225 = vmatpush3.bf16.msra.mxu1 %v7224_v18 }
0x2a5e   :  { %7226 = vmatprep.subr.bf16.mxu1 %v9083_v4 }
0x2a61   :  { %7228 = vmatpush3.bf16.msra.mxu1 %v7227_v1  ;;  %v3392_v1 = vsel %vm3384_vm14, %v7398_v57, 0.0 }
0x2a62   :  { %7229 = vmatprep.subr.bf16.mxu1 %v9083_v4  ;;  %v3393_v55 = vrot.slane %v3392_v1, 4 }
0x2b2f   :  { %v5005_v44 = vpop.f32.mrb[40].mxu1 }
0x2b30   :  { %v5006_v63 = vadd.f32 %v5005_v44, %v4935_v15  ;;  %v6818_v12 = vpop.f32.mrb[41].mxu1  ;;  %v8949_v44 = vld [vmem:[%s9057_s7 + $0x30] sm:$0xf] }
0x2b32   :  { %v5009_v42 = vmul.f32 %v5006_v63, %v5006_v63 }
0x2b34   :  { %v5010_v11 = vmul.f32 %v5009_v42, %v5006_v63 }
0x2b36   :  { %v5011_v23 = vmul.f32 0.044715, %v5010_v11 }
0x2b38   :  { %v5012_v13 = vadd.f32 %v5011_v23, %v5006_v63 }
0x2b3a   :  { %v5013_v43 = vmul.f32 0.7978846, %v5012_v13 }
0x2b3c   :  { %7384 = vtanh.f32 %v5013_v43 }
0x2b46   :  { %v7385_v0 = vpop.eup %7384 }
0x2b47   :  { %v5015_v26 = vadd.f32 1.0, %v7385_v0 }
0x2b49   :  { %v5016_v50 = vmul.f32 0.5, %v5015_v26 }
0x2b4b   :  { %v5017_v52 = vmul.f32 %v5016_v50, %v5006_v63  ;;  %v5283_v63 = vrot.slane %v8949_v44, %v7576_v59  ;;  %v3375_v50 = vsub.f32 %v8411_v21, %v8379_v27  ;;  %v3394_v27 = vadd.f32 %v3393_v55, %v3392_v1 }
0x2b4d   :  { %6852 = vmatmul.mubr.f32.vlgmr.msra.gmra.mrb[50].mxu0 %v5017_v52  ;;  %v3376_v18 = vmul.f32 %v3375_v50, %v3375_v50  ;;  %v5458_v50 = vrot.slane %v8949_v44, %v7527_v19  ;;  %v5619_v19 = vld [vmem:[%s9056_s6 + $0x20] sm:$0xff] }
0x2b4e   :  { %6906 = vmatprep.mubr.msk.f32.mxu0 %vm7427_vm2, %v9082_v45 }
0x2b4f   :  { %v3377_v59 = vsel %vm9102_vm15, %v3376_v18, 0.0 }
0x2c20   :  { %v5100_v24 = vpop.f32.mrb[50].mxu0 }
0x2c21   :  { %v5104_v28 = vadd.f32 %v5100_v24, %v8777_v38  ;;  %v6853_v61 = vpop.f32.mrb[51].mxu0  ;;  %v5130_v38 = vld [vmem:[%s9054_s4 + $0x4e0] sm:$0xff] }
0x2c22   :  { %v7233_v60 = vpack.c.bf16 %v5130_v38, %v5129_v41 }
0x2c23   :  { %v5109_v51 = vadd.f32 %v5108_v47, %v5104_v28  ;;  %v3395_v28 = vrot.slane %v3394_v27, 2 }
0x2c25   :  { %v5119_v36 = vrot.slane %v5109_v51, 7  ;;  %v5123_v30 = vrot.slane %v5109_v51, 1  ;;  %v3396_v25 = vadd.f32 %v3395_v28, %v3394_v27 }
0x2c27   :  { %v5122_v39 = vmul.f32 %v5119_v36, %v5116_v46  ;;  %v5126_v5 = vmul.f32 %v5123_v30, %v5117_v31  ;;  %v3397_v46 = vrot.slane %v3396_v25, 1 }
0x2c29   :  { %6863 = vmatmul.mubr.msk.f32.vlgmr.msra.gmra.mrb[42].mxu1 %vm231_vm1, %v5122_v39  ;;  %v3398_v62 = vadd.f32 %v3397_v46, %v3396_v25 }
0x2c2a   :  { %7231 = vmatpush3.bf16.msra.mxu1 %v7230_v8  ;;  %6873 = vmatprep.mubr.msk.f32.mxu1 %vm7427_vm2, %v9082_v45 }
0x2c2b   :  { %7232 = vmatprep.subr.bf16.mxu1 %v9083_v4  ;;  %v3399_v38 = vmax.f32 %v3398_v62, 1.0 }
0x2c2d   :  { %7386 = vrcp.f32 %v3399_v38 }
0x2c2e   :  { %7234 = vmatpush3.bf16.msra.mxu1 %v7233_v60 }
0x2c2f   :  { %7235 = vmatprep.subr.bf16.mxu1 %v9083_v4 }
0x2c31   :  { %6874 = vmatmul.mubr.msk.f32.vlgmr.msra.gmra.mrb[44].mxu1 %vm231_vm1, %v5109_v51 }
0x2c32   :  { %7237 = vmatpush3.bf16.msra.mxu1 %v7236_v29  ;;  %6884 = vmatprep.mubr.msk.f32.mxu1 %vm7427_vm2, %v9082_v45 }
0x2c33   :  { %7238 = vmatprep.subr.bf16.mxu1 %v9083_v4 }
0x2c36   :  { %7240 = vmatpush3.bf16.msra.mxu1 %v7239_v35  ;;  %v5460_v35 = vld [vmem:[%s9054_s4 + $0x528] sm:$0xff] }
0x2c37   :  { %7241 = vmatprep.subr.bf16.mxu1 %v9083_v4  ;;  %v7248_v30 = vpack.c.bf16 %v5461_v10, %v5460_v35  ;;  %v7387_v58 = vpop.eup %7386 }
0x2c39   :  { %6885 = vmatmul.mubr.msk.f32.vlgmr.msra.gmra.mrb[46].mxu1 %vm231_vm1, %v5126_v5  ;;  %7249 = vmatpush3.bf16.msra.mxu0 %v7248_v30  ;;  %v5463_v5 = vld [vmem:[%s9054_s4 + $0x540] sm:$0xff] }
0x2c3a   :  { %7243 = vmatpush3.bf16.msra.mxu1 %v7242_v48  ;;  %6895 = vmatprep.mubr.msk.f32.mxu1 %vm7427_vm2, %v9082_v45  ;;  %v5462_v48 = vld [vmem:[%s9054_s4 + $0x538] sm:$0xff] }
0x2c3b   :  { %7244 = vmatprep.subr.bf16.mxu1 %v9083_v4  ;;  %7250 = vmatprep.subr.bf16.mxu0 %v9083_v4  ;;  %v7251_v32 = vpack.c.bf16 %v5463_v5, %v5462_v48 }
0x2c3d   :  { %7252 = vmatpush3.bf16.msra.mxu0 %v7251_v32 }
0x2c3e   :  { %7246 = vmatpush3.bf16.msra.mxu1 %v7245_v7  ;;  %7259 = vmatprep.subr.bf16.mxu0 %v9083_v4 }
0x2c3f   :  { %7253 = vmatprep.subr.bf16.mxu1 %v9083_v4 }
0x2c41   :  { %6896 = vmatmul.mubr.msk.f32.vlgmr.msra.gmra.mrb[48].mxu1 %vm231_vm1, %v5109_v51 }
0x2c42   :  { %6917 = vmatprep.mubr.msk.f32.mxu1 %vm7427_vm2, %v9082_v45 }
0x2cfc   :  { %v5204_v33 = vpop.f32.mrb[42].mxu1 }
0x2cfd   :  { %v6864_v15 = vpop.f32.mrb[43].mxu1 }
0x2cfe   :  { %v5538_v15 = vld [vmem:[%s9054_s4 + $0x550] sm:$0xff] }
0x2d04   :  { %v5276_v12 = vpop.f32.mrb[44].mxu1 }
0x2d05   :  { %v5277_v42 = vadd.f32 %v5276_v12, %v5204_v33  ;;  %v6875_v11 = vpop.f32.mrb[45].mxu1  ;;  %v5537_v33 = vld [vmem:[%s9054_s4 + $0x548] sm:$0xff] }
0x2d06   :  { %v7254_v12 = vpack.c.bf16 %v5538_v15, %v5537_v33 }
0x2d07   :  { %v5284_v23 = vadd.f32 %v5283_v63, %v5277_v42  ;;  %v5540_v42 = vld [vmem:[%s9054_s4 + $0x560] sm:$0xff] }
0x2d08   :  { %7255 = vmatpush3.bf16.msra.mxu1 %v7254_v12 }
0x2d09   :  { %v5437_v13 = vsel %vm231_vm1, %v5284_v23, 0.0  ;;  %7256 = vmatprep.subr.bf16.mxu1 %v9083_v4 }
0x2d0a   :  { %5438 = vadd.xlane.f32.xlu1 %v5437_v13 }
0x2d0c   :  { %v5362_v43 = vpop.f32.mrb[46].mxu1 }
0x2d0d   :  { %v6886_v0 = vpop.f32.mrb[47].mxu1 }
0x2d0e   :  { %v5453_v0 = vrot.slane %v8863_v9, %v7819_v2  ;;  %v5620_v9 = vld [vmem:[%s9056_s6 + $0x28] sm:$0xff] }
0x2d14   :  { %v5432_v26 = vpop.f32.mrb[48].mxu1 }
0x2d15   :  { %v5433_v52 = vadd.f32 %v5432_v26, %v5362_v43  ;;  %v6897_v17 = vpop.f32.mrb[49].mxu1 }
0x2d17   :  { %v5436_v34 = vadd.f32 %v5433_v52, %v5283_v63  ;;  %v5539_v63 = vld [vmem:[%s9054_s4 + $0x558] sm:$0xff] }
0x2d18   :  { %v7257_v11 = vpack.c.bf16 %v5540_v42, %v5539_v63 }
0x2d19   :  { %v5700_v56 = vsel %vm231_vm1, %v5436_v34, 0.0 }
0x2d1a   :  { %5701 = vadd.xlane.f32.xlu1 %v5700_v56  ;;  %7258 = vmatpush3.bf16.msra.mxu1 %v7257_v11 }
0x2d1b   :  { %7265 = vmatprep.subr.bf16.mxu1 %v9083_v4 }
0x2d1e   :  { %3378 = vadd.xlane.f32.xlu1 %v3377_v59 }
0x2d97   :  { %v5439_v47 = vpop.xlane.xlu1 %5438 }
0x2d98   :  { %v5440_v40 = vmul.f32 0.03125, %v5439_v47  ;;  %v7260_v47 = vpack.c.bf16 %v5620_v9, %v5619_v19 }
0x2d9a   :  { %v5441_v21 = vsub.f32 %v5284_v23, %v5440_v40 }
0x2d9c   :  { %v5442_v24 = vmul.f32 %v5441_v21, %v5441_v21 }
0x2d9e   :  { %v5443_v61 = vsel %vm231_vm1, %v5442_v24, 0.0  ;;  %v5622_v24 = vld [vmem:[%s9056_s6 + $0x38] sm:$0xff] }
0x2d9f   :  { %5444 = vadd.xlane.f32.xlu0 %v5443_v61  ;;  %v5544_v61 = vrot.slane %v8949_v44, %v7658_v53 }
0x2da7   :  { %v5702_v51 = vpop.xlane.xlu1 %5701 }
0x2da8   :  { %v5703_v49 = vmul.f32 0.03125, %v5702_v51 }
0x2daa   :  { %v5704_v36 = vsub.f32 %v5436_v34, %v5703_v49 }
0x2dab   :  { %v3379_v8 = vpop.xlane.xlu1 %3378 }
0x2dac   :  { %v3381_v39 = vmul.f32 0.0625, %v3379_v8  ;;  %v5705_v41 = vmul.f32 %v5704_v36, %v5704_v36 }
0x2dae   :  { %v3382_v60 = vmul.f32 2.0, %v3381_v39  ;;  %v5706_v6 = vsel %vm231_vm1, %v5705_v41, 0.0 }
0x2daf   :  { %5707 = vadd.xlane.f32.xlu0 %v5706_v6 }
0x2db0   :  { %v3383_v37 = vmul.f32 %v7398_v57, %v3382_v60 }
0x2db2   :  { %v3385_v29 = vsel %vm3384_vm14, %v3383_v37, 0.0 }
0x2db3   :  { %v3386_v3 = vrot.slane %v3385_v29, 4 }
0x2db5   :  { %v3387_v22 = vadd.f32 %v3386_v3, %v3385_v29 }
0x2db7   :  { %v3388_v16 = vrot.slane %v3387_v22, 2 }
0x2db9   :  { %v3389_v31 = vadd.f32 %v3388_v16, %v3387_v22 }
0x2dbb   :  { %v3390_v14 = vrot.slane %v3389_v31, 1 }
0x2dbd   :  { %v3391_v20 = vadd.f32 %v3390_v14, %v3389_v31 }
0x2dbf   :  { %v3401_v7 = vmul.f32 %v7387_v58, %v3391_v20 }
0x2dc1   :  { %3403 = vst.msk [vmem:[#allocation2] sm:$0x1] %vm3402_vm5, %v3401_v7 }
0x2e2c   :  { %v5445_v23 = vpop.xlane.xlu0 %5444 }
0x2e2d   :  { %v5446_v13 = vmul.f32 0.03125, %v5445_v23 }
0x2e2f   :  { %v5447_v43 = vadd.f32 1e-05, %v5446_v13 }
0x2e31   :  { %7388 = vrsqrt.f32 %v5447_v43 }
0x2e3b   :  { %v7389_v26 = vpop.eup %7388 }
0x2e3c   :  { %v5449_v52 = vmul.f32 %v7389_v26, %v5441_v21  ;;  %v5708_v17 = vpop.xlane.xlu0 %5707  ;;  %v5621_v21 = vld [vmem:[%s9056_s6 + $0x30] sm:$0xff]  ;;  %s7428_s6 = smov [#allocation2]  }
0x2e3d   :  { %v5709_v34 = vmul.f32 0.03125, %v5708_v17  ;;  %v7263_v28 = vpack.c.bf16 %v5622_v24, %v5621_v21  ;;  %s5951_s9 = sshll.u32 %s7428_s6, 4  ;;  %s5952_s9 = int_to_ptr.vmem [resolvable:$true] %s5951_s9 }
0x2e3e   :  { %v5454_v18 = vmul.f32 %v5453_v0, %v5449_v52  ;;  %s7399_s17 = scalar_lea.vmem %s5952_s9, 16  ;;  %s7403_s7 = scalar_lea.vmem %s5952_s9, 32 }
0x2e3f   :  { %v5710_v56 = vadd.f32 1e-05, %v5709_v34  ;;  %p7400_p0 = scmp.ne.s32.totalorder %s5952_s9, %s7399_s17  ;;  %p7404_p1 = scmp.lt.s32.totalorder %s5952_s9, %s5952_s9 }
0x2e40   :  { %v5459_v59 = vadd.f32 %v5458_v50, %v5454_v18  ;;  %p7405_p2 = scmp.lt.s32.totalorder %s7403_s7, %s7399_s17 }
0x2e41   :  { %7390 = vrsqrt.f32 %v5710_v56 }
0x2e42   :  { %6907 = vmatmul.mubr.msk.f32.vlgmr.msra.gmra.mrb[52].mxu0 %vm231_vm1, %v5459_v59  ;;  %p7406_p3 = por %p7405_p2, %p7404_p1 }
0x2e43   :  { %6928 = vmatprep.mubr.msk.f32.mxu0 %vm7427_vm2, %v9082_v45  ;;  %7261 = vmatpush3.bf16.msra.mxu0 %v7260_v47 }
0x2e44   :  { %7262 = vmatprep.subr.bf16.mxu0 %v9083_v4  ;;  %p7407_p4 = pnand %p7406_p3, %p7400_p0 }
0x2e47   :  { %7264 = vmatpush3.bf16.msra.mxu0 %v7263_v28 }
0x2e48   :  { %7271 = vmatprep.subr.bf16.mxu0 %v9083_v4 }
0x2e4b   :  { %v7391_v57 = vpop.eup %7390 }
0x2e4c   :  { %v5712_v1 = vmul.f32 %v7391_v57, %v5704_v36 }
0x2e4e   :  { %v5713_v55 = vmul.f32 %v5712_v1, %v5453_v0 }
0x2e50   :  { %v5714_v2 = vadd.f32 %v5713_v55, %v5458_v50 }
0x2f15   :  { %v5533_v40 = vpop.f32.mrb[52].mxu0 }
0x2f16   :  { %v6908_v27 = vpop.f32.mrb[53].mxu0  ;;  %6918 = vmatmul.mubr.msk.f32.vlgmr.msra.gmra.mrb[50].mxu1 %vm231_vm1, %v5533_v40 }
0x2f17   :  { %7267 = vmatpush3.bf16.msra.mxu1 %v7248_v30  ;;  %6939 = vmatprep.mubr.msk.f32.mxu1 %vm7427_vm2, %v9082_v45 }
0x2f18   :  { %7268 = vmatprep.subr.bf16.mxu1 %v9083_v4 }
0x2f1b   :  { %7270 = vmatpush3.bf16.msra.mxu1 %v7251_v32 }
0x2f1c   :  { %7277 = vmatprep.subr.bf16.mxu1 %v9083_v4 }
0x2f1e   :  { %6940 = vmatmul.mubr.msk.f32.vlgmr.msra.gmra.mrb[52].mxu1 %vm231_vm1, %v5714_v2 }
0x2f1f   :  { %7279 = vmatpush3.bf16.msra.mxu1 %v7260_v47  ;;  %6961 = vmatprep.mubr.msk.f32.mxu1 %vm7427_vm2, %v9082_v45 }
0x2f20   :  { %7280 = vmatprep.subr.bf16.mxu1 %v9083_v4 }
0x2f23   :  { %7282 = vmatpush3.bf16.msra.mxu1 %v7263_v28 }
0x2fe9   :  { %v5614_v25 = vpop.f32.mrb[50].mxu1 }
0x2fea   :  { %v5615_v46 = vadd.f32 %v5614_v25, %v5544_v61  ;;  %v6919_v51 = vpop.f32.mrb[51].mxu1 }
0x2fec   :  { %v5618_v49 = vmax.f32 %v5615_v46, 0.0 }
0x2fee   :  { %6929 = vmatmul.mubr.msk.f32.vlgmr.msra.gmra.mrb[54].mxu0 %vm231_vm1, %v5618_v49 }
0x2fef   :  { %7273 = vmatpush3.bf16.msra.mxu0 %v7254_v12  ;;  %6950 = vmatprep.mubr.msk.f32.mxu0 %vm7427_vm2, %v9082_v45 }
0x2ff0   :  { %7274 = vmatprep.subr.bf16.mxu0 %v9083_v4 }
0x2ff1   :  { %v5784_v62 = vpop.f32.mrb[52].mxu1 }
0x2ff2   :  { %v6941_v36 = vpop.f32.mrb[53].mxu1 }
0x2ff3   :  { %7276 = vmatpush3.bf16.msra.mxu0 %v7257_v11 }
0x2ff6   :  { %6951 = vmatmul.mubr.msk.f32.vlgmr.msra.gmra.mrb[56].mxu0 %vm231_vm1, %v5784_v62 }
0x30c1   :  { %v5696_v8 = vpop.f32.mrb[54].mxu0 }
0x30c2   :  { %v6930_v39 = vpop.f32.mrb[55].mxu0 }
0x30c9   :  { %v5857_v53 = vpop.f32.mrb[56].mxu0 }
0x30ca   :  { %v5858_v41 = vadd.f32 %v5857_v53, %v5544_v61  ;;  %v6952_v38 = vpop.f32.mrb[57].mxu0 }
0x30cc   :  { %v5861_v60 = vmax.f32 %v5858_v41, 0.0 }
0x30ce   :  { %6962 = vmatmul.mubr.msk.f32.vlgmr.msra.gmra.mrb[54].mxu1 %vm231_vm1, %v5861_v60 }
0x30cf   :  { %7410 = shalt.err (!%p7407_p4)
}
0x30d0   :  { %s7411_s19 = scalar_lea.hbm %s9060_s10, 16 }
0x30d1   :  { %p7412_p5 = scmp.ne.s32.totalorder %s9060_s10, %s7411_s19  ;;  %p7415_p6 = scmp.lt.u32.totalorder %s7411_s19, %s9060_s10 }
0x30d3   :  { %p7417_p7 = pnand %p7415_p6, %p7412_p5 }
0x30d5   :  { %7420 = shalt.err (!%p7417_p7)
}
0x30d6   :  { %5954 = dma.vmem_to_hbm [thread:$0]  %s5952_s9, 16, %s9060_s10, [#allocation3]   ;;  %v5626_v45 = vrot.slane %v8949_v44, %v7661_v54  ;;  %vm9103_vm2 = vmmov %vm9098_vm3 }
0x30d7   :  { %s7429_s26 = smov 16  }
0x30d8   :  { %v5697_v29 = vadd.f32 %v5696_v8, %v5626_v45 }
0x31a1   :  { %v5931_v4 = vpop.f32.mrb[54].mxu1 }
0x31a2   :  { %v5932_v6 = vadd.f32 %v5931_v4, %v5626_v45  ;;  %v6963_v37 = vpop.f32.mrb[55].mxu1 }
0x31a4   :  { %5936 = vrot.lane.b32.xlu0 %v5932_v6, %s7429_s26 }
0x3216   :  { %v5937_v3 = vpop.permute.xlu0 %5936 }
0x3217   :  { %v5939_v22 = vsel %vm9103_vm2, %v5697_v29, %v5937_v3 }
0x3218   :  { %5940 = vst.msk [vmem:[%s9058_s8] sm:$0xff] %vm231_vm1, %v5939_v22 }
0x3219   :  { %7421 = dma.done.wait [#allocation3], 16  }
0x321a   :  { %7422 = vsyncadd [#allocation3], 4294967280 }
0x321b   :  { %5962 = vsyncpa [#allocation3], 1 }

</bundles_post_ra>
